<compile_context>
chip_gen: v7x
topology: tpu7x:2x2x1
jax: 0.10.0
libtpu: 0.0.40
codegen_flags: <defaults>
</compile_context>

<pallas_src>
import functools
import math

import jax
import jax.numpy as jnp
from jax.experimental import pallas as pl
from jax.experimental.pallas import tpu as pltpu

HIDDEN = 750        # logical hidden size (matches the PyTorch module)
HIDDEN_PAD = 768    # padded hidden size: 6 * 128, MXU/lane aligned
OUT_LANES = 128     # lane-dense packed-output width


def _round_up(x, m):
    return (x + m - 1) // m * m


# --------------------------------------------------------------------------
# Kernel
# --------------------------------------------------------------------------
def _vae_kernel(
    sa_ref,            # (bm, S+A)  bf16   cat([state, action], 1)
    eps_ref,           # (bm, L)    f32    standard normal noise
    w_e1, b_e1,        # (S+A, H) bf16, (1, H) f32
    w_e2, b_e2,        # (H, H)   bf16, (1, H) f32
    w_ml, b_ml,        # (H, 2L)  bf16, (1, 2L) f32   fused [mean | log_std]
    w_d1s, w_d1z, b_d1,# (S+A, H) bf16 (action rows zeroed), (L, H) bf16, (1, H) f32
    w_d2, b_d2,        # (H, H)   bf16, (1, H) f32
    w_d3, b_d3,        # (H, A)   bf16, (1, A) f32
    out_ref,           # (bm, OUT_LANES) f32   packed [u | mean | std | 0]
    *, state_dim, action_dim, latent_dim, out_pad,
):
    f32 = jnp.float32
    bf16 = jnp.bfloat16
    A, L = action_dim, latent_dim
    del state_dim  # decoder reuses the full sa block (action rows of w_d1s are zero)

    sa = sa_ref[...]                                            # bf16 (bm, S+A)

    # ---------------- encoder ----------------
    h = jnp.dot(sa, w_e1[...], preferred_element_type=f32) + b_e1[...]
    h = jnp.maximum(h, 0.0)                                     # relu(e1)
    h = jnp.dot(h.astype(bf16), w_e2[...], preferred_element_type=f32) + b_e2[...]
    h = jnp.maximum(h, 0.0)                                     # relu(e2)

    # fused mean / log_std head: one K=H matmul, split with static lane slices
    ml = jnp.dot(h.astype(bf16), w_ml[...], preferred_element_type=f32) + b_ml[...]
    mean = ml[:, :L]
    log_std = jnp.clip(ml[:, L:], -4.0, 15.0)                   # .clamp(-4, 15)
    std = jnp.exp(log_std)

    # ---------------- reparameterize ----------------
    z = mean + std * eps_ref[...]                               # randn_like -> eps

    # ---------------- decoder ----------------
    # d1(cat([state, z])) = dot(sa, w_d1s) + dot(z, w_d1z) + b_d1
    # (w_d1s has zero rows for the action part, so only state contributes)
    a = (jnp.dot(sa, w_d1s[...], preferred_element_type=f32)
         + jnp.dot(z.astype(bf16), w_d1z[...], preferred_element_type=f32)
         + b_d1[...])
    a = jnp.maximum(a, 0.0)                                     # relu(d1)
    a = jnp.dot(a.astype(bf16), w_d2[...], preferred_element_type=f32) + b_d2[...]
    a = jnp.maximum(a, 0.0)                                     # relu(d2)
    u = jnp.dot(a.astype(bf16), w_d3[...], preferred_element_type=f32) + b_d3[...]

    # lane-dense packed output: [ u | mean | std | zeros ] — one unmasked store
    bm = out_ref.shape[0]
    parts = [u, mean, std]
    pad = out_pad - (A + 2 * L)
    if pad:
        parts.append(jnp.zeros((bm, pad), f32))
    out_ref[...] = jnp.concatenate(parts, axis=1)


# --------------------------------------------------------------------------
# Parameter construction (PyTorch-like init, logical shapes)
# --------------------------------------------------------------------------
def _linear_params(key, in_dim, out_dim):
    """Deterministic PyTorch-like nn.Linear init. Weight returned as (in, out)."""
    kw, kb = jax.random.split(key)
    bound = 1.0 / math.sqrt(in_dim)
    w = jax.random.uniform(kw, (in_dim, out_dim), jnp.float32, -bound, bound)
    b = jax.random.uniform(kb, (1, out_dim), jnp.float32, -bound, bound)
    return w, b


def make_vae_params(key, state_dim, action_dim, latent_dim):
    """Logical (unpadded, unfused) parameters — mirrors the PyTorch module."""
    keys = jax.random.split(key, 7)
    w_e1, b_e1 = _linear_params(keys[0], state_dim + action_dim, HIDDEN)
    w_e2, b_e2 = _linear_params(keys[1], HIDDEN, HIDDEN)
    w_mu, b_mu = _linear_params(keys[2], HIDDEN, latent_dim)
    w_ls, b_ls = _linear_params(keys[3], HIDDEN, latent_dim)
    w_d1, b_d1 = _linear_params(keys[4], state_dim + latent_dim, HIDDEN)
    w_d2, b_d2 = _linear_params(keys[5], HIDDEN, HIDDEN)
    w_d3, b_d3 = _linear_params(keys[6], HIDDEN, action_dim)
    return dict(
        w_e1=w_e1, b_e1=b_e1, w_e2=w_e2, b_e2=b_e2,
        w_mu=w_mu, b_mu=b_mu, w_ls=w_ls, b_ls=b_ls,
        w_d1=w_d1, b_d1=b_d1, w_d2=w_d2, b_d2=b_d2,
        w_d3=w_d3, b_d3=b_d3,
    )


def pack_vae_params(params, hidden_pad=HIDDEN_PAD):
    """Pad hidden 750->768, fuse [mean|log_std], split d1, cast weights to bf16."""
    h = params["w_e1"].shape[1]
    ph = hidden_pad - h
    L = params["w_mu"].shape[1]
    A = params["w_d3"].shape[1]
    S = params["w_d1"].shape[0] - L

    pad_cols = lambda w: jnp.pad(w, ((0, 0), (0, ph)))
    pad_rows = lambda w: jnp.pad(w, ((0, ph), (0, 0)))

    w_ml = pad_rows(jnp.concatenate([params["w_mu"], params["w_ls"]], axis=1))
    b_ml = jnp.concatenate([params["b_mu"], params["b_ls"]], axis=1)

    # d1 split: state half laid out over the full (S+A) sa input with zeroed
    # action rows (so the kernel reuses sa without slicing) + separate z half.
    w_d1s = jnp.pad(pad_cols(params["w_d1"][:S]), ((0, A), (0, 0)))
    w_d1z = pad_cols(params["w_d1"][S:])

    bf16, f32 = jnp.bfloat16, jnp.float32
    return dict(
        w_e1=pad_cols(params["w_e1"]).astype(bf16), b_e1=pad_cols(params["b_e1"]).astype(f32),
        w_e2=pad_cols(pad_rows(params["w_e2"])).astype(bf16), b_e2=pad_cols(params["b_e2"]).astype(f32),
        w_ml=w_ml.astype(bf16), b_ml=b_ml.astype(f32),
        w_d1s=w_d1s.astype(bf16), w_d1z=w_d1z.astype(bf16),
        b_d1=pad_cols(params["b_d1"]).astype(f32),
        w_d2=pad_cols(pad_rows(params["w_d2"])).astype(bf16), b_d2=pad_cols(params["b_d2"]).astype(f32),
        w_d3=pad_rows(params["w_d3"]).astype(bf16), b_d3=params["b_d3"].astype(f32),
    )


# --------------------------------------------------------------------------
# Wrapper
# --------------------------------------------------------------------------
def vae_forward(packed, state, action, eps, *, block_b=256):
    """Pallas equivalent of VAE.forward(state, action) -> (u, mean, std).

    block_b: batch tile rows.  256 fills the 2x256 MXU on v6e/v7x; use 128
    on v5e (4x128 MXU).  At small B this degenerates to a single tile.
    """
    B, S = state.shape
    A = action.shape[1]
    L = eps.shape[1]
    H = packed["w_e1"].shape[1]          # padded hidden (768)
    out_cols = A + 2 * L
    out_pad = max(OUT_LANES, _round_up(out_cols, OUT_LANES))

    # batch tiling: multiples of 16 rows (bf16 packs 16 sublanes per vreg)
    bm = min(_round_up(block_b, 16), _round_up(B, 16))
    B_pad = _round_up(B, bm)
    nb = B_pad // bm

    def pad_b(x):
        return jnp.pad(x, ((0, B_pad - B), (0, 0))) if B_pad != B else x

    sa = pad_b(jnp.concatenate([state, action], axis=1)).astype(jnp.bfloat16)
    eps_f = pad_b(eps.astype(jnp.float32))

    weights = (
        packed["w_e1"], packed["b_e1"], packed["w_e2"], packed["b_e2"],
        packed["w_ml"], packed["b_ml"],
        packed["w_d1s"], packed["w_d1z"], packed["b_d1"],
        packed["w_d2"], packed["b_d2"],
        packed["w_d3"], packed["b_d3"],
    )
    inputs = (sa, eps_f) + weights

    def act_spec(cols):
        return pl.BlockSpec((bm, cols), lambda i: (i, 0))

    # Constant-index weights are DMA'd once and stay VMEM-resident.  When the
    # grid actually iterates, single-buffer them (they are never re-fetched,
    # so a second pipeline buffer is pure VMEM waste).
    weight_kwargs = {"pipeline_mode": pl.Buffered(1)} if nb > 1 else {}

    def const_spec(arr):  # whole array, same block every grid step
        return pl.BlockSpec(arr.shape, lambda i: (0, 0), **weight_kwargs)

    in_specs = [act_spec(S + A), act_spec(L)] + [const_spec(a) for a in weights]
    out_spec = pl.BlockSpec((bm, out_pad), lambda i: (i, 0))
    out_shape = jax.ShapeDtypeStruct((B_pad, out_pad), jnp.float32)

    # advisory cost estimate for XLA's scheduler
    flops = 2 * B_pad * ((S + A) * H + H * H + H * 2 * L
                         + (S + A) * H + L * H + H * H + H * A)
    weight_bytes = sum(int(v.size) * v.dtype.itemsize for v in weights)
    io_bytes = (sum(int(x.size) * x.dtype.itemsize for x in (sa, eps_f))
                + B_pad * out_pad * 4)
    cost = pl.CostEstimate(flops=flops, transcendentals=B_pad * L,
                           bytes_accessed=weight_bytes + io_bytes)

    kernel = functools.partial(_vae_kernel, state_dim=S, action_dim=A,
                               latent_dim=L, out_pad=out_pad)

    packed_out = pl.pallas_call(
        kernel,
        out_shape=out_shape,
        grid=(nb,),
        in_specs=in_specs,
        out_specs=out_spec,
        compiler_params=pltpu.CompilerParams(dimension_semantics=("parallel",)),
        cost_estimate=cost,
    )(*inputs)

    u = packed_out[:B, :A]
    mean = packed_out[:B, A:A + L]
    std = packed_out[:B, A + L:A + 2 * L]
    return u, mean, std


# --------------------------------------------------------------------------
# Pure-JAX reference (precision-matched: bf16 matmul operands, f32 accumulate)
# --------------------------------------------------------------------------
def _reference_forward(params, state, action, eps):
    bf16, f32 = jnp.bfloat16, jnp.float32

    def mm(x, w):
        return jnp.dot(x.astype(bf16), w.astype(bf16), preferred_element_type=f32)

    sa = jnp.concatenate([state, action], axis=1)
    h = jax.nn.relu(mm(sa, params["w_e1"]) + params["b_e1"])
    h = jax.nn.relu(mm(h, params["w_e2"]) + params["b_e2"])
    mean = mm(h, params["w_mu"]) + params["b_mu"]
    log_std = jnp.clip(mm(h, params["w_ls"]) + params["b_ls"], -4.0, 15.0)
    std = jnp.exp(log_std)
    z = mean + std * eps
    sz = jnp.concatenate([state, z], axis=1)
    a = jax.nn.relu(mm(sz, params["w_d1"]) + params["b_d1"])
    a = jax.nn.relu(mm(a, params["w_d2"]) + params["b_d2"])
    u = mm(a, params["w_d3"]) + params["b_d3"]
    return u, mean, std


if __name__ == "__main__":
    # Small shapes consistent with the module.
    B, STATE_DIM, ACTION_DIM, LATENT_DIM = 4, 16, 8, 16

    root = jax.random.PRNGKey(0)
    k_params, k_state, k_action, k_eps = jax.random.split(root, 4)

    params = make_vae_params(k_params, STATE_DIM, ACTION_DIM, LATENT_DIM)
    packed = pack_vae_params(params)

    state = jax.random.normal(k_state, (B, STATE_DIM), jnp.float32)
    action = jax.random.normal(k_action, (B, ACTION_DIM), jnp.float32)
    # torch.randn_like(std) -> deterministic standard-normal noise passed in.
    eps = jax.random.normal(k_eps, (B, LATENT_DIM), jnp.float32)

    u, mean, std = vae_forward(packed, state, action, eps)
    jax.block_until_ready((u, mean, std))

    # correctness check against a precision-matched pure-JAX reference
    u_ref, mean_ref, std_ref = _reference_forward(params, state, action, eps)
    assert jnp.allclose(u, u_ref, atol=2e-3, rtol=2e-3), "u mismatch"
    assert jnp.allclose(mean, mean_ref, atol=2e-3, rtol=2e-3), "mean mismatch"
    assert jnp.allclose(std, std_ref, atol=2e-3, rtol=2e-3), "std mismatch"

    print("KERNEL_OK")
</pallas_src>

<mosaic_0001>
module attributes {stable_mosaic.version = 11 : i64} {
  func.func @_vae_kernel(%arg0: i32, %arg1: memref<16x24xbf16, #tpu.memory_space<vmem>>, %arg2: memref<16x16xf32, #tpu.memory_space<vmem>>, %arg3: memref<24x768xbf16, #tpu.memory_space<vmem>>, %arg4: memref<1x768xf32, #tpu.memory_space<vmem>>, %arg5: memref<768x768xbf16, #tpu.memory_space<vmem>>, %arg6: memref<1x768xf32, #tpu.memory_space<vmem>>, %arg7: memref<768x32xbf16, #tpu.memory_space<vmem>>, %arg8: memref<1x32xf32, #tpu.memory_space<vmem>>, %arg9: memref<24x768xbf16, #tpu.memory_space<vmem>>, %arg10: memref<16x768xbf16, #tpu.memory_space<vmem>>, %arg11: memref<1x768xf32, #tpu.memory_space<vmem>>, %arg12: memref<768x768xbf16, #tpu.memory_space<vmem>>, %arg13: memref<1x768xf32, #tpu.memory_space<vmem>>, %arg14: memref<768x8xbf16, #tpu.memory_space<vmem>>, %arg15: memref<1x8xf32, #tpu.memory_space<vmem>>, %arg16: memref<16x128xf32, #tpu.memory_space<vmem>>) attributes {dimension_semantics = [#tpu.dimension_semantics<parallel>], iteration_bounds = array<i64: 1>, scalar_prefetch = 0 : i64, scratch_operands = 0 : i64, tpu.core_type = #tpu.core_type<tc>, window_params = [{transform_indices = @transform_0, window_bounds = array<i64: 16, 24>}, {transform_indices = @transform_1, window_bounds = array<i64: 16, 16>}, {pipeline_mode = #tpu.pipeline_mode<synchronous>, transform_indices = @transform_2, window_bounds = array<i64: 24, 768>}, {pipeline_mode = #tpu.pipeline_mode<synchronous>, transform_indices = @transform_3, window_bounds = array<i64: 1, 768>}, {pipeline_mode = #tpu.pipeline_mode<synchronous>, transform_indices = @transform_4, window_bounds = array<i64: 768, 768>}, {pipeline_mode = #tpu.pipeline_mode<synchronous>, transform_indices = @transform_5, window_bounds = array<i64: 1, 768>}, {pipeline_mode = #tpu.pipeline_mode<synchronous>, transform_indices = @transform_6, window_bounds = array<i64: 768, 32>}, {pipeline_mode = #tpu.pipeline_mode<synchronous>, transform_indices = @transform_7, window_bounds = array<i64: 1, 32>}, {pipeline_mode = #tpu.pipeline_mode<synchronous>, transform_indices = @transform_8, window_bounds = array<i64: 24, 768>}, {pipeline_mode = #tpu.pipeline_mode<synchronous>, transform_indices = @transform_9, window_bounds = array<i64: 16, 768>}, {pipeline_mode = #tpu.pipeline_mode<synchronous>, transform_indices = @transform_10, window_bounds = array<i64: 1, 768>}, {pipeline_mode = #tpu.pipeline_mode<synchronous>, transform_indices = @transform_11, window_bounds = array<i64: 768, 768>}, {pipeline_mode = #tpu.pipeline_mode<synchronous>, transform_indices = @transform_12, window_bounds = array<i64: 1, 768>}, {pipeline_mode = #tpu.pipeline_mode<synchronous>, transform_indices = @transform_13, window_bounds = array<i64: 768, 8>}, {pipeline_mode = #tpu.pipeline_mode<synchronous>, transform_indices = @transform_14, window_bounds = array<i64: 1, 8>}, {transform_indices = @transform_15, window_bounds = array<i64: 16, 128>}]} {
    %c0 = arith.constant 0 : index
    %c0_0 = arith.constant 0 : index
    %0 = vector.load %arg1[%c0, %c0_0] : memref<16x24xbf16, #tpu.memory_space<vmem>>, vector<16x24xbf16>
    %c0_1 = arith.constant 0 : index
    %c0_2 = arith.constant 0 : index
    %1 = vector.load %arg3[%c0_1, %c0_2] : memref<24x768xbf16, #tpu.memory_space<vmem>>, vector<24x768xbf16>
    %cst = arith.constant dense<0.000000e+00> : vector<16x768xf32>
    %2 = tpu.matmul %0, %1, %cst {dimension_numbers = #tpu.dot_dimension_numbers<[1], [0], [0], [1], [0, 0, 1, 1], [], []>} : vector<16x24xbf16>, vector<24x768xbf16>, vector<16x768xf32> -> vector<16x768xf32>
    %c0_3 = arith.constant 0 : index
    %c0_4 = arith.constant 0 : index
    %3 = vector.load %arg4[%c0_3, %c0_4] : memref<1x768xf32, #tpu.memory_space<vmem>>, vector<1x768xf32>
    %4 = vector.broadcast %3 : vector<1x768xf32> to vector<16x768xf32>
    %5 = arith.addf %2, %4 : vector<16x768xf32>
    %cst_5 = arith.constant 0.000000e+00 : f32
    %6 = vector.broadcast %cst_5 : f32 to vector<16x768xf32>
    %7 = arith.maximumf %5, %6 : vector<16x768xf32>
    %8 = arith.truncf %7 : vector<16x768xf32> to vector<16x768xbf16>
    %c0_6 = arith.constant 0 : index
    %c0_7 = arith.constant 0 : index
    %9 = vector.load %arg5[%c0_6, %c0_7] : memref<768x768xbf16, #tpu.memory_space<vmem>>, vector<768x768xbf16>
    %cst_8 = arith.constant dense<0.000000e+00> : vector<16x768xf32>
    %10 = tpu.matmul %8, %9, %cst_8 {dimension_numbers = #tpu.dot_dimension_numbers<[1], [0], [0], [1], [0, 0, 1, 1], [], []>} : vector<16x768xbf16>, vector<768x768xbf16>, vector<16x768xf32> -> vector<16x768xf32>
    %c0_9 = arith.constant 0 : index
    %c0_10 = arith.constant 0 : index
    %11 = vector.load %arg6[%c0_9, %c0_10] : memref<1x768xf32, #tpu.memory_space<vmem>>, vector<1x768xf32>
    %12 = vector.broadcast %11 : vector<1x768xf32> to vector<16x768xf32>
    %13 = arith.addf %10, %12 : vector<16x768xf32>
    %cst_11 = arith.constant 0.000000e+00 : f32
    %14 = vector.broadcast %cst_11 : f32 to vector<16x768xf32>
    %15 = arith.maximumf %13, %14 : vector<16x768xf32>
    %16 = arith.truncf %15 : vector<16x768xf32> to vector<16x768xbf16>
    %c0_12 = arith.constant 0 : index
    %c0_13 = arith.constant 0 : index
    %17 = vector.load %arg7[%c0_12, %c0_13] : memref<768x32xbf16, #tpu.memory_space<vmem>>, vector<768x32xbf16>
    %cst_14 = arith.constant dense<0.000000e+00> : vector<16x32xf32>
    %18 = tpu.matmul %16, %17, %cst_14 {dimension_numbers = #tpu.dot_dimension_numbers<[1], [0], [0], [1], [0, 0, 1, 1], [], []>} : vector<16x768xbf16>, vector<768x32xbf16>, vector<16x32xf32> -> vector<16x32xf32>
    %c0_15 = arith.constant 0 : index
    %c0_16 = arith.constant 0 : index
    %19 = vector.load %arg8[%c0_15, %c0_16] : memref<1x32xf32, #tpu.memory_space<vmem>>, vector<1x32xf32>
    %20 = vector.broadcast %19 : vector<1x32xf32> to vector<16x32xf32>
    %21 = arith.addf %18, %20 : vector<16x32xf32>
    %22 = vector.extract_strided_slice %21 {offsets = [0, 0], sizes = [16, 16], strides = [1, 1]} : vector<16x32xf32> to vector<16x16xf32>
    %23 = vector.extract_strided_slice %21 {offsets = [0, 16], sizes = [16, 16], strides = [1, 1]} : vector<16x32xf32> to vector<16x16xf32>
    %cst_17 = arith.constant -4.000000e+00 : f32
    %cst_18 = arith.constant 1.500000e+01 : f32
    %24 = vector.broadcast %cst_17 : f32 to vector<16x16xf32>
    %25 = arith.maximumf %24, %23 : vector<16x16xf32>
    %26 = vector.broadcast %cst_18 : f32 to vector<16x16xf32>
    %27 = arith.minimumf %26, %25 : vector<16x16xf32>
    %28 = math.exp %27 : vector<16x16xf32>
    %c0_19 = arith.constant 0 : index
    %c0_20 = arith.constant 0 : index
    %29 = vector.load %arg2[%c0_19, %c0_20] : memref<16x16xf32, #tpu.memory_space<vmem>>, vector<16x16xf32>
    %30 = arith.mulf %28, %29 : vector<16x16xf32>
    %31 = arith.addf %22, %30 : vector<16x16xf32>
    %c0_21 = arith.constant 0 : index
    %c0_22 = arith.constant 0 : index
    %32 = vector.load %arg9[%c0_21, %c0_22] : memref<24x768xbf16, #tpu.memory_space<vmem>>, vector<24x768xbf16>
    %cst_23 = arith.constant dense<0.000000e+00> : vector<16x768xf32>
    %33 = tpu.matmul %0, %32, %cst_23 {dimension_numbers = #tpu.dot_dimension_numbers<[1], [0], [0], [1], [0, 0, 1, 1], [], []>} : vector<16x24xbf16>, vector<24x768xbf16>, vector<16x768xf32> -> vector<16x768xf32>
    %34 = arith.truncf %31 : vector<16x16xf32> to vector<16x16xbf16>
    %c0_24 = arith.constant 0 : index
    %c0_25 = arith.constant 0 : index
    %35 = vector.load %arg10[%c0_24, %c0_25] : memref<16x768xbf16, #tpu.memory_space<vmem>>, vector<16x768xbf16>
    %cst_26 = arith.constant dense<0.000000e+00> : vector<16x768xf32>
    %36 = tpu.matmul %34, %35, %cst_26 {dimension_numbers = #tpu.dot_dimension_numbers<[1], [0], [0], [1], [0, 0, 1, 1], [], []>} : vector<16x16xbf16>, vector<16x768xbf16>, vector<16x768xf32> -> vector<16x768xf32>
    %37 = arith.addf %33, %36 : vector<16x768xf32>
    %c0_27 = arith.constant 0 : index
    %c0_28 = arith.constant 0 : index
    %38 = vector.load %arg11[%c0_27, %c0_28] : memref<1x768xf32, #tpu.memory_space<vmem>>, vector<1x768xf32>
    %39 = vector.broadcast %38 : vector<1x768xf32> to vector<16x768xf32>
    %40 = arith.addf %37, %39 : vector<16x768xf32>
    %cst_29 = arith.constant 0.000000e+00 : f32
    %41 = vector.broadcast %cst_29 : f32 to vector<16x768xf32>
    %42 = arith.maximumf %40, %41 : vector<16x768xf32>
    %43 = arith.truncf %42 : vector<16x768xf32> to vector<16x768xbf16>
    %c0_30 = arith.constant 0 : index
    %c0_31 = arith.constant 0 : index
    %44 = vector.load %arg12[%c0_30, %c0_31] : memref<768x768xbf16, #tpu.memory_space<vmem>>, vector<768x768xbf16>
    %cst_32 = arith.constant dense<0.000000e+00> : vector<16x768xf32>
    %45 = tpu.matmul %43, %44, %cst_32 {dimension_numbers = #tpu.dot_dimension_numbers<[1], [0], [0], [1], [0, 0, 1, 1], [], []>} : vector<16x768xbf16>, vector<768x768xbf16>, vector<16x768xf32> -> vector<16x768xf32>
    %c0_33 = arith.constant 0 : index
    %c0_34 = arith.constant 0 : index
    %46 = vector.load %arg13[%c0_33, %c0_34] : memref<1x768xf32, #tpu.memory_space<vmem>>, vector<1x768xf32>
    %47 = vector.broadcast %46 : vector<1x768xf32> to vector<16x768xf32>
    %48 = arith.addf %45, %47 : vector<16x768xf32>
    %cst_35 = arith.constant 0.000000e+00 : f32
    %49 = vector.broadcast %cst_35 : f32 to vector<16x768xf32>
    %50 = arith.maximumf %48, %49 : vector<16x768xf32>
    %51 = arith.truncf %50 : vector<16x768xf32> to vector<16x768xbf16>
    %c0_36 = arith.constant 0 : index
    %c0_37 = arith.constant 0 : index
    %52 = vector.load %arg14[%c0_36, %c0_37] : memref<768x8xbf16, #tpu.memory_space<vmem>>, vector<768x8xbf16>
    %cst_38 = arith.constant dense<0.000000e+00> : vector<16x8xf32>
    %53 = tpu.matmul %51, %52, %cst_38 {dimension_numbers = #tpu.dot_dimension_numbers<[1], [0], [0], [1], [0, 0, 1, 1], [], []>} : vector<16x768xbf16>, vector<768x8xbf16>, vector<16x8xf32> -> vector<16x8xf32>
    %c0_39 = arith.constant 0 : index
    %c0_40 = arith.constant 0 : index
    %54 = vector.load %arg15[%c0_39, %c0_40] : memref<1x8xf32, #tpu.memory_space<vmem>>, vector<1x8xf32>
    %55 = vector.broadcast %54 : vector<1x8xf32> to vector<16x8xf32>
    %56 = arith.addf %53, %55 : vector<16x8xf32>
    %cst_41 = arith.constant 0.000000e+00 : f32
    %57 = vector.broadcast %cst_41 : f32 to vector<16x88xf32>
    %58 = tpu.concatenate %56, %22, %28, %57 in 1 : vector<16x8xf32>, vector<16x16xf32>, vector<16x16xf32>, vector<16x88xf32> -> vector<16x128xf32>
    %c0_42 = arith.constant 0 : index
    %c0_43 = arith.constant 0 : index
    %59 = vector.load %arg16[%c0_42, %c0_43] : memref<16x128xf32, #tpu.memory_space<vmem>>, vector<16x128xf32>
    tpu.vector_store %arg16[%c0_42, %c0_43], %58 {strides = array<i32>} : memref<16x128xf32, #tpu.memory_space<vmem>>, vector<16x128xf32>,
    return
  }
  func.func @transform_0(%arg0: i32) -> (i32, i32) {
    %c0_i32 = arith.constant 0 : i32
    %c0_i32_0 = arith.constant 0 : i32
    return %arg0, %c0_i32 : i32, i32
  }
  func.func @transform_1(%arg0: i32) -> (i32, i32) {
    %c0_i32 = arith.constant 0 : i32
    %c0_i32_0 = arith.constant 0 : i32
    return %arg0, %c0_i32 : i32, i32
  }
  func.func @transform_2(%arg0: i32) -> (i32, i32) {
    %c0_i32 = arith.constant 0 : i32
    %c0_i32_0 = arith.constant 0 : i32
    %c0_i32_1 = arith.constant 0 : i32
    return %c0_i32, %c0_i32_0 : i32, i32
  }
  func.func @transform_3(%arg0: i32) -> (i32, i32) {
    %c0_i32 = arith.constant 0 : i32
    %c0_i32_0 = arith.constant 0 : i32
    %c0_i32_1 = arith.constant 0 : i32
    return %c0_i32, %c0_i32_0 : i32, i32
  }
  func.func @transform_4(%arg0: i32) -> (i32, i32) {
    %c0_i32 = arith.constant 0 : i32
    %c0_i32_0 = arith.constant 0 : i32
    %c0_i32_1 = arith.constant 0 : i32
    return %c0_i32, %c0_i32_0 : i32, i32
  }
  func.func @transform_5(%arg0: i32) -> (i32, i32) {
    %c0_i32 = arith.constant 0 : i32
    %c0_i32_0 = arith.constant 0 : i32
    %c0_i32_1 = arith.constant 0 : i32
    return %c0_i32, %c0_i32_0 : i32, i32
  }
  func.func @transform_6(%arg0: i32) -> (i32, i32) {
    %c0_i32 = arith.constant 0 : i32
    %c0_i32_0 = arith.constant 0 : i32
    %c0_i32_1 = arith.constant 0 : i32
    return %c0_i32, %c0_i32_0 : i32, i32
  }
  func.func @transform_7(%arg0: i32) -> (i32, i32) {
    %c0_i32 = arith.constant 0 : i32
    %c0_i32_0 = arith.constant 0 : i32
    %c0_i32_1 = arith.constant 0 : i32
    return %c0_i32, %c0_i32_0 : i32, i32
  }
  func.func @transform_8(%arg0: i32) -> (i32, i32) {
    %c0_i32 = arith.constant 0 : i32
    %c0_i32_0 = arith.constant 0 : i32
    %c0_i32_1 = arith.constant 0 : i32
    return %c0_i32, %c0_i32_0 : i32, i32
  }
  func.func @transform_9(%arg0: i32) -> (i32, i32) {
    %c0_i32 = arith.constant 0 : i32
    %c0_i32_0 = arith.constant 0 : i32
    %c0_i32_1 = arith.constant 0 : i32
    return %c0_i32, %c0_i32_0 : i32, i32
  }
  func.func @transform_10(%arg0: i32) -> (i32, i32) {
    %c0_i32 = arith.constant 0 : i32
    %c0_i32_0 = arith.constant 0 : i32
    %c0_i32_1 = arith.constant 0 : i32
    return %c0_i32, %c0_i32_0 : i32, i32
  }
  func.func @transform_11(%arg0: i32) -> (i32, i32) {
    %c0_i32 = arith.constant 0 : i32
    %c0_i32_0 = arith.constant 0 : i32
    %c0_i32_1 = arith.constant 0 : i32
    return %c0_i32, %c0_i32_0 : i32, i32
  }
  func.func @transform_12(%arg0: i32) -> (i32, i32) {
    %c0_i32 = arith.constant 0 : i32
    %c0_i32_0 = arith.constant 0 : i32
    %c0_i32_1 = arith.constant 0 : i32
    return %c0_i32, %c0_i32_0 : i32, i32
  }
  func.func @transform_13(%arg0: i32) -> (i32, i32) {
    %c0_i32 = arith.constant 0 : i32
    %c0_i32_0 = arith.constant 0 : i32
    %c0_i32_1 = arith.constant 0 : i32
    return %c0_i32, %c0_i32_0 : i32, i32
  }
  func.func @transform_14(%arg0: i32) -> (i32, i32) {
    %c0_i32 = arith.constant 0 : i32
    %c0_i32_0 = arith.constant 0 : i32
    %c0_i32_1 = arith.constant 0 : i32
    return %c0_i32, %c0_i32_0 : i32, i32
  }
  func.func @transform_15(%arg0: i32) -> (i32, i32) {
    %c0_i32 = arith.constant 0 : i32
    %c0_i32_0 = arith.constant 0 : i32
    return %arg0, %c0_i32 : i32, i32
  }
}

</mosaic_0001>

<bundles_post_ra>
// kernel: tpu_custom_call.1
= control target key start
LH: loop header
LB: loop body
LE: loop exit
PB: predicated region body
PF: predicated region fallthrough
CT: control target
= control target key end

     0   :  { %s9375_s0 = inlined_call_operand.hbm [shape: bf16[16,24], index: 0, kind: input, shape index: {}]   ;;  %s9376_s1 = inlined_call_operand.hbm [shape: f32[16,16], index: 1, kind: input, shape index: {}]   ;;  %s9377_s2 = inlined_call_operand.hbm [shape: bf16[24,768], index: 2, kind: input, shape index: {}]   ;;  %s9378_s3 = inlined_call_operand.hbm [shape: f32[1,768], index: 3, kind: input, shape index: {}]   ;;  %s9379_s4 = inlined_call_operand.hbm [shape: bf16[768,768], index: 4, kind: input, shape index: {}]   ;;  %s9380_s5 = inlined_call_operand.hbm [shape: f32[1,768], index: 5, kind: input, shape index: {}]   ;;  %s9381_s6 = inlined_call_operand.vmem [shape: bf16[768,32], index: 6, kind: input, shape index: {}]   ;;  %s9382_s7 = inlined_call_operand.hbm [shape: f32[1,32], index: 7, kind: input, shape index: {}]   ;;  %s9383_s8 = inlined_call_operand.hbm [shape: bf16[24,768], index: 8, kind: input, shape index: {}]   ;;  %s9384_s9 = inlined_call_operand.hbm [shape: bf16[16,768], index: 9, kind: input, shape index: {}]   ;;  %s9385_s10 = inlined_call_operand.hbm [shape: f32[1,768], index: 10, kind: input, shape index: {}]   ;;  %s9386_s11 = inlined_call_operand.hbm [shape: bf16[768,768], index: 11, kind: input, shape index: {}]   ;;  %s9387_s12 = inlined_call_operand.hbm [shape: f32[1,768], index: 12, kind: input, shape index: {}]   ;;  %s9388_s13 = inlined_call_operand.vmem [shape: bf16[768,8], index: 13, kind: input, shape index: {}]   ;;  %s9389_s14 = inlined_call_operand.hbm [shape: f32[1,8], index: 14, kind: input, shape index: {}]   ;;  %s9390_s15 = inlined_call_operand.hbm [shape: f32[16,128], index: 15, kind: output, shape index: {}]  }
   0x1   :  { %9392 = sst [smem:[#allocation32_spill]] %s9390_s15 }
   0x2   :  { %20 = vsyncpa [#allocation3], 0 }
   0x3   :  { %21 = vsyncpa [#allocation6], 0 }
   0x4   :  { %22 = vsyncpa [#allocation9], 0 }
   0x5   :  { %23 = vsyncpa [#allocation12], 0 }
   0x6   :  { %24 = vsyncpa [#allocation15], 0 }
   0x7   :  { %25 = vsyncpa [#allocation18], 0 }
   0x8   :  { %26 = vsyncpa [#allocation21], 0 }
   0x9   :  { %27 = vsyncpa [#allocation4], 0  ;;  %s8637_s18 = smov [#allocation5]   ;;  %s8313_s22 = scalar_lea.hbm %s9376_s1, 256 }
   0xa   :  { %s45_s19 = sshll.u32 %s8637_s18, 4  ;;  %p8314_p0 = scmp.ne.s32.totalorder %s9376_s1, %s8313_s22  ;;  %s46_s19 = int_to_ptr.vmem [resolvable:$true] %s45_s19 }
   0xb   :  { %p8317_p1 = scmp.lt.u32.totalorder %s8313_s22, %s9376_s1 }
   0xd   :  { %p8319_p2 = pnand %p8317_p1, %p8314_p0 }
   0xf   :  { %8322 = shalt.err (!%p8319_p2)
}
  0x10   :  { %s8323_s27 = scalar_lea.vmem %s46_s19, 256  ;;  %p8328_p4 = scmp.lt.s32.totalorder %s46_s19, %s46_s19 }
  0x11   :  { %p8324_p3 = scmp.ne.s32.totalorder %s46_s19, %s8323_s27  ;;  %p8329_p5 = scmp.lt.s32.totalorder %s8323_s27, %s8323_s27 }
  0x13   :  { %p8330_p6 = por %p8329_p5, %p8328_p4 }
  0x15   :  { %p8331_p7 = pnand %p8330_p6, %p8324_p3 }
  0x17   :  { %8334 = shalt.err (!%p8331_p7)
}
  0x18   :  { %s8638_s28 = smov 128   ;;  %s8639_s29 = smov 8  }
  0x19   :  { %51 = dma.hbm_to_vmem [thread:$0]  %s9376_s1, 256, %s46_s19, [#allocation6], %s8638_s28, %s8638_s28, %s8639_s29  }
  0x1a   :  { %s8640_s17 = smov [#allocation8]   ;;  %s8641_s20 = smov [#allocation11]  }
  0x1b   :  { %s70_s18 = sshll.u32 %s8640_s17, 4  ;;  %s92_s21 = sshll.u32 %s8641_s20, 4  ;;  %s71_s18 = int_to_ptr.vmem [resolvable:$true] %s70_s18  ;;  %s93_s21 = int_to_ptr.vmem [resolvable:$true] %s92_s21 }
  0x1c   :  { %s8335_s24 = scalar_lea.hbm %s9378_s3, 96 }
  0x1d   :  { %p8336_p8 = scmp.ne.s32.totalorder %s9378_s3, %s8335_s24  ;;  %p8339_p9 = scmp.lt.u32.totalorder %s8335_s24, %s9378_s3 }
  0x1f   :  { %p8341_p10 = pnand %p8339_p9, %p8336_p8 }
  0x21   :  { %8344 = shalt.err (!%p8341_p10)
}
  0x22   :  { %s8345_s1 = scalar_lea.vmem %s71_s18, 96  ;;  %p8350_p12 = scmp.lt.s32.totalorder %s71_s18, %s71_s18 }
  0x23   :  { %p8346_p11 = scmp.ne.s32.totalorder %s71_s18, %s8345_s1  ;;  %p8351_p13 = scmp.lt.s32.totalorder %s8345_s1, %s8345_s1 }
  0x25   :  { %p8352_p0 = por %p8351_p13, %p8350_p12 }
  0x27   :  { %p8353_p1 = pnand %p8352_p0, %p8346_p11 }
  0x29   :  { %8356 = shalt.err (!%p8353_p1)
}
  0x2a   :  { %73 = dma.hbm_to_vmem [thread:$0]  %s9378_s3, 96, %s71_s18, [#allocation9]  }
  0x2b   :  { %s8357_s20 = scalar_lea.hbm %s9380_s5, 96 }
  0x2c   :  { %p8358_p2 = scmp.ne.s32.totalorder %s9380_s5, %s8357_s20  ;;  %p8361_p3 = scmp.lt.u32.totalorder %s8357_s20, %s9380_s5 }
  0x2e   :  { %p8363_p4 = pnand %p8361_p3, %p8358_p2 }
  0x30   :  { %8366 = shalt.err (!%p8363_p4)
}
  0x31   :  { %s8367_s25 = scalar_lea.vmem %s93_s21, 96  ;;  %p8372_p6 = scmp.lt.s32.totalorder %s93_s21, %s93_s21 }
  0x32   :  { %p8368_p5 = scmp.ne.s32.totalorder %s93_s21, %s8367_s25  ;;  %p8373_p7 = scmp.lt.s32.totalorder %s8367_s25, %s8367_s25 }
  0x34   :  { %p8374_p8 = por %p8373_p7, %p8372_p6 }
  0x36   :  { %p8375_p9 = pnand %p8374_p8, %p8368_p5 }
  0x38   :  { %8378 = shalt.err (!%p8375_p9)
}
  0x39   :  { %95 = dma.hbm_to_vmem [thread:$0]  %s9380_s5, 96, %s93_s21, [#allocation12]  }
  0x3a   :  { %s8642_s26 = smov [#allocation14]   ;;  %s8643_s1 = smov [#allocation17]  }
  0x3b   :  { %s113_s27 = sshll.u32 %s8642_s26, 4  ;;  %s138_s19 = sshll.u32 %s8643_s1, 4  ;;  %s114_s27 = int_to_ptr.vmem [resolvable:$true] %s113_s27  ;;  %s139_s19 = int_to_ptr.vmem [resolvable:$true] %s138_s19 }
  0x3c   :  { %s8379_s17 = scalar_lea.hbm %s9383_s8, 1152 }
  0x3d   :  { %p8380_p10 = scmp.ne.s32.totalorder %s9383_s8, %s8379_s17  ;;  %p8383_p11 = scmp.lt.u32.totalorder %s8379_s17, %s9383_s8 }
  0x3f   :  { %p8385_p12 = pnand %p8383_p11, %p8380_p10 }
  0x41   :  { %8388 = shalt.err (!%p8385_p12)
}
  0x42   :  { %s8389_s5 = scalar_lea.vmem %s114_s27, 1152  ;;  %p8394_p0 = scmp.lt.s32.totalorder %s114_s27, %s114_s27 }
  0x43   :  { %p8390_p13 = scmp.ne.s32.totalorder %s114_s27, %s8389_s5  ;;  %p8395_p1 = scmp.lt.s32.totalorder %s8389_s5, %s8389_s5 }
  0x45   :  { %p8396_p2 = por %p8395_p1, %p8394_p0 }
  0x47   :  { %p8397_p3 = pnand %p8396_p2, %p8390_p13 }
  0x49   :  { %8400 = shalt.err (!%p8397_p3)
}
  0x4a   :  { %s8644_s21 = smov 384   ;;  %s8645_s24 = smov 24  }
  0x4b   :  { %119 = dma.hbm_to_vmem [thread:$0]  %s9383_s8, 1152, %s114_s27, [#allocation15], %s8644_s21, %s8644_s21, %s8645_s24  }
  0x4c   :  { %s8401_s1 = scalar_lea.hbm %s9385_s10, 96 }
  0x4d   :  { %p8402_p4 = scmp.ne.s32.totalorder %s9385_s10, %s8401_s1  ;;  %p8405_p5 = scmp.lt.u32.totalorder %s8401_s1, %s9385_s10 }
  0x4f   :  { %p8407_p6 = pnand %p8405_p5, %p8402_p4 }
  0x51   :  { %8410 = shalt.err (!%p8407_p6)
}
  0x52   :  { %s8411_s15 = scalar_lea.vmem %s139_s19, 96  ;;  %p8416_p8 = scmp.lt.s32.totalorder %s139_s19, %s139_s19 }
  0x53   :  { %p8412_p7 = scmp.ne.s32.totalorder %s139_s19, %s8411_s15  ;;  %p8417_p9 = scmp.lt.s32.totalorder %s8411_s15, %s8411_s15 }
  0x55   :  { %p8418_p10 = por %p8417_p9, %p8416_p8 }
  0x57   :  { %p8419_p11 = pnand %p8418_p10, %p8412_p7 }
  0x59   :  { %8422 = shalt.err (!%p8419_p11)
}
  0x5a   :  { %141 = dma.hbm_to_vmem [thread:$0]  %s9385_s10, 96, %s139_s19, [#allocation18]  }
  0x5b   :  { %s8646_s22 = smov [#allocation20]   ;;  %s8647_s5 = smov [#allocation2]  }
  0x5c   :  { %s160_s23 = sshll.u32 %s8646_s22, 4  ;;  %s33_s25 = sshll.u32 %s8647_s5, 4  ;;  %s161_s23 = int_to_ptr.vmem [resolvable:$true] %s160_s23  ;;  %s34_s25 = int_to_ptr.vmem [resolvable:$true] %s33_s25 }
  0x5d   :  { %s8423_s26 = scalar_lea.hbm %s9387_s12, 96 }
  0x5e   :  { %p8424_p12 = scmp.ne.s32.totalorder %s9387_s12, %s8423_s26  ;;  %p8427_p13 = scmp.lt.u32.totalorder %s8423_s26, %s9387_s12 }
  0x60   :  { %p8429_p0 = pnand %p8427_p13, %p8424_p12 }
  0x62   :  { %8432 = shalt.err (!%p8429_p0)
}
  0x63   :  { %s8433_s10 = scalar_lea.vmem %s161_s23, 96  ;;  %p8438_p2 = scmp.lt.s32.totalorder %s161_s23, %s161_s23 }
  0x64   :  { %p8434_p1 = scmp.ne.s32.totalorder %s161_s23, %s8433_s10  ;;  %p8439_p3 = scmp.lt.s32.totalorder %s8433_s10, %s8433_s10 }
  0x66   :  { %p8440_p4 = por %p8439_p3, %p8438_p2 }
  0x68   :  { %p8441_p5 = pnand %p8440_p4, %p8434_p1 }
  0x6a   :  { %8444 = shalt.err (!%p8441_p5)
}
  0x6b   :  { %163 = dma.hbm_to_vmem [thread:$0]  %s9387_s12, 96, %s161_s23, [#allocation21]  }
  0x6c   :  { %s8445_s27 = scalar_lea.hbm %s9375_s0, 128 }
  0x6d   :  { %p8446_p6 = scmp.ne.s32.totalorder %s9375_s0, %s8445_s27  ;;  %p8449_p7 = scmp.lt.u32.totalorder %s8445_s27, %s9375_s0 }
  0x6f   :  { %p8451_p8 = pnand %p8449_p7, %p8446_p6 }
  0x71   :  { %8454 = shalt.err (!%p8451_p8)
}
  0x72   :  { %s8455_s26 = scalar_lea.vmem %s34_s25, 128  ;;  %p8460_p10 = scmp.lt.s32.totalorder %s34_s25, %s34_s25 }
  0x73   :  { %p8456_p9 = scmp.ne.s32.totalorder %s34_s25, %s8455_s26  ;;  %p8461_p11 = scmp.lt.s32.totalorder %s8455_s26, %s8455_s26 }
  0x75   :  { %p8462_p12 = por %p8461_p11, %p8460_p10 }
  0x77   :  { %p8463_p13 = pnand %p8462_p12, %p8456_p9 }
  0x79   :  { %8466 = shalt.err (!%p8463_p13)
}
  0x7a   :  { %s8648_s12 = smov 64   ;;  %s8649_s23 = smov 4  }
  0x7b   :  { %39 = dma.hbm_to_vmem [thread:$0]  %s9375_s0, 128, %s34_s25, [#allocation3], %s8648_s12, %s8648_s12, %s8649_s23  }
  0x7c   :  { %s8650_s16 = smov [#allocation7]   ;;  %s8651_s10 = smov [#allocation10]  }
  0x7d   :  { %s57_s17 = sshll.u32 %s8650_s16, 4  ;;  %s79_s19 = sshll.u32 %s8651_s10, 4  ;;  %s58_s17 = int_to_ptr.vmem [resolvable:$true] %s57_s17  ;;  %s80_s19 = int_to_ptr.vmem [resolvable:$true] %s79_s19 }
  0x7e   :  { %s8467_s8 = scalar_lea.hbm %s9377_s2, 1152 }
  0x7f   :  { %p8468_p0 = scmp.ne.s32.totalorder %s9377_s2, %s8467_s8  ;;  %p8471_p1 = scmp.lt.u32.totalorder %s8467_s8, %s9377_s2 }
  0x81   :  { %p8473_p2 = pnand %p8471_p1, %p8468_p0 }
  0x83   :  { %8476 = shalt.err (!%p8473_p2)
}
  0x84   :  { %s8477_s0 = scalar_lea.vmem %s58_s17, 1152  ;;  %p8482_p4 = scmp.lt.s32.totalorder %s58_s17, %s58_s17 }
  0x85   :  { %p8478_p3 = scmp.ne.s32.totalorder %s58_s17, %s8477_s0  ;;  %p8483_p5 = scmp.lt.s32.totalorder %s8477_s0, %s8477_s0 }
  0x87   :  { %p8484_p6 = por %p8483_p5, %p8482_p4 }
  0x89   :  { %p8485_p7 = pnand %p8484_p6, %p8478_p3 }
  0x8b   :  { %8488 = shalt.err (!%p8485_p7)
}
  0x8c   :  { %63 = dma.hbm_to_vmem [thread:$0]  %s9377_s2, 1152, %s58_s17, [#allocation6], %s8644_s21, %s8644_s21, %s8645_s24  }
  0x8d   :  { %s8489_s23 = scalar_lea.hbm %s9379_s4, 36864 }
  0x8e   :  { %p8490_p8 = scmp.ne.s32.totalorder %s9379_s4, %s8489_s23  ;;  %p8493_p9 = scmp.lt.u32.totalorder %s8489_s23, %s9379_s4 }
  0x90   :  { %p8495_p10 = pnand %p8493_p9, %p8490_p8 }
  0x92   :  { %8498 = shalt.err (!%p8495_p10)
}
  0x93   :  { %s8499_s20 = scalar_lea.vmem %s80_s19, 36864  ;;  %p8504_p12 = scmp.lt.s32.totalorder %s80_s19, %s80_s19 }
  0x94   :  { %p8500_p11 = scmp.ne.s32.totalorder %s80_s19, %s8499_s20  ;;  %p8505_p13 = scmp.lt.s32.totalorder %s8499_s20, %s8499_s20 }
  0x96   :  { %p8506_p0 = por %p8505_p13, %p8504_p12 }
  0x98   :  { %p8507_p1 = pnand %p8506_p0, %p8500_p11 }
  0x9a   :  { %8510 = shalt.err (!%p8507_p1)
}
  0x9b   :  { %85 = dma.hbm_to_vmem [thread:$0]  %s9379_s4, 36864, %s80_s19, [#allocation9], %s8644_s21, %s8644_s21, %s8645_s24  }
  0x9c   :  { %s8652_s15 = smov [#allocation13]   ;;  %s8653_s27 = smov [#allocation16]  }
  0x9d   :  { %s104_s8 = sshll.u32 %s8652_s15, 4  ;;  %s125_s22 = sshll.u32 %s8653_s27, 4  ;;  %s105_s8 = int_to_ptr.vmem [resolvable:$true] %s104_s8  ;;  %s126_s22 = int_to_ptr.vmem [resolvable:$true] %s125_s22 }
  0x9e   :  { %s8511_s0 = scalar_lea.hbm %s9382_s7, 16 }
  0x9f   :  { %p8512_p2 = scmp.ne.s32.totalorder %s9382_s7, %s8511_s0  ;;  %p8515_p3 = scmp.lt.u32.totalorder %s8511_s0, %s9382_s7 }
  0xa1   :  { %p8517_p4 = pnand %p8515_p3, %p8512_p2 }
  0xa3   :  { %8520 = shalt.err (!%p8517_p4)
}
  0xa4   :  { %s8521_s4 = scalar_lea.vmem %s105_s8, 16  ;;  %s8525_s19 = scalar_lea.vmem %s105_s8, 32 }
  0xa5   :  { %p8522_p5 = scmp.ne.s32.totalorder %s105_s8, %s8521_s4  ;;  %p8526_p6 = scmp.lt.s32.totalorder %s105_s8, %s105_s8 }
  0xa6   :  { %p8527_p7 = scmp.lt.s32.totalorder %s8525_s19, %s8521_s4 }
  0xa8   :  { %p8528_p8 = por %p8527_p7, %p8526_p6 }
  0xaa   :  { %p8529_p9 = pnand %p8528_p8, %p8522_p5 }
  0xac   :  { %8532 = shalt.err (!%p8529_p9)
}
  0xad   :  { %107 = dma.hbm_to_vmem [thread:$0]  %s9382_s7, 16, %s105_s8, [#allocation12]  }
  0xae   :  { %s8533_s10 = scalar_lea.hbm %s9384_s9, 768 }
  0xaf   :  { %p8534_p10 = scmp.ne.s32.totalorder %s9384_s9, %s8533_s10  ;;  %p8537_p11 = scmp.lt.u32.totalorder %s8533_s10, %s9384_s9 }
  0xb1   :  { %p8539_p12 = pnand %p8537_p11, %p8534_p10 }
  0xb3   :  { %8542 = shalt.err (!%p8539_p12)
}
  0xb4   :  { %s8543_s27 = scalar_lea.vmem %s126_s22, 768  ;;  %p8548_p0 = scmp.lt.s32.totalorder %s126_s22, %s126_s22 }
  0xb5   :  { %p8544_p13 = scmp.ne.s32.totalorder %s126_s22, %s8543_s27  ;;  %p8549_p1 = scmp.lt.s32.totalorder %s8543_s27, %s8543_s27 }
  0xb7   :  { %p8550_p2 = por %p8549_p1, %p8548_p0 }
  0xb9   :  { %p8551_p3 = pnand %p8550_p2, %p8544_p13 }
  0xbb   :  { %8554 = shalt.err (!%p8551_p3)
}
  0xbc   :  { %131 = dma.hbm_to_vmem [thread:$0]  %s9384_s9, 768, %s126_s22, [#allocation15], %s8644_s21, %s8644_s21, %s8645_s24  }
  0xbd   :  { %s8654_s5 = smov [#allocation19]   ;;  %s8655_s0 = smov [#allocation22]  }
  0xbe   :  { %s147_s3 = sshll.u32 %s8654_s5, 4  ;;  %s172_s25 = sshll.u32 %s8655_s0, 4  ;;  %s148_s3 = int_to_ptr.vmem [resolvable:$true] %s147_s3  ;;  %s173_s25 = int_to_ptr.vmem [resolvable:$true] %s172_s25 }
  0xbf   :  { %s8555_s12 = scalar_lea.hbm %s9386_s11, 36864 }
  0xc0   :  { %p8556_p4 = scmp.ne.s32.totalorder %s9386_s11, %s8555_s12  ;;  %p8559_p5 = scmp.lt.u32.totalorder %s8555_s12, %s9386_s11 }
  0xc2   :  { %p8561_p6 = pnand %p8559_p5, %p8556_p4 }
  0xc4   :  { %8564 = shalt.err (!%p8561_p6)
}
  0xc5   :  { %s8565_s9 = scalar_lea.vmem %s148_s3, 36864  ;;  %p8570_p8 = scmp.lt.s32.totalorder %s148_s3, %s148_s3 }
  0xc6   :  { %p8566_p7 = scmp.ne.s32.totalorder %s148_s3, %s8565_s9  ;;  %p8571_p9 = scmp.lt.s32.totalorder %s8565_s9, %s8565_s9 }
  0xc8   :  { %p8572_p10 = por %p8571_p9, %p8570_p8 }
  0xca   :  { %p8573_p11 = pnand %p8572_p10, %p8566_p7 }
  0xcc   :  { %8576 = shalt.err (!%p8573_p11)
}
  0xcd   :  { %153 = dma.hbm_to_vmem [thread:$0]  %s9386_s11, 36864, %s148_s3, [#allocation18], %s8644_s21, %s8644_s21, %s8645_s24  }
  0xce   :  { %s8577_s20 = scalar_lea.hbm %s9389_s14, 16 }
  0xcf   :  { %p8578_p12 = scmp.ne.s32.totalorder %s9389_s14, %s8577_s20  ;;  %p8581_p13 = scmp.lt.u32.totalorder %s8577_s20, %s9389_s14 }
  0xd1   :  { %p8583_p0 = pnand %p8581_p13, %p8578_p12 }
  0xd3   :  { %8586 = shalt.err (!%p8583_p0)
}
  0xd4   :  { %s8587_s7 = scalar_lea.vmem %s173_s25, 16  ;;  %s8591_s8 = scalar_lea.vmem %s173_s25, 32 }
  0xd5   :  { %p8588_p1 = scmp.ne.s32.totalorder %s173_s25, %s8587_s7  ;;  %p8592_p2 = scmp.lt.s32.totalorder %s173_s25, %s173_s25 }
  0xd6   :  { %p8593_p3 = scmp.lt.s32.totalorder %s8591_s8, %s8587_s7 }
  0xd8   :  { %p8594_p4 = por %p8593_p3, %p8592_p2 }
  0xda   :  { %p8595_p5 = pnand %p8594_p4, %p8588_p1 }
  0xdc   :  { %8598 = shalt.err (!%p8595_p5)
}
  0xdd   :  { %175 = dma.hbm_to_vmem [thread:$0]  %s9389_s14, 16, %s173_s25, [#allocation21]  }
  0xde   :  { %8621 = dma.done.wait [#allocation3], 128  }
  0xdf   :  { %8622 = vsyncadd [#allocation3], 4294967168 }
  0xe0   :  { %8623 = dma.done.wait [#allocation6], 1408  }
  0xe1   :  { %8624 = vsyncadd [#allocation6], 4294965888 }
  0xe2   :  { %8625 = dma.done.wait [#allocation9], 36960  }
  0xe3   :  { %8626 = vsyncadd [#allocation9], 4294930336 }
  0xe4   :  { %8627 = dma.done.wait [#allocation12], 112  }
  0xe5   :  { %8628 = vsyncadd [#allocation12], 4294967184 }
  0xe6   :  { %8629 = dma.done.wait [#allocation15], 1920  }
  0xe7   :  { %8630 = vsyncadd [#allocation15], 4294965376 }
  0xe8   :  { %8631 = dma.done.wait [#allocation18], 36960  }
  0xe9   :  { %8632 = vsyncadd [#allocation18], 4294930336 }
  0xea   :  { %8633 = dma.done.wait [#allocation21], 112  }
  0xeb   :  { %8634 = vsyncadd [#allocation21], 4294967184  ;;  %v8656_v0 = vmov 0   ;;  %v7308_v1 = vld [vmem:[#allocation7 + $0x4] ss:$24 sps:$4 sm:$0xff]   ;;  %v224_v3 = vld [vmem:[#allocation7 + $0x30] sm:$0xff] }
  0xec   :  { %364 = vmatprep.mubr.bf16.mxu0 %v8656_v0  ;;  %407 = vmatprep.mubr.bf16.mxu1 %v8656_v0  ;;  %v7310_v2 = vld [vmem:[#allocation7] ss:$24 sps:$4 sm:$0xff]   ;;  %vm313_vm0 = vcmask 1043456   ;;  %v6357_v4 = vcombine.high %v224_v3, %v224_v3  ;;  %v6356_v5 = vcombine.low %v224_v3, %v224_v3  ;;  %v7314_v6 = vld [vmem:[#allocation7 + $0xc] ss:$24 sps:$4 sm:$0xff]   ;;  %vm309_vm1 = vcmask 195584  }
  0xed   :  { %332 = vmatprep.subr.bf16.mxu0 %v7308_v1  ;;  %v7316_v7 = vld [vmem:[#allocation7 + $0x8] ss:$24 sps:$4 sm:$0xff]   ;;  %v225_v9 = vld [vmem:[#allocation7 + $0x38] sm:$0xff]  ;;  %375 = vmatprep.subr.bf16.mxu1 %v7314_v6  ;;  %v7321_v12 = vld [vmem:[#allocation7 + $0x14] ss:$24 sps:$4 sm:$0xff]   ;;  %s8657_s30 = smov 16  }
  0xee   :  { %333 = vmatpush1.bf16.msra.mxu0 %v7310_v2  ;;  %v315_v8 = vsel %vm313_vm0, %v6356_v5, 0  ;;  %v6359_v10 = vcombine.high %v225_v9, %v225_v9  ;;  %v6358_v11 = vcombine.low %v225_v9, %v225_v9  ;;  %v226_v13 = vld [vmem:[#allocation7 + $0x40] sm:$0xff]  ;;  %v7313_v14 = vld [vmem:[#allocation2] sm:$0xff]   ;;  %376 = vmatpush1.bf16.msra.mxu1 %v7316_v7  ;;  %v7329_v23 = vld [vmem:[#allocation10 + $0xc] ss:$24 sps:$4 sm:$0xff]   ;;  %vm3234_vm2 = vcmask 130048  }
  0xef   :  { %6362 = vmatprep.subr.msk.bf16.mxu0 %vm313_vm0, %v6357_v4  ;;  %v7319_v16 = vld [vmem:[#allocation7 + $0x10] ss:$24 sps:$4 sm:$0xff]   ;;  %v6361_v17 = vcombine.high %v226_v13, %v226_v13  ;;  %v6360_v18 = vcombine.low %v226_v13, %v226_v13  ;;  %v7332_v21 = vld [vmem:[#allocation10 + $0x34] ss:$24 sps:$4 sm:$0xff]   ;;  %v7330_v25 = vld [vmem:[#allocation10 + $0x30] ss:$24 sps:$4 sm:$0xff]  }
  0xf0   :  { %6364 = vmatprep.subr.msk.bf16.mxu1 %vm313_vm0, %v6359_v10  ;;  %v321_v15 = vsel %vm313_vm0, %v6358_v11, 0  ;;  %v7326_v19 = vld [vmem:[#allocation10 + $0x4] ss:$24 sps:$4 sm:$0xff]   ;;  %v7324_v20 = vld [vmem:[#allocation10] ss:$24 sps:$4 sm:$0xff]   ;;  %vm6316_vm3 = vcmask 64512  }
  0xf1   :  { %v327_v22 = vsel %vm313_vm0, %v6360_v18, 0  ;;  %v7327_v24 = vld [vmem:[#allocation10 + $0x8] ss:$24 sps:$4 sm:$0xff]   ;;  %v7338_v26 = vld [vmem:[#allocation10 + $0x64] ss:$24 sps:$4 sm:$0xff]   ;;  %vm6321_vm4 = vcmask 326656  }
  0xf2   :  { %335 = vmatpush1.bf16.msra.mxu0 %v315_v8  ;;  %378 = vmatpush1.bf16.msra.mxu1 %v321_v15  ;;  %v7335_v27 = vld [vmem:[#allocation10 + $0x3c] ss:$24 sps:$4 sm:$0xff]   ;;  %v7333_v28 = vld [vmem:[#allocation10 + $0x38] ss:$24 sps:$4 sm:$0xff]   ;;  %v7341_v31 = vld [vmem:[#allocation10 + $0x6c] ss:$24 sps:$4 sm:$0xff]  }
  0xf3   :  { %418 = vmatprep.subr.bf16.mxu0 %v7321_v12  ;;  %2239 = vmatprep.subr.bf16.mxu1 %v7326_v19  ;;  %v7336_v29 = vld [vmem:[#allocation10 + $0x60] ss:$24 sps:$4 sm:$0xff]   ;;  %v7344_v30 = vld [vmem:[#allocation10 + $0x94] ss:$24 sps:$4 sm:$0xff]   ;;  %v7342_v33 = vld [vmem:[#allocation10 + $0x90] ss:$24 sps:$4 sm:$0xff]  }
  0xf4   :  { %v7339_v32 = vld [vmem:[#allocation10 + $0x68] ss:$24 sps:$4 sm:$0xff]   ;;  %v7350_v34 = vld [vmem:[#allocation10 + $0xc4] ss:$24 sps:$4 sm:$0xff]   ;;  %v7345_v36 = vld [vmem:[#allocation10 + $0x98] ss:$24 sps:$4 sm:$0xff]  }
  0xf5   :  { %6363 = vmatmul.mubr.msk.bf16.vlgmr.msra.gmra.mrb[0].mxu0 %vm309_vm1, %v7313_v14  ;;  %6365 = vmatmul.mubr.msk.bf16.vlgmr.msra.gmra.mrb[0].mxu1 %vm309_vm1, %v7313_v14  ;;  %v7347_v35 = vld [vmem:[#allocation10 + $0x9c] ss:$24 sps:$4 sm:$0xff]   ;;  %v7348_v37 = vld [vmem:[#allocation10 + $0xc0] ss:$24 sps:$4 sm:$0xff]   ;;  %v7353_v39 = vld [vmem:[#allocation10 + $0xcc] ss:$24 sps:$4 sm:$0xff]  }
  0xf6   :  { %419 = vmatpush1.bf16.msra.mxu0 %v7319_v16  ;;  %450 = vmatprep.mubr.bf16.mxu0 %v8656_v0  ;;  %v7356_v38 = vld [vmem:[#allocation10 + $0xf4] ss:$24 sps:$4 sm:$0xff]   ;;  %v7351_v40 = vld [vmem:[#allocation10 + $0xc8] ss:$24 sps:$4 sm:$0xff]   ;;  %v7362_v42 = vld [vmem:[#allocation10 + $0x124] ss:$24 sps:$4 sm:$0xff]  }
  0xf7   :  { %6366 = vmatprep.subr.msk.bf16.mxu0 %vm313_vm0, %v6361_v17  ;;  %2240 = vmatpush1.bf16.msra.mxu1 %v7324_v20  ;;  %v7354_v41 = vld [vmem:[#allocation10 + $0xf0] ss:$24 sps:$4 sm:$0xff]   ;;  %v7359_v43 = vld [vmem:[#allocation10 + $0xfc] ss:$24 sps:$4 sm:$0xff]   ;;  %v7360_v45 = vld [vmem:[#allocation10 + $0x120] ss:$24 sps:$4 sm:$0xff]  }
  0xf8   :  { %2241 = vmatprep.subr.bf16.mxu1 %v7332_v21  ;;  %v7357_v44 = vld [vmem:[#allocation10 + $0xf8] ss:$24 sps:$4 sm:$0xff]   ;;  %v7368_v46 = vld [vmem:[#allocation10 + $0x154] ss:$24 sps:$4 sm:$0xff]   ;;  %v7363_v48 = vld [vmem:[#allocation10 + $0x128] ss:$24 sps:$4 sm:$0xff]  }
  0xf9   :  { %v7365_v47 = vld [vmem:[#allocation10 + $0x12c] ss:$24 sps:$4 sm:$0xff]   ;;  %v7366_v49 = vld [vmem:[#allocation10 + $0x150] ss:$24 sps:$4 sm:$0xff]   ;;  %v7371_v51 = vld [vmem:[#allocation10 + $0x15c] ss:$24 sps:$4 sm:$0xff]  }
  0xfa   :  { %421 = vmatpush1.bf16.msra.mxu0 %v327_v22  ;;  %v7374_v50 = vld [vmem:[#allocation10 + $0x184] ss:$24 sps:$4 sm:$0xff]   ;;  %v7369_v52 = vld [vmem:[#allocation10 + $0x158] ss:$24 sps:$4 sm:$0xff]   ;;  %v7380_v55 = vld [vmem:[#allocation10 + $0x1b4] ss:$24 sps:$4 sm:$0xff]  }
  0xfb   :  { %2368 = vmatprep.subr.bf16.mxu0 %v7329_v23  ;;  %2242 = vmatpush1.bf16.msra.mxu1 %v7330_v25  ;;  %v7372_v53 = vld [vmem:[#allocation10 + $0x180] ss:$24 sps:$4 sm:$0xff]   ;;  %v7377_v54 = vld [vmem:[#allocation10 + $0x18c] ss:$24 sps:$4 sm:$0xff]   ;;  %v7378_v56 = vld [vmem:[#allocation10 + $0x1b0] ss:$24 sps:$4 sm:$0xff]   ;;  %v229_v23 = vlaneseq }
  0xfc   :  { %2243 = vmatprep.subr.bf16.mxu1 %v7338_v26  ;;  %v7375_v57 = vld [vmem:[#allocation10 + $0x188] ss:$24 sps:$4 sm:$0xff]   ;;  %v7386_v58 = vld [vmem:[#allocation10 + $0x1e4] ss:$24 sps:$4 sm:$0xff]   ;;  %v7381_v61 = vld [vmem:[#allocation10 + $0x1b8] ss:$24 sps:$4 sm:$0xff]  }
  0xfd   :  { %6367 = vmatmul.mubr.msk.bf16.vlgmr.msra.gmra.mrb[4].mxu0 %vm309_vm1, %v7313_v14  ;;  %v7383_v59 = vld [vmem:[#allocation10 + $0x1bc] ss:$24 sps:$4 sm:$0xff]   ;;  %v7384_v60 = vld [vmem:[#allocation10 + $0x1e0] ss:$24 sps:$4 sm:$0xff]   ;;  %v7389_v63 = vld [vmem:[#allocation10 + $0x1ec] ss:$24 sps:$4 sm:$0xff]  }
  0xfe   :  { %2369 = vmatpush1.bf16.msra.mxu0 %v7327_v24  ;;  %v7392_v62 = vld [vmem:[#allocation10 + $0x214] ss:$24 sps:$4 sm:$0xff]   ;;  %v7390_v1 = vld [vmem:[#allocation10 + $0x210] ss:$24 sps:$4 sm:$0xff]   ;;  %v7398_v3 = vld [vmem:[#allocation10 + $0x244] ss:$24 sps:$4 sm:$0xff]  }
  0xff   :  { %2370 = vmatprep.subr.bf16.mxu0 %v7335_v27  ;;  %2244 = vmatpush1.bf16.msra.mxu1 %v7336_v29  ;;  %v7387_v2 = vld [vmem:[#allocation10 + $0x1e8] ss:$24 sps:$4 sm:$0xff]   ;;  %v7395_v4 = vld [vmem:[#allocation10 + $0x21c] ss:$24 sps:$4 sm:$0xff]   ;;  %v7393_v6 = vld [vmem:[#allocation10 + $0x218] ss:$24 sps:$4 sm:$0xff]  }
 0x100   :  { %2245 = vmatprep.subr.bf16.mxu1 %v7344_v30  ;;  %v7396_v5 = vld [vmem:[#allocation10 + $0x240] ss:$24 sps:$4 sm:$0xff]   ;;  %v7404_v7 = vld [vmem:[#allocation10 + $0x274] ss:$24 sps:$4 sm:$0xff]   ;;  %v7402_v9 = vld [vmem:[#allocation10 + $0x270] ss:$24 sps:$4 sm:$0xff]  }
 0x101   :  { %v7401_v8 = vld [vmem:[#allocation10 + $0x24c] ss:$24 sps:$4 sm:$0xff]   ;;  %v7399_v10 = vld [vmem:[#allocation10 + $0x248] ss:$24 sps:$4 sm:$0xff]   ;;  %v7407_v11 = vld [vmem:[#allocation10 + $0x27c] ss:$24 sps:$4 sm:$0xff]  }
 0x102   :  { %2371 = vmatpush1.bf16.msra.mxu0 %v7333_v28  ;;  %v7405_v12 = vld [vmem:[#allocation10 + $0x278] ss:$24 sps:$4 sm:$0xff]   ;;  %v7410_v13 = vld [vmem:[#allocation10 + $0x2a4] ss:$24 sps:$4 sm:$0xff]   ;;  %v7411_v16 = vld [vmem:[#allocation10 + $0x2a8] ss:$24 sps:$4 sm:$0xff]  }
 0x103   :  { %2372 = vmatprep.subr.bf16.mxu0 %v7341_v31  ;;  %2246 = vmatpush1.bf16.msra.mxu1 %v7342_v33  ;;  %v7413_v14 = vld [vmem:[#allocation10 + $0x2ac] ss:$24 sps:$4 sm:$0xff]   ;;  %v7408_v15 = vld [vmem:[#allocation10 + $0x2a0] ss:$24 sps:$4 sm:$0xff]   ;;  %v7419_v18 = vld [vmem:[#allocation10 + $0x2dc] ss:$24 sps:$4 sm:$0xff]  }
 0x104   :  { %2247 = vmatprep.subr.bf16.mxu1 %v7350_v34  ;;  %v7416_v17 = vld [vmem:[#allocation10 + $0x2d4] ss:$24 sps:$4 sm:$0xff]   ;;  %v7414_v19 = vld [vmem:[#allocation10 + $0x2d0] ss:$24 sps:$4 sm:$0xff]   ;;  %v7422_v21 = vld [vmem:[#allocation10 + $0x304] ss:$24 sps:$4 sm:$0xff]  }
 0x105   :  { %v7417_v20 = vld [vmem:[#allocation10 + $0x2d8] ss:$24 sps:$4 sm:$0xff]   ;;  %v7425_v22 = vld [vmem:[#allocation10 + $0x30c] ss:$24 sps:$4 sm:$0xff]   ;;  %v230_v24 = vshrl.u32 %v229_v23, 7 }
 0x106   :  { %2373 = vmatpush1.bf16.msra.mxu0 %v7339_v32  ;;  %v227_v25 = vld [vmem:[#allocation8] sm:$0x3f]  ;;  %v7435_v23 = vld [vmem:[#allocation10 + $0x368] ss:$24 sps:$4 sm:$0xff]  }
 0x107   :  { %2374 = vmatprep.subr.bf16.mxu0 %v7347_v35  ;;  %2248 = vmatpush1.bf16.msra.mxu1 %v7348_v37  ;;  %v8926_v26 = vsub.s32 0, %v230_v24  ;;  %v8928_v27 = vsub.s32 1, %v230_v24  ;;  %v8930_v28 = vsub.s32 2, %v230_v24  ;;  %v8933_v30 = vsub.s32 3, %v230_v24 }
 0x108   :  { %2249 = vmatprep.subr.bf16.mxu1 %v7356_v38  ;;  %v8937_v34 = vsub.s32 4, %v230_v24 }
 0x109   :  { %v232_v29 = vrot.slane %v227_v25, %v8926_v26  ;;  %v236_v31 = vrot.slane %v227_v25, %v8928_v27  ;;  %v240_v33 = vrot.slane %v227_v25, %v8930_v28  ;;  %v244_v37 = vrot.slane %v227_v25, %v8933_v30 }
 0x10a   :  { %2375 = vmatpush1.bf16.msra.mxu0 %v7345_v36 }
 0x10b   :  { %2376 = vmatprep.subr.bf16.mxu0 %v7353_v39  ;;  %2250 = vmatpush1.bf16.msra.mxu1 %v7354_v41 }
 0x10c   :  { %2251 = vmatprep.subr.bf16.mxu1 %v7362_v42 }
 0x10e   :  { %2377 = vmatpush1.bf16.msra.mxu0 %v7351_v40  ;;  %v8940_v40 = vsub.s32 5, %v230_v24 }
 0x10f   :  { %2378 = vmatprep.subr.bf16.mxu0 %v7359_v43  ;;  %2252 = vmatpush1.bf16.msra.mxu1 %v7360_v45 }
 0x110   :  { %2253 = vmatprep.subr.bf16.mxu1 %v7368_v46 }
 0x112   :  { %2379 = vmatpush1.bf16.msra.mxu0 %v7357_v44 }
 0x113   :  { %2380 = vmatprep.subr.bf16.mxu0 %v7365_v47  ;;  %2254 = vmatpush1.bf16.msra.mxu1 %v7366_v49  ;;  %v248_v47 = vrot.slane %v227_v25, %v8937_v34 }
 0x114   :  { %2255 = vmatprep.subr.bf16.mxu1 %v7374_v50 }
 0x116   :  { %2381 = vmatpush1.bf16.msra.mxu0 %v7363_v48 }
 0x117   :  { %2382 = vmatprep.subr.bf16.mxu0 %v7371_v51  ;;  %2256 = vmatpush1.bf16.msra.mxu1 %v7372_v53 }
 0x118   :  { %2257 = vmatprep.subr.bf16.mxu1 %v7380_v55  ;;  %v7423_v55 = vld [vmem:[#allocation10 + $0x308] ss:$24 sps:$4 sm:$0xff]  }
 0x11a   :  { %2383 = vmatpush1.bf16.msra.mxu0 %v7369_v52 }
 0x11b   :  { %2384 = vmatprep.subr.bf16.mxu0 %v7377_v54  ;;  %2258 = vmatpush1.bf16.msra.mxu1 %v7378_v56  ;;  %v7420_v54 = vld [vmem:[#allocation10 + $0x300] ss:$24 sps:$4 sm:$0xff]  }
 0x11c   :  { %2259 = vmatprep.subr.bf16.mxu1 %v7386_v58 }
 0x11e   :  { %2385 = vmatpush1.bf16.msra.mxu0 %v7375_v57 }
 0x11f   :  { %2386 = vmatprep.subr.bf16.mxu0 %v7383_v59  ;;  %2260 = vmatpush1.bf16.msra.mxu1 %v7384_v60  ;;  %v252_v59 = vrot.slane %v227_v25, %v8940_v40 }
 0x120   :  { %2261 = vmatprep.subr.bf16.mxu1 %v7392_v62 }
 0x122   :  { %2387 = vmatpush1.bf16.msra.mxu0 %v7381_v61  ;;  %v7428_v61 = vld [vmem:[#allocation10 + $0x334] ss:$24 sps:$4 sm:$0xff]  }
 0x123   :  { %2388 = vmatprep.subr.bf16.mxu0 %v7389_v63  ;;  %2262 = vmatpush1.bf16.msra.mxu1 %v7390_v1 }
 0x124   :  { %2263 = vmatprep.subr.bf16.mxu1 %v7398_v3 }
 0x126   :  { %2389 = vmatpush1.bf16.msra.mxu0 %v7387_v2 }
 0x127   :  { %2390 = vmatprep.subr.bf16.mxu0 %v7395_v4  ;;  %2264 = vmatpush1.bf16.msra.mxu1 %v7396_v5  ;;  %v7431_v4 = vld [vmem:[#allocation10 + $0x33c] ss:$24 sps:$4 sm:$0xff]  }
 0x128   :  { %2265 = vmatprep.subr.bf16.mxu1 %v7404_v7 }
 0x12a   :  { %2391 = vmatpush1.bf16.msra.mxu0 %v7393_v6 }
 0x12b   :  { %2392 = vmatprep.subr.bf16.mxu0 %v7401_v8  ;;  %2266 = vmatpush1.bf16.msra.mxu1 %v7402_v9  ;;  %v7426_v8 = vld [vmem:[#allocation10 + $0x330] ss:$24 sps:$4 sm:$0xff]  }
 0x12c   :  { %2267 = vmatprep.subr.bf16.mxu1 %v7410_v13  ;;  %v7429_v9 = vld [vmem:[#allocation10 + $0x338] ss:$24 sps:$4 sm:$0xff]  }
 0x12e   :  { %2393 = vmatpush1.bf16.msra.mxu0 %v7399_v10 }
 0x12f   :  { %2394 = vmatprep.subr.bf16.mxu0 %v7407_v11  ;;  %2268 = vmatpush1.bf16.msra.mxu1 %v7408_v15 }
 0x130   :  { %2269 = vmatprep.subr.bf16.mxu1 %v7416_v17  ;;  %v7434_v17 = vld [vmem:[#allocation10 + $0x364] ss:$24 sps:$4 sm:$0xff]  }
 0x132   :  { %2395 = vmatpush1.bf16.msra.mxu0 %v7405_v12 }
 0x133   :  { %2396 = vmatprep.subr.bf16.mxu0 %v7413_v14  ;;  %2270 = vmatpush1.bf16.msra.mxu1 %v7414_v19 }
 0x134   :  { %2282 = vmatprep.subr.bf16.mxu1 %v7422_v21 }
 0x136   :  { %2397 = vmatpush1.bf16.msra.mxu0 %v7411_v16 }
 0x137   :  { %2398 = vmatprep.subr.bf16.mxu0 %v7419_v18  ;;  %v7437_v18 = vld [vmem:[#allocation10 + $0x36c] ss:$24 sps:$4 sm:$0xff]  }
 0x13a   :  { %2399 = vmatpush1.bf16.msra.mxu0 %v7417_v20 }
 0x13b   :  { %2411 = vmatprep.subr.bf16.mxu0 %v7425_v22  ;;  %v7432_v22 = vld [vmem:[#allocation10 + $0x360] ss:$24 sps:$4 sm:$0xff]  }
 0x1c8   :  { %v366_v32 = vpop.f32.mrb[0].mxu0  ;;  %v409_v43 = vpop.f32.mrb[0].mxu1 }
 0x1c9   :  { %v367_v35 = vadd.f32 %v366_v32, %v232_v29  ;;  %v368_v36 = vpop.f32.mrb[1].mxu0  ;;  %v410_v45 = vadd.f32 %v409_v43, %v240_v33  ;;  %v411_v46 = vpop.f32.mrb[1].mxu1  ;;  %v7450_v43 = vld [vmem:[#allocation10 + $0x3f0] ss:$24 sps:$4 sm:$0xff]  }
 0x1ca   :  { %v369_v38 = vadd.f32 %v368_v36, %v236_v31  ;;  %v370_v39 = vpop.f32.mrb[2].mxu0  ;;  %v412_v51 = vadd.f32 %v411_v46, %v244_v37  ;;  %v413_v52 = vpop.f32.mrb[2].mxu1  ;;  %v7446_v36 = vld [vmem:[#allocation10 + $0x3c4] ss:$24 sps:$4 sm:$0xff]  }
 0x1cb   :  { %v371_v41 = vadd.f32 %v370_v39, %v232_v29  ;;  %v372_v42 = vpop.f32.mrb[3].mxu0  ;;  %v461_v48 = vmax.f32 %v367_v35, 0.0  ;;  %v463_v56 = vmax.f32 %v410_v45, 0.0  ;;  %v414_v57 = vadd.f32 %v413_v52, %v240_v33  ;;  %v415_v58 = vpop.f32.mrb[3].mxu1  ;;  %v7440_v29 = vld [vmem:[#allocation10 + $0x394] ss:$24 sps:$4 sm:$0xff]  }
 0x1cc   :  { %v373_v44 = vadd.f32 %v372_v42, %v236_v31  ;;  %v462_v49 = vmax.f32 %v369_v38, 0.0  ;;  %v464_v62 = vmax.f32 %v412_v51, 0.0  ;;  %v416_v63 = vadd.f32 %v415_v58, %v244_v37  ;;  %v7443_v31 = vld [vmem:[#allocation10 + $0x39c] ss:$24 sps:$4 sm:$0xff]   ;;  %v7438_v33 = vld [vmem:[#allocation10 + $0x390] ss:$24 sps:$4 sm:$0xff]  }
 0x1cd   :  { %v467_v50 = vmax.f32 %v371_v41, 0.0  ;;  %v469_v2 = vmax.f32 %v414_v57, 0.0  ;;  %v7441_v35 = vld [vmem:[#allocation10 + $0x398] ss:$24 sps:$4 sm:$0xff]   ;;  %v7449_v37 = vld [vmem:[#allocation10 + $0x3cc] ss:$24 sps:$4 sm:$0xff]  }
 0x1ce   :  { %v468_v53 = vmax.f32 %v373_v44, 0.0  ;;  %v470_v5 = vmax.f32 %v416_v63, 0.0  ;;  %v7444_v38 = vld [vmem:[#allocation10 + $0x3c0] ss:$24 sps:$4 sm:$0xff]   ;;  %v7452_v41 = vld [vmem:[#allocation10 + $0x3f4] ss:$24 sps:$4 sm:$0xff]  }
 0x1cf   :  { %v8944_v60 = vpack.c.bf16 %v467_v50, %v461_v48  ;;  %v8950_v10 = vpack.c.bf16 %v469_v2, %v463_v56  ;;  %v7447_v39 = vld [vmem:[#allocation10 + $0x3c8] ss:$24 sps:$4 sm:$0xff]   ;;  %v7455_v42 = vld [vmem:[#allocation10 + $0x3fc] ss:$24 sps:$4 sm:$0xff]   ;;  %v7453_v44 = vld [vmem:[#allocation10 + $0x3f8] ss:$24 sps:$4 sm:$0xff]  }
 0x1d0   :  { %v8946_v1 = vpack.c.bf16 %v468_v53, %v462_v49  ;;  %v452_v3 = vpop.f32.mrb[4].mxu0  ;;  %v8954_v13 = vpack.c.bf16 %v470_v5, %v464_v62  ;;  %v7458_v45 = vld [vmem:[#allocation10 + $0x424] ss:$24 sps:$4 sm:$0xff]   ;;  %v7459_v48 = vld [vmem:[#allocation10 + $0x428] ss:$24 sps:$4 sm:$0xff]  }
 0x1d1   :  { %v453_v6 = vadd.f32 %v452_v3, %v248_v47  ;;  %v454_v7 = vpop.f32.mrb[5].mxu0  ;;  %v7461_v46 = vld [vmem:[#allocation10 + $0x42c] ss:$24 sps:$4 sm:$0xff]   ;;  %v7467_v50 = vld [vmem:[#allocation10 + $0x45c] ss:$24 sps:$4 sm:$0xff]  }
 0x1d2   :  { %2271 = vmatprep.mubr.bf16.mxu1 %v8946_v1  ;;  %2400 = vmatprep.mubr.bf16.mxu0 %v8946_v1  ;;  %v455_v11 = vadd.f32 %v454_v7, %v252_v59  ;;  %v456_v12 = vpop.f32.mrb[6].mxu0  ;;  %v7464_v49 = vld [vmem:[#allocation10 + $0x454] ss:$24 sps:$4 sm:$0xff]   ;;  %v7462_v51 = vld [vmem:[#allocation10 + $0x450] ss:$24 sps:$4 sm:$0xff]  }
 0x1d3   :  { %2272 = vmatmul.mubr.bf16.vlgmr.msra.gmra.mrb[4].mxu1 %v8944_v60  ;;  %2401 = vmatmul.mubr.bf16.vlgmr.msra.gmra.mrb[8].mxu0 %v8944_v60  ;;  %v465_v14 = vmax.f32 %v453_v6, 0.0  ;;  %v457_v15 = vadd.f32 %v456_v12, %v248_v47  ;;  %v458_v16 = vpop.f32.mrb[7].mxu0  ;;  %v7456_v47 = vld [vmem:[#allocation10 + $0x420] ss:$24 sps:$4 sm:$0xff]   ;;  %v7470_v53 = vld [vmem:[#allocation10 + $0x484] ss:$24 sps:$4 sm:$0xff]  }
 0x1d4   :  { %2283 = vmatpush1.bf16.msra.mxu1 %v7420_v54  ;;  %2412 = vmatpush1.bf16.msra.mxu0 %v7423_v55  ;;  %v466_v19 = vmax.f32 %v455_v11, 0.0  ;;  %v459_v20 = vadd.f32 %v458_v16, %v252_v59  ;;  %v7465_v52 = vld [vmem:[#allocation10 + $0x458] ss:$24 sps:$4 sm:$0xff]   ;;  %v7473_v54 = vld [vmem:[#allocation10 + $0x48c] ss:$24 sps:$4 sm:$0xff]  }
 0x1d5   :  { %2284 = vmatprep.subr.bf16.mxu1 %v7428_v61  ;;  %2413 = vmatprep.subr.bf16.mxu0 %v7431_v4  ;;  %v471_v21 = vmax.f32 %v457_v15, 0.0  ;;  %v7468_v55 = vld [vmem:[#allocation10 + $0x480] ss:$24 sps:$4 sm:$0xff]   ;;  %v7476_v57 = vld [vmem:[#allocation10 + $0x4b4] ss:$24 sps:$4 sm:$0xff]  }
 0x1d6   :  { %2314 = vmatprep.mubr.bf16.mxu1 %v8954_v13  ;;  %2443 = vmatprep.mubr.bf16.mxu0 %v8954_v13  ;;  %v472_v24 = vmax.f32 %v459_v20, 0.0  ;;  %v7471_v56 = vld [vmem:[#allocation10 + $0x488] ss:$24 sps:$4 sm:$0xff]   ;;  %v7479_v58 = vld [vmem:[#allocation10 + $0x4bc] ss:$24 sps:$4 sm:$0xff]  }
 0x1d7   :  { %v8958_v25 = vpack.c.bf16 %v471_v21, %v465_v14  ;;  %v7474_v59 = vld [vmem:[#allocation10 + $0x4b0] ss:$24 sps:$4 sm:$0xff]   ;;  %v7482_v62 = vld [vmem:[#allocation10 + $0x4e4] ss:$24 sps:$4 sm:$0xff]   ;;  %v7480_v2 = vld [vmem:[#allocation10 + $0x4e0] ss:$24 sps:$4 sm:$0xff]  }
 0x1d8   :  { %2285 = vmatpush1.bf16.msra.mxu1 %v7426_v8  ;;  %2414 = vmatpush1.bf16.msra.mxu0 %v7429_v9  ;;  %v8960_v32 = vpack.c.bf16 %v472_v24, %v466_v19  ;;  %v7477_v61 = vld [vmem:[#allocation10 + $0x4b8] ss:$24 sps:$4 sm:$0xff]   ;;  %v7485_v63 = vld [vmem:[#allocation10 + $0x4ec] ss:$24 sps:$4 sm:$0xff]   ;;  %v7483_v3 = vld [vmem:[#allocation10 + $0x4e8] ss:$24 sps:$4 sm:$0xff]  }
 0x1d9   :  { %2286 = vmatprep.subr.bf16.mxu1 %v7434_v17  ;;  %2415 = vmatprep.subr.bf16.mxu0 %v7437_v18  ;;  %v7488_v4 = vld [vmem:[#allocation10 + $0x514] ss:$24 sps:$4 sm:$0xff]   ;;  %v7486_v6 = vld [vmem:[#allocation10 + $0x510] ss:$24 sps:$4 sm:$0xff]   ;;  %v7494_v8 = vld [vmem:[#allocation10 + $0x544] ss:$24 sps:$4 sm:$0xff]  }
 0x1da   :  { %v7491_v5 = vld [vmem:[#allocation10 + $0x51c] ss:$24 sps:$4 sm:$0xff]   ;;  %v7489_v7 = vld [vmem:[#allocation10 + $0x518] ss:$24 sps:$4 sm:$0xff]   ;;  %v7497_v9 = vld [vmem:[#allocation10 + $0x54c] ss:$24 sps:$4 sm:$0xff]  }
 0x1db   :  { %v7492_v11 = vld [vmem:[#allocation10 + $0x540] ss:$24 sps:$4 sm:$0xff]   ;;  %v7500_v14 = vld [vmem:[#allocation10 + $0x574] ss:$24 sps:$4 sm:$0xff]   ;;  %v7498_v16 = vld [vmem:[#allocation10 + $0x570] ss:$24 sps:$4 sm:$0xff]  }
 0x1dc   :  { %2287 = vmatpush1.bf16.msra.mxu1 %v7432_v22  ;;  %2416 = vmatpush1.bf16.msra.mxu0 %v7435_v23  ;;  %v7495_v12 = vld [vmem:[#allocation10 + $0x548] ss:$24 sps:$4 sm:$0xff]   ;;  %v7503_v15 = vld [vmem:[#allocation10 + $0x57c] ss:$24 sps:$4 sm:$0xff]   ;;  %v7501_v17 = vld [vmem:[#allocation10 + $0x578] ss:$24 sps:$4 sm:$0xff]  }
 0x1dd   :  { %2288 = vmatprep.subr.bf16.mxu1 %v7440_v29  ;;  %2417 = vmatprep.subr.bf16.mxu0 %v7443_v31  ;;  %v7506_v18 = vld [vmem:[#allocation10 + $0x5a4] ss:$24 sps:$4 sm:$0xff]   ;;  %v7504_v20 = vld [vmem:[#allocation10 + $0x5a0] ss:$24 sps:$4 sm:$0xff]   ;;  %v7512_v22 = vld [vmem:[#allocation10 + $0x5d4] ss:$24 sps:$4 sm:$0xff]  }
 0x1de   :  { %v7509_v19 = vld [vmem:[#allocation10 + $0x5ac] ss:$24 sps:$4 sm:$0xff]   ;;  %v7507_v21 = vld [vmem:[#allocation10 + $0x5a8] ss:$24 sps:$4 sm:$0xff]   ;;  %v7515_v23 = vld [vmem:[#allocation10 + $0x5dc] ss:$24 sps:$4 sm:$0xff]  }
 0x1df   :  { %v7510_v24 = vld [vmem:[#allocation10 + $0x5d0] ss:$24 sps:$4 sm:$0xff]   ;;  %v7518_v31 = vld [vmem:[#allocation10 + $0x604] ss:$24 sps:$4 sm:$0xff]  }
 0x1e0   :  { %2289 = vmatpush1.bf16.msra.mxu1 %v7438_v33  ;;  %2418 = vmatpush1.bf16.msra.mxu0 %v7441_v35  ;;  %v7513_v29 = vld [vmem:[#allocation10 + $0x5d8] ss:$24 sps:$4 sm:$0xff]   ;;  %v7521_v33 = vld [vmem:[#allocation10 + $0x60c] ss:$24 sps:$4 sm:$0xff]  }
 0x1e1   :  { %2290 = vmatprep.subr.bf16.mxu1 %v7446_v36  ;;  %2419 = vmatprep.subr.bf16.mxu0 %v7449_v37  ;;  %v7516_v35 = vld [vmem:[#allocation10 + $0x600] ss:$24 sps:$4 sm:$0xff]   ;;  %v7524_v37 = vld [vmem:[#allocation10 + $0x634] ss:$24 sps:$4 sm:$0xff]  }
 0x1e2   :  { %v7519_v36 = vld [vmem:[#allocation10 + $0x608] ss:$24 sps:$4 sm:$0xff]  }
 0x1e4   :  { %2291 = vmatpush1.bf16.msra.mxu1 %v7444_v38  ;;  %2420 = vmatpush1.bf16.msra.mxu0 %v7447_v39  ;;  %v7527_v38 = vld [vmem:[#allocation10 + $0x63c] ss:$24 sps:$4 sm:$0xff]   ;;  %v7522_v39 = vld [vmem:[#allocation10 + $0x630] ss:$24 sps:$4 sm:$0xff]  }
 0x1e5   :  { %2292 = vmatprep.subr.bf16.mxu1 %v7452_v41  ;;  %2421 = vmatprep.subr.bf16.mxu0 %v7455_v42  ;;  %v7525_v41 = vld [vmem:[#allocation10 + $0x638] ss:$24 sps:$4 sm:$0xff]   ;;  %v7530_v42 = vld [vmem:[#allocation10 + $0x664] ss:$24 sps:$4 sm:$0xff]  }
 0x1e8   :  { %2293 = vmatpush1.bf16.msra.mxu1 %v7450_v43  ;;  %2422 = vmatpush1.bf16.msra.mxu0 %v7453_v44  ;;  %v7533_v43 = vld [vmem:[#allocation10 + $0x66c] ss:$24 sps:$4 sm:$0xff]   ;;  %v7528_v44 = vld [vmem:[#allocation10 + $0x660] ss:$24 sps:$4 sm:$0xff]  }
 0x1e9   :  { %2294 = vmatprep.subr.bf16.mxu1 %v7458_v45  ;;  %2423 = vmatprep.subr.bf16.mxu0 %v7461_v46  ;;  %v7531_v45 = vld [vmem:[#allocation10 + $0x668] ss:$24 sps:$4 sm:$0xff]   ;;  %v7536_v46 = vld [vmem:[#allocation10 + $0x694] ss:$24 sps:$4 sm:$0xff]  }
 0x1ec   :  { %2295 = vmatpush1.bf16.msra.mxu1 %v7456_v47  ;;  %2424 = vmatpush1.bf16.msra.mxu0 %v7459_v48  ;;  %v7539_v47 = vld [vmem:[#allocation10 + $0x69c] ss:$24 sps:$4 sm:$0xff]   ;;  %v7534_v48 = vld [vmem:[#allocation10 + $0x690] ss:$24 sps:$4 sm:$0xff]  }
 0x1ed   :  { %2296 = vmatprep.subr.bf16.mxu1 %v7464_v49  ;;  %2425 = vmatprep.subr.bf16.mxu0 %v7467_v50  ;;  %v7537_v49 = vld [vmem:[#allocation10 + $0x698] ss:$24 sps:$4 sm:$0xff]   ;;  %v7542_v50 = vld [vmem:[#allocation10 + $0x6c4] ss:$24 sps:$4 sm:$0xff]  }
 0x1f0   :  { %2297 = vmatpush1.bf16.msra.mxu1 %v7462_v51  ;;  %2426 = vmatpush1.bf16.msra.mxu0 %v7465_v52  ;;  %v7545_v51 = vld [vmem:[#allocation10 + $0x6cc] ss:$24 sps:$4 sm:$0xff]   ;;  %v7540_v52 = vld [vmem:[#allocation10 + $0x6c0] ss:$24 sps:$4 sm:$0xff]  }
 0x1f1   :  { %2298 = vmatprep.subr.bf16.mxu1 %v7470_v53  ;;  %2427 = vmatprep.subr.bf16.mxu0 %v7473_v54  ;;  %v7543_v53 = vld [vmem:[#allocation10 + $0x6c8] ss:$24 sps:$4 sm:$0xff]   ;;  %v7548_v54 = vld [vmem:[#allocation10 + $0x6f4] ss:$24 sps:$4 sm:$0xff]  }
 0x1f4   :  { %2299 = vmatpush1.bf16.msra.mxu1 %v7468_v55  ;;  %2428 = vmatpush1.bf16.msra.mxu0 %v7471_v56  ;;  %v7551_v55 = vld [vmem:[#allocation10 + $0x6fc] ss:$24 sps:$4 sm:$0xff]   ;;  %v7546_v56 = vld [vmem:[#allocation10 + $0x6f0] ss:$24 sps:$4 sm:$0xff]  }
 0x1f5   :  { %2300 = vmatprep.subr.bf16.mxu1 %v7476_v57  ;;  %2429 = vmatprep.subr.bf16.mxu0 %v7479_v58  ;;  %v7549_v57 = vld [vmem:[#allocation10 + $0x6f8] ss:$24 sps:$4 sm:$0xff]   ;;  %v7554_v58 = vld [vmem:[#allocation10 + $0x724] ss:$24 sps:$4 sm:$0xff]  }
 0x1f8   :  { %2301 = vmatpush1.bf16.msra.mxu1 %v7474_v59  ;;  %2430 = vmatpush1.bf16.msra.mxu0 %v7477_v61  ;;  %v7557_v59 = vld [vmem:[#allocation10 + $0x72c] ss:$24 sps:$4 sm:$0xff]   ;;  %v7552_v61 = vld [vmem:[#allocation10 + $0x720] ss:$24 sps:$4 sm:$0xff]  }
 0x1f9   :  { %2302 = vmatprep.subr.bf16.mxu1 %v7482_v62  ;;  %2431 = vmatprep.subr.bf16.mxu0 %v7485_v63  ;;  %v7555_v62 = vld [vmem:[#allocation10 + $0x728] ss:$24 sps:$4 sm:$0xff]   ;;  %v7560_v63 = vld [vmem:[#allocation10 + $0x754] ss:$24 sps:$4 sm:$0xff]  }
 0x1fc   :  { %2303 = vmatpush1.bf16.msra.mxu1 %v7480_v2  ;;  %2432 = vmatpush1.bf16.msra.mxu0 %v7483_v3  ;;  %v7563_v2 = vld [vmem:[#allocation10 + $0x75c] ss:$24 sps:$4 sm:$0xff]   ;;  %v7558_v3 = vld [vmem:[#allocation10 + $0x750] ss:$24 sps:$4 sm:$0xff]  }
 0x1fd   :  { %2304 = vmatprep.subr.bf16.mxu1 %v7488_v4  ;;  %2433 = vmatprep.subr.bf16.mxu0 %v7491_v5  ;;  %v7561_v4 = vld [vmem:[#allocation10 + $0x758] ss:$24 sps:$4 sm:$0xff]   ;;  %v7566_v5 = vld [vmem:[#allocation10 + $0x784] ss:$24 sps:$4 sm:$0xff]  }
 0x200   :  { %2305 = vmatpush1.bf16.msra.mxu1 %v7486_v6  ;;  %2434 = vmatpush1.bf16.msra.mxu0 %v7489_v7  ;;  %v7569_v6 = vld [vmem:[#allocation10 + $0x78c] ss:$24 sps:$4 sm:$0xff]   ;;  %v7564_v7 = vld [vmem:[#allocation10 + $0x780] ss:$24 sps:$4 sm:$0xff]  }
 0x201   :  { %2306 = vmatprep.subr.bf16.mxu1 %v7494_v8  ;;  %2435 = vmatprep.subr.bf16.mxu0 %v7497_v9  ;;  %v7567_v8 = vld [vmem:[#allocation10 + $0x788] ss:$24 sps:$4 sm:$0xff]   ;;  %v7572_v9 = vld [vmem:[#allocation10 + $0x7b4] ss:$24 sps:$4 sm:$0xff]  }
 0x204   :  { %2307 = vmatpush1.bf16.msra.mxu1 %v7492_v11  ;;  %2436 = vmatpush1.bf16.msra.mxu0 %v7495_v12  ;;  %v7575_v11 = vld [vmem:[#allocation10 + $0x7bc] ss:$24 sps:$4 sm:$0xff]   ;;  %v7570_v12 = vld [vmem:[#allocation10 + $0x7b0] ss:$24 sps:$4 sm:$0xff]  }
 0x205   :  { %2308 = vmatprep.subr.bf16.mxu1 %v7500_v14  ;;  %2437 = vmatprep.subr.bf16.mxu0 %v7503_v15  ;;  %v7573_v14 = vld [vmem:[#allocation10 + $0x7b8] ss:$24 sps:$4 sm:$0xff]   ;;  %v7578_v15 = vld [vmem:[#allocation10 + $0x7e4] ss:$24 sps:$4 sm:$0xff]  }
 0x208   :  { %2309 = vmatpush1.bf16.msra.mxu1 %v7498_v16  ;;  %2438 = vmatpush1.bf16.msra.mxu0 %v7501_v17  ;;  %v7581_v16 = vld [vmem:[#allocation10 + $0x7ec] ss:$24 sps:$4 sm:$0xff]   ;;  %v7576_v17 = vld [vmem:[#allocation10 + $0x7e0] ss:$24 sps:$4 sm:$0xff]  }
 0x209   :  { %2310 = vmatprep.subr.bf16.mxu1 %v7506_v18  ;;  %2439 = vmatprep.subr.bf16.mxu0 %v7509_v19  ;;  %v7579_v18 = vld [vmem:[#allocation10 + $0x7e8] ss:$24 sps:$4 sm:$0xff]   ;;  %v7584_v19 = vld [vmem:[#allocation10 + $0x814] ss:$24 sps:$4 sm:$0xff]  }
 0x20c   :  { %2311 = vmatpush1.bf16.msra.mxu1 %v7504_v20  ;;  %2440 = vmatpush1.bf16.msra.mxu0 %v7507_v21  ;;  %v7587_v20 = vld [vmem:[#allocation10 + $0x81c] ss:$24 sps:$4 sm:$0xff]   ;;  %v7582_v21 = vld [vmem:[#allocation10 + $0x810] ss:$24 sps:$4 sm:$0xff]  }
 0x20d   :  { %2312 = vmatprep.subr.bf16.mxu1 %v7512_v22  ;;  %2441 = vmatprep.subr.bf16.mxu0 %v7515_v23  ;;  %v7585_v22 = vld [vmem:[#allocation10 + $0x818] ss:$24 sps:$4 sm:$0xff]   ;;  %v7590_v23 = vld [vmem:[#allocation10 + $0x844] ss:$24 sps:$4 sm:$0xff]  }
 0x210   :  { %2313 = vmatpush1.bf16.msra.mxu1 %v7510_v24  ;;  %2442 = vmatpush1.bf16.msra.mxu0 %v7513_v29  ;;  %v7593_v24 = vld [vmem:[#allocation10 + $0x84c] ss:$24 sps:$4 sm:$0xff]   ;;  %v7588_v29 = vld [vmem:[#allocation10 + $0x840] ss:$24 sps:$4 sm:$0xff]  }
 0x211   :  { %2325 = vmatprep.subr.bf16.mxu1 %v7518_v31  ;;  %2454 = vmatprep.subr.bf16.mxu0 %v7521_v33  ;;  %v7591_v31 = vld [vmem:[#allocation10 + $0x848] ss:$24 sps:$4 sm:$0xff]   ;;  %v7596_v33 = vld [vmem:[#allocation10 + $0x874] ss:$24 sps:$4 sm:$0xff]  }
 0x213   :  { %2315 = vmatmul.mubr.bf16.vlgmr.msra.gmra.mrb[4].mxu1 %v8950_v10  ;;  %2444 = vmatmul.mubr.bf16.vlgmr.msra.gmra.mrb[8].mxu0 %v8950_v10 }
 0x214   :  { %2326 = vmatpush1.bf16.msra.mxu1 %v7516_v35  ;;  %2455 = vmatpush1.bf16.msra.mxu0 %v7519_v36  ;;  %v7599_v35 = vld [vmem:[#allocation10 + $0x87c] ss:$24 sps:$4 sm:$0xff]   ;;  %v7594_v36 = vld [vmem:[#allocation10 + $0x870] ss:$24 sps:$4 sm:$0xff]  }
 0x215   :  { %2327 = vmatprep.subr.bf16.mxu1 %v7524_v37  ;;  %2456 = vmatprep.subr.bf16.mxu0 %v7527_v38  ;;  %v7597_v37 = vld [vmem:[#allocation10 + $0x878] ss:$24 sps:$4 sm:$0xff]   ;;  %v7602_v38 = vld [vmem:[#allocation10 + $0x8a4] ss:$24 sps:$4 sm:$0xff]  }
 0x216   :  { %2357 = vmatprep.mubr.bf16.mxu1 %v8960_v32  ;;  %2486 = vmatprep.mubr.bf16.mxu0 %v8960_v32 }
 0x218   :  { %2328 = vmatpush1.bf16.msra.mxu1 %v7522_v39  ;;  %2457 = vmatpush1.bf16.msra.mxu0 %v7525_v41  ;;  %v7605_v39 = vld [vmem:[#allocation10 + $0x8ac] ss:$24 sps:$4 sm:$0xff]   ;;  %v7600_v41 = vld [vmem:[#allocation10 + $0x8a0] ss:$24 sps:$4 sm:$0xff]  }
 0x219   :  { %2329 = vmatprep.subr.bf16.mxu1 %v7530_v42  ;;  %2458 = vmatprep.subr.bf16.mxu0 %v7533_v43  ;;  %v7603_v42 = vld [vmem:[#allocation10 + $0x8a8] ss:$24 sps:$4 sm:$0xff]   ;;  %v7608_v43 = vld [vmem:[#allocation10 + $0x8d4] ss:$24 sps:$4 sm:$0xff]  }
 0x21c   :  { %2330 = vmatpush1.bf16.msra.mxu1 %v7528_v44  ;;  %2459 = vmatpush1.bf16.msra.mxu0 %v7531_v45  ;;  %v7611_v44 = vld [vmem:[#allocation10 + $0x8dc] ss:$24 sps:$4 sm:$0xff]   ;;  %v7606_v45 = vld [vmem:[#allocation10 + $0x8d0] ss:$24 sps:$4 sm:$0xff]  }
 0x21d   :  { %2331 = vmatprep.subr.bf16.mxu1 %v7536_v46  ;;  %2460 = vmatprep.subr.bf16.mxu0 %v7539_v47  ;;  %v7609_v46 = vld [vmem:[#allocation10 + $0x8d8] ss:$24 sps:$4 sm:$0xff]   ;;  %v7614_v47 = vld [vmem:[#allocation10 + $0x14] ss:$24 sps:$4 sm:$0xff]  }
 0x220   :  { %2332 = vmatpush1.bf16.msra.mxu1 %v7534_v48  ;;  %2461 = vmatpush1.bf16.msra.mxu0 %v7537_v49  ;;  %v7612_v48 = vld [vmem:[#allocation10 + $0x10] ss:$24 sps:$4 sm:$0xff]   ;;  %v7617_v49 = vld [vmem:[#allocation10 + $0x44] ss:$24 sps:$4 sm:$0xff]  }
 0x221   :  { %2333 = vmatprep.subr.bf16.mxu1 %v7542_v50  ;;  %2462 = vmatprep.subr.bf16.mxu0 %v7545_v51  ;;  %v7615_v50 = vld [vmem:[#allocation10 + $0x40] ss:$24 sps:$4 sm:$0xff]   ;;  %v7620_v51 = vld [vmem:[#allocation10 + $0x74] ss:$24 sps:$4 sm:$0xff]  }
 0x224   :  { %2334 = vmatpush1.bf16.msra.mxu1 %v7540_v52  ;;  %2463 = vmatpush1.bf16.msra.mxu0 %v7543_v53  ;;  %v7618_v52 = vld [vmem:[#allocation10 + $0x70] ss:$24 sps:$4 sm:$0xff]   ;;  %v7623_v53 = vld [vmem:[#allocation10 + $0xa4] ss:$24 sps:$4 sm:$0xff]  }
 0x225   :  { %2335 = vmatprep.subr.bf16.mxu1 %v7548_v54  ;;  %2464 = vmatprep.subr.bf16.mxu0 %v7551_v55  ;;  %v7621_v54 = vld [vmem:[#allocation10 + $0xa0] ss:$24 sps:$4 sm:$0xff]   ;;  %v7626_v55 = vld [vmem:[#allocation10 + $0xd4] ss:$24 sps:$4 sm:$0xff]  }
 0x228   :  { %2336 = vmatpush1.bf16.msra.mxu1 %v7546_v56  ;;  %2465 = vmatpush1.bf16.msra.mxu0 %v7549_v57  ;;  %v7624_v56 = vld [vmem:[#allocation10 + $0xd0] ss:$24 sps:$4 sm:$0xff]   ;;  %v7629_v57 = vld [vmem:[#allocation10 + $0x104] ss:$24 sps:$4 sm:$0xff]  }
 0x229   :  { %2337 = vmatprep.subr.bf16.mxu1 %v7554_v58  ;;  %2466 = vmatprep.subr.bf16.mxu0 %v7557_v59  ;;  %v7627_v58 = vld [vmem:[#allocation10 + $0x100] ss:$24 sps:$4 sm:$0xff]   ;;  %v7632_v59 = vld [vmem:[#allocation10 + $0x134] ss:$24 sps:$4 sm:$0xff]  }
 0x22c   :  { %2338 = vmatpush1.bf16.msra.mxu1 %v7552_v61  ;;  %2467 = vmatpush1.bf16.msra.mxu0 %v7555_v62  ;;  %v7635_v61 = vld [vmem:[#allocation10 + $0x164] ss:$24 sps:$4 sm:$0xff]   ;;  %v7633_v62 = vld [vmem:[#allocation10 + $0x160] ss:$24 sps:$4 sm:$0xff]  }
 0x22d   :  { %2339 = vmatprep.subr.bf16.mxu1 %v7560_v63  ;;  %2468 = vmatprep.subr.bf16.mxu0 %v7563_v2  ;;  %v7638_v63 = vld [vmem:[#allocation10 + $0x194] ss:$24 sps:$4 sm:$0xff]   ;;  %v7636_v2 = vld [vmem:[#allocation10 + $0x190] ss:$24 sps:$4 sm:$0xff]  }
 0x230   :  { %2340 = vmatpush1.bf16.msra.mxu1 %v7558_v3  ;;  %2469 = vmatpush1.bf16.msra.mxu0 %v7561_v4  ;;  %v7641_v3 = vld [vmem:[#allocation10 + $0x1c4] ss:$24 sps:$4 sm:$0xff]   ;;  %v7639_v4 = vld [vmem:[#allocation10 + $0x1c0] ss:$24 sps:$4 sm:$0xff]  }
 0x231   :  { %2341 = vmatprep.subr.bf16.mxu1 %v7566_v5  ;;  %2470 = vmatprep.subr.bf16.mxu0 %v7569_v6  ;;  %v7644_v5 = vld [vmem:[#allocation10 + $0x1f4] ss:$24 sps:$4 sm:$0xff]   ;;  %v7642_v6 = vld [vmem:[#allocation10 + $0x1f0] ss:$24 sps:$4 sm:$0xff]  }
 0x234   :  { %2342 = vmatpush1.bf16.msra.mxu1 %v7564_v7  ;;  %2471 = vmatpush1.bf16.msra.mxu0 %v7567_v8  ;;  %v7647_v7 = vld [vmem:[#allocation10 + $0x224] ss:$24 sps:$4 sm:$0xff]   ;;  %v7645_v8 = vld [vmem:[#allocation10 + $0x220] ss:$24 sps:$4 sm:$0xff]  }
 0x235   :  { %2343 = vmatprep.subr.bf16.mxu1 %v7572_v9  ;;  %2472 = vmatprep.subr.bf16.mxu0 %v7575_v11  ;;  %v7650_v9 = vld [vmem:[#allocation10 + $0x254] ss:$24 sps:$4 sm:$0xff]   ;;  %v7648_v11 = vld [vmem:[#allocation10 + $0x250] ss:$24 sps:$4 sm:$0xff]  }
 0x238   :  { %2344 = vmatpush1.bf16.msra.mxu1 %v7570_v12  ;;  %2473 = vmatpush1.bf16.msra.mxu0 %v7573_v14  ;;  %v7653_v12 = vld [vmem:[#allocation10 + $0x284] ss:$24 sps:$4 sm:$0xff]   ;;  %v7651_v14 = vld [vmem:[#allocation10 + $0x280] ss:$24 sps:$4 sm:$0xff]  }
 0x239   :  { %2345 = vmatprep.subr.bf16.mxu1 %v7578_v15  ;;  %2474 = vmatprep.subr.bf16.mxu0 %v7581_v16  ;;  %v7656_v15 = vld [vmem:[#allocation10 + $0x2b4] ss:$24 sps:$4 sm:$0xff]   ;;  %v7654_v16 = vld [vmem:[#allocation10 + $0x2b0] ss:$24 sps:$4 sm:$0xff]  }
 0x23c   :  { %2346 = vmatpush1.bf16.msra.mxu1 %v7576_v17  ;;  %2475 = vmatpush1.bf16.msra.mxu0 %v7579_v18  ;;  %v7659_v17 = vld [vmem:[#allocation10 + $0x2e4] ss:$24 sps:$4 sm:$0xff]   ;;  %v7657_v18 = vld [vmem:[#allocation10 + $0x2e0] ss:$24 sps:$4 sm:$0xff]  }
 0x23d   :  { %2347 = vmatprep.subr.bf16.mxu1 %v7584_v19  ;;  %2476 = vmatprep.subr.bf16.mxu0 %v7587_v20  ;;  %v7662_v19 = vld [vmem:[#allocation10 + $0x314] ss:$24 sps:$4 sm:$0xff]   ;;  %v7756_v20 = vld [vmem:[%s9381_s6 + $0xc0] sm:$0xff]  }
 0x240   :  { %2348 = vmatpush1.bf16.msra.mxu1 %v7582_v21  ;;  %2477 = vmatpush1.bf16.msra.mxu0 %v7585_v22  ;;  %v7660_v21 = vld [vmem:[#allocation10 + $0x310] ss:$24 sps:$4 sm:$0xff]   ;;  %v7757_v22 = vld [vmem:[%s9381_s6 + $0x80] sm:$0xff]  }
 0x241   :  { %2349 = vmatprep.subr.bf16.mxu1 %v7590_v23  ;;  %2478 = vmatprep.subr.bf16.mxu0 %v7593_v24  ;;  %v7665_v23 = vld [vmem:[#allocation10 + $0x344] ss:$24 sps:$4 sm:$0xff]  }
 0x242   :  { %v7760_v24 = vld [vmem:[%s9381_s6 + $0xc8] sm:$0xff]  }
 0x244   :  { %2350 = vmatpush1.bf16.msra.mxu1 %v7588_v29  ;;  %2479 = vmatpush1.bf16.msra.mxu0 %v7591_v31  ;;  %v7663_v29 = vld [vmem:[#allocation10 + $0x340] ss:$24 sps:$4 sm:$0xff]  }
 0x245   :  { %2351 = vmatprep.subr.bf16.mxu1 %v7596_v33  ;;  %2480 = vmatprep.subr.bf16.mxu0 %v7599_v35  ;;  %v7761_v31 = vld [vmem:[%s9381_s6 + $0x88] sm:$0xff]   ;;  %v7668_v33 = vld [vmem:[#allocation10 + $0x374] ss:$24 sps:$4 sm:$0xff]  }
 0x246   :  { %v7666_v35 = vld [vmem:[#allocation10 + $0x370] ss:$24 sps:$4 sm:$0xff]  }
 0x248   :  { %2352 = vmatpush1.bf16.msra.mxu1 %v7594_v36  ;;  %2481 = vmatpush1.bf16.msra.mxu0 %v7597_v37  ;;  %v7765_v36 = vld [vmem:[%s9381_s6 + $0x90] sm:$0xff]   ;;  %v7768_v37 = vld [vmem:[%s9381_s6 + $0xd8] sm:$0xff]  }
 0x249   :  { %2353 = vmatprep.subr.bf16.mxu1 %v7602_v38  ;;  %2482 = vmatprep.subr.bf16.mxu0 %v7605_v39  ;;  %v7669_v38 = vld [vmem:[#allocation10 + $0x3a0] ss:$24 sps:$4 sm:$0xff]  }
 0x24a   :  { %v7769_v39 = vld [vmem:[%s9381_s6 + $0x98] sm:$0xff]  }
 0x24c   :  { %2354 = vmatpush1.bf16.msra.mxu1 %v7600_v41  ;;  %2483 = vmatpush1.bf16.msra.mxu0 %v7603_v42  ;;  %v7674_v41 = vld [vmem:[#allocation10 + $0x3d4] ss:$24 sps:$4 sm:$0xff]   ;;  %v7772_v42 = vld [vmem:[%s9381_s6 + $0xe0] sm:$0xff]  }
 0x24d   :  { %2355 = vmatprep.subr.bf16.mxu1 %v7608_v43  ;;  %2484 = vmatprep.subr.bf16.mxu0 %v7611_v44  ;;  %v7672_v43 = vld [vmem:[#allocation10 + $0x3d0] ss:$24 sps:$4 sm:$0xff]   ;;  %v7773_v44 = vld [vmem:[%s9381_s6 + $0xa0] sm:$0xff]  }
 0x250   :  { %2356 = vmatpush1.bf16.msra.mxu1 %v7606_v45  ;;  %2485 = vmatpush1.bf16.msra.mxu0 %v7609_v46  ;;  %v7677_v45 = vld [vmem:[#allocation10 + $0x404] ss:$24 sps:$4 sm:$0xff]  }
 0x251   :  { %2497 = vmatprep.subr.bf16.mxu1 %v7614_v47  ;;  %7091 = vmatprep.subr.bf16.mxu0 %v7756_v20  ;;  %v7776_v46 = vld [vmem:[%s9381_s6 + $0xe8] sm:$0xff]  }
 0x252   :  { %v7675_v47 = vld [vmem:[#allocation10 + $0x400] ss:$24 sps:$4 sm:$0xff]   ;;  %v7719_v20 = vld [vmem:[#allocation10 + $0x6a4] ss:$24 sps:$4 sm:$0xff]  }
 0x253   :  { %2358 = vmatmul.mubr.bf16.vlgmr.msra.gmra.mrb[4].mxu1 %v8958_v25  ;;  %2487 = vmatmul.mubr.bf16.vlgmr.msra.gmra.mrb[8].mxu0 %v8958_v25 }
 0x254   :  { %2498 = vmatpush1.bf16.msra.mxu1 %v7612_v48  ;;  %2529 = vmatprep.mubr.bf16.mxu1 %v8946_v1  ;;  %v7630_v1 = vld [vmem:[#allocation10 + $0x130] ss:$24 sps:$4 sm:$0xff]  }
 0x255   :  { %2499 = vmatprep.subr.bf16.mxu1 %v7617_v49  ;;  %7092 = vmatpush3.bf16.msra.mxu0 %v7757_v22  ;;  %v7777_v48 = vld [vmem:[%s9381_s6 + $0xa8] sm:$0xff]   ;;  %v7680_v49 = vld [vmem:[#allocation10 + $0x434] ss:$24 sps:$4 sm:$0xff]  }
 0x256   :  { %7093 = vmatprep.subr.bf16.mxu0 %v7760_v24  ;;  %v7722_v22 = vld [vmem:[#allocation10 + $0x6d4] ss:$24 sps:$4 sm:$0xff]   ;;  %v7725_v24 = vld [vmem:[#allocation10 + $0x704] ss:$24 sps:$4 sm:$0xff]  }
 0x258   :  { %2500 = vmatpush1.bf16.msra.mxu1 %v7615_v50  ;;  %v7780_v50 = vld [vmem:[%s9381_s6 + $0xf0] sm:$0xff]  }
 0x259   :  { %2501 = vmatprep.subr.bf16.mxu1 %v7620_v51  ;;  %7094 = vmatpush3.bf16.msra.mxu0 %v7761_v31  ;;  %v7678_v51 = vld [vmem:[#allocation10 + $0x430] ss:$24 sps:$4 sm:$0xff]   ;;  %v7731_v31 = vld [vmem:[#allocation10 + $0x764] ss:$24 sps:$4 sm:$0xff]  }
 0x25c   :  { %2502 = vmatpush1.bf16.msra.mxu1 %v7618_v52  ;;  %v7781_v52 = vld [vmem:[%s9381_s6 + $0xb0] sm:$0xff]  }
 0x25d   :  { %2503 = vmatprep.subr.bf16.mxu1 %v7623_v53  ;;  %v7683_v53 = vld [vmem:[#allocation10 + $0x464] ss:$24 sps:$4 sm:$0xff]  }
 0x260   :  { %2504 = vmatpush1.bf16.msra.mxu1 %v7621_v54  ;;  %v7784_v54 = vld [vmem:[%s9381_s6 + $0xf8] sm:$0xff]  }
 0x261   :  { %2505 = vmatprep.subr.bf16.mxu1 %v7626_v55  ;;  %v7681_v55 = vld [vmem:[#allocation10 + $0x460] ss:$24 sps:$4 sm:$0xff]  }
 0x264   :  { %2506 = vmatpush1.bf16.msra.mxu1 %v7624_v56  ;;  %v7785_v56 = vld [vmem:[%s9381_s6 + $0xb8] sm:$0xff]  }
 0x265   :  { %2507 = vmatprep.subr.bf16.mxu1 %v7629_v57  ;;  %v7686_v57 = vld [vmem:[#allocation10 + $0x494] ss:$24 sps:$4 sm:$0xff]  }
 0x268   :  { %2508 = vmatpush1.bf16.msra.mxu1 %v7627_v58  ;;  %v7684_v58 = vld [vmem:[#allocation10 + $0x490] ss:$24 sps:$4 sm:$0xff]  }
 0x269   :  { %2509 = vmatprep.subr.bf16.mxu1 %v7632_v59  ;;  %v7689_v59 = vld [vmem:[#allocation10 + $0x4c4] ss:$24 sps:$4 sm:$0xff]  }
 0x26c   :  { %2510 = vmatpush1.bf16.msra.mxu1 %v7630_v1  ;;  %v7788_v1 = vld [vmem:[%s9381_s6 + $0x140] sm:$0xff]  }
 0x26d   :  { %2511 = vmatprep.subr.bf16.mxu1 %v7635_v61  ;;  %v7687_v61 = vld [vmem:[#allocation10 + $0x4c0] ss:$24 sps:$4 sm:$0xff]  }
 0x270   :  { %2512 = vmatpush1.bf16.msra.mxu1 %v7633_v62  ;;  %v7692_v62 = vld [vmem:[#allocation10 + $0x4f4] ss:$24 sps:$4 sm:$0xff]  }
 0x271   :  { %2513 = vmatprep.subr.bf16.mxu1 %v7638_v63  ;;  %v7690_v63 = vld [vmem:[#allocation10 + $0x4f0] ss:$24 sps:$4 sm:$0xff]  }
 0x274   :  { %2514 = vmatpush1.bf16.msra.mxu1 %v7636_v2  ;;  %v7695_v2 = vld [vmem:[#allocation10 + $0x524] ss:$24 sps:$4 sm:$0xff]  }
 0x275   :  { %2515 = vmatprep.subr.bf16.mxu1 %v7641_v3  ;;  %v7693_v3 = vld [vmem:[#allocation10 + $0x520] ss:$24 sps:$4 sm:$0xff]  }
 0x278   :  { %2516 = vmatpush1.bf16.msra.mxu1 %v7639_v4  ;;  %v7698_v4 = vld [vmem:[#allocation10 + $0x554] ss:$24 sps:$4 sm:$0xff]  }
 0x279   :  { %2517 = vmatprep.subr.bf16.mxu1 %v7644_v5  ;;  %v7696_v5 = vld [vmem:[#allocation10 + $0x550] ss:$24 sps:$4 sm:$0xff]  }
 0x27c   :  { %2518 = vmatpush1.bf16.msra.mxu1 %v7642_v6  ;;  %v7701_v6 = vld [vmem:[#allocation10 + $0x584] ss:$24 sps:$4 sm:$0xff]  }
 0x27d   :  { %2519 = vmatprep.subr.bf16.mxu1 %v7647_v7  ;;  %v7699_v7 = vld [vmem:[#allocation10 + $0x580] ss:$24 sps:$4 sm:$0xff]  }
 0x280   :  { %2520 = vmatpush1.bf16.msra.mxu1 %v7645_v8  ;;  %v7704_v8 = vld [vmem:[#allocation10 + $0x5b4] ss:$24 sps:$4 sm:$0xff]  }
 0x281   :  { %2521 = vmatprep.subr.bf16.mxu1 %v7650_v9  ;;  %v7702_v9 = vld [vmem:[#allocation10 + $0x5b0] ss:$24 sps:$4 sm:$0xff]  }
 0x284   :  { %2522 = vmatpush1.bf16.msra.mxu1 %v7648_v11  ;;  %v7707_v11 = vld [vmem:[#allocation10 + $0x5e4] ss:$24 sps:$4 sm:$0xff]  }
 0x285   :  { %2523 = vmatprep.subr.bf16.mxu1 %v7653_v12  ;;  %v7705_v12 = vld [vmem:[#allocation10 + $0x5e0] ss:$24 sps:$4 sm:$0xff]  }
 0x288   :  { %2524 = vmatpush1.bf16.msra.mxu1 %v7651_v14  ;;  %v7710_v14 = vld [vmem:[#allocation10 + $0x614] ss:$24 sps:$4 sm:$0xff]  }
 0x289   :  { %2525 = vmatprep.subr.bf16.mxu1 %v7656_v15  ;;  %v7708_v15 = vld [vmem:[#allocation10 + $0x610] ss:$24 sps:$4 sm:$0xff]  }
 0x28c   :  { %2526 = vmatpush1.bf16.msra.mxu1 %v7654_v16  ;;  %v7713_v16 = vld [vmem:[#allocation10 + $0x644] ss:$24 sps:$4 sm:$0xff]  }
 0x28d   :  { %2527 = vmatprep.subr.bf16.mxu1 %v7659_v17  ;;  %v7711_v17 = vld [vmem:[#allocation10 + $0x640] ss:$24 sps:$4 sm:$0xff]  }
 0x290   :  { %2528 = vmatpush1.bf16.msra.mxu1 %v7657_v18  ;;  %v7716_v18 = vld [vmem:[#allocation10 + $0x674] ss:$24 sps:$4 sm:$0xff]  }
 0x291   :  { %2540 = vmatprep.subr.bf16.mxu1 %v7662_v19  ;;  %v7714_v19 = vld [vmem:[#allocation10 + $0x670] ss:$24 sps:$4 sm:$0xff]  }
 0x293   :  { %2530 = vmatmul.mubr.bf16.vlgmr.msra.gmra.mrb[8].mxu1 %v8944_v60  ;;  %v7764_v60 = vld [vmem:[%s9381_s6 + $0xd0] sm:$0xff]  }
 0x294   :  { %2541 = vmatpush1.bf16.msra.mxu1 %v7660_v21  ;;  %2572 = vmatprep.mubr.bf16.mxu1 %v8954_v13  ;;  %v7671_v13 = vld [vmem:[#allocation10 + $0x3a4] ss:$24 sps:$4 sm:$0xff]   ;;  %v7717_v21 = vld [vmem:[#allocation10 + $0x6a0] ss:$24 sps:$4 sm:$0xff]  }
 0x295   :  { %2542 = vmatprep.subr.bf16.mxu1 %v7665_v23  ;;  %7095 = vmatprep.subr.bf16.mxu0 %v7764_v60  ;;  %v7720_v23 = vld [vmem:[#allocation10 + $0x6d0] ss:$24 sps:$4 sm:$0xff]   ;;  %v7734_v60 = vld [vmem:[#allocation10 + $0x794] ss:$24 sps:$4 sm:$0xff]  }
 0x296   :  { %7096 = vmatpush3.bf16.msra.mxu0 %v7765_v36  ;;  %v7737_v36 = vld [vmem:[#allocation10 + $0x7c4] ss:$24 sps:$4 sm:$0xff]  }
 0x297   :  { %7097 = vmatprep.subr.bf16.mxu0 %v7768_v37  ;;  %v7740_v37 = vld [vmem:[#allocation10 + $0x7f4] ss:$24 sps:$4 sm:$0xff]  }
 0x298   :  { %2543 = vmatpush1.bf16.msra.mxu1 %v7663_v29  ;;  %v7728_v29 = vld [vmem:[#allocation10 + $0x734] ss:$24 sps:$4 sm:$0xff]  }
 0x299   :  { %2544 = vmatprep.subr.bf16.mxu1 %v7668_v33  ;;  %v7729_v33 = vld [vmem:[#allocation10 + $0x760] ss:$24 sps:$4 sm:$0xff]  }
 0x29a   :  { %7098 = vmatpush3.bf16.msra.mxu0 %v7769_v39  ;;  %v7743_v39 = vld [vmem:[#allocation10 + $0x824] ss:$24 sps:$4 sm:$0xff]  }
 0x29b   :  { %7099 = vmatprep.subr.bf16.mxu0 %v7772_v42  ;;  %v7746_v42 = vld [vmem:[#allocation10 + $0x854] ss:$24 sps:$4 sm:$0xff]  }
 0x29c   :  { %2545 = vmatpush1.bf16.msra.mxu1 %v7666_v35  ;;  %v7732_v35 = vld [vmem:[#allocation10 + $0x790] ss:$24 sps:$4 sm:$0xff]  }
 0x29d   :  { %2546 = vmatprep.subr.bf16.mxu1 %v7671_v13  ;;  %v7735_v13 = vld [vmem:[#allocation10 + $0x7c0] ss:$24 sps:$4 sm:$0xff]  }
 0x29e   :  { %7100 = vmatpush3.bf16.msra.mxu0 %v7773_v44  ;;  %v7749_v44 = vld [vmem:[#allocation10 + $0x884] ss:$24 sps:$4 sm:$0xff]  }
 0x29f   :  { %7101 = vmatprep.subr.bf16.mxu0 %v7776_v46  ;;  %v7752_v46 = vld [vmem:[#allocation10 + $0x8b4] ss:$24 sps:$4 sm:$0xff]  }
 0x2a0   :  { %2547 = vmatpush1.bf16.msra.mxu1 %v7669_v38  ;;  %v7738_v38 = vld [vmem:[#allocation10 + $0x7f0] ss:$24 sps:$4 sm:$0xff]  }
 0x2a1   :  { %2548 = vmatprep.subr.bf16.mxu1 %v7674_v41  ;;  %v7741_v41 = vld [vmem:[#allocation10 + $0x820] ss:$24 sps:$4 sm:$0xff]  }
 0x2a2   :  { %7102 = vmatpush3.bf16.msra.mxu0 %v7777_v48  ;;  %v7755_v48 = vld [vmem:[#allocation10 + $0x8e4] ss:$24 sps:$4 sm:$0xff]  }
 0x2a3   :  { %7103 = vmatprep.subr.bf16.mxu0 %v7780_v50  ;;  %v7758_v50 = vld [vmem:[%s9381_s6 + $0x40] sm:$0xff]  }
 0x2a4   :  { %2549 = vmatpush1.bf16.msra.mxu1 %v7672_v43  ;;  %v7744_v43 = vld [vmem:[#allocation10 + $0x850] ss:$24 sps:$4 sm:$0xff]  }
 0x2a5   :  { %2550 = vmatprep.subr.bf16.mxu1 %v7677_v45  ;;  %v7747_v45 = vld [vmem:[#allocation10 + $0x880] ss:$24 sps:$4 sm:$0xff]  }
 0x2a6   :  { %7104 = vmatpush3.bf16.msra.mxu0 %v7781_v52  ;;  %v7762_v52 = vld [vmem:[%s9381_s6 + $0x48] sm:$0xff]  }
 0x2a7   :  { %7105 = vmatprep.subr.bf16.mxu0 %v7784_v54  ;;  %v7766_v54 = vld [vmem:[%s9381_s6 + $0x50] sm:$0xff]  }
 0x2a8   :  { %2551 = vmatpush1.bf16.msra.mxu1 %v7675_v47  ;;  %v7750_v47 = vld [vmem:[#allocation10 + $0x8b0] ss:$24 sps:$4 sm:$0xff]  }
 0x2a9   :  { %2552 = vmatprep.subr.bf16.mxu1 %v7680_v49  ;;  %v7753_v49 = vld [vmem:[#allocation10 + $0x8e0] ss:$24 sps:$4 sm:$0xff]  }
 0x2aa   :  { %7106 = vmatpush3.bf16.msra.mxu0 %v7785_v56  ;;  %v7771_v56 = vld [vmem:[%s9381_s6 + $0x18] sm:$0xff]  }
 0x2ab   :  { %7113 = vmatprep.subr.bf16.mxu0 %v7788_v1  ;;  %v7778_v1 = vld [vmem:[%s9381_s6 + $0x68] sm:$0xff]  }
 0x2ac   :  { %2553 = vmatpush1.bf16.msra.mxu1 %v7678_v51  ;;  %v7759_v51 = vld [vmem:[%s9381_s6] sm:$0xff]  }
 0x2ad   :  { %2554 = vmatprep.subr.bf16.mxu1 %v7683_v53  ;;  %v7763_v53 = vld [vmem:[%s9381_s6 + $0x8] sm:$0xff]  }
 0x2b0   :  { %2555 = vmatpush1.bf16.msra.mxu1 %v7681_v55  ;;  %v7767_v55 = vld [vmem:[%s9381_s6 + $0x10] sm:$0xff]  }
 0x2b1   :  { %2556 = vmatprep.subr.bf16.mxu1 %v7686_v57  ;;  %v7774_v57 = vld [vmem:[%s9381_s6 + $0x60] sm:$0xff]  }
 0x2b4   :  { %2557 = vmatpush1.bf16.msra.mxu1 %v7684_v58  ;;  %v7775_v58 = vld [vmem:[%s9381_s6 + $0x20] sm:$0xff]  }
 0x2b5   :  { %2558 = vmatprep.subr.bf16.mxu1 %v7689_v59  ;;  %v9055_v59 = vld [vmem:[#allocation11] sm:$0x3f] }
 0x2b8   :  { %2559 = vmatpush1.bf16.msra.mxu1 %v7687_v61  ;;  %v772_v61 = vrot.slane %v9055_v59, %v8926_v26 }
 0x2b9   :  { %2560 = vmatprep.subr.bf16.mxu1 %v7692_v62  ;;  %v780_v62 = vrot.slane %v9055_v59, %v8930_v28 }
 0x2bc   :  { %2561 = vmatpush1.bf16.msra.mxu1 %v7690_v63  ;;  %v776_v63 = vrot.slane %v9055_v59, %v8928_v27 }
 0x2bd   :  { %2562 = vmatprep.subr.bf16.mxu1 %v7695_v2  ;;  %v784_v2 = vrot.slane %v9055_v59, %v8933_v30 }
 0x2c0   :  { %2563 = vmatpush1.bf16.msra.mxu1 %v7693_v3  ;;  %v7779_v3 = vld [vmem:[%s9381_s6 + $0x28] sm:$0xff]  }
 0x2c1   :  { %2564 = vmatprep.subr.bf16.mxu1 %v7698_v4  ;;  %v7782_v4 = vld [vmem:[%s9381_s6 + $0x70] sm:$0xff]  }
 0x2c4   :  { %2565 = vmatpush1.bf16.msra.mxu1 %v7696_v5 }
 0x2c5   :  { %2566 = vmatprep.subr.bf16.mxu1 %v7701_v6 }
 0x2c8   :  { %2567 = vmatpush1.bf16.msra.mxu1 %v7699_v7 }
 0x2c9   :  { %2568 = vmatprep.subr.bf16.mxu1 %v7704_v8 }
 0x2cc   :  { %2569 = vmatpush1.bf16.msra.mxu1 %v7702_v9 }
 0x2cd   :  { %2570 = vmatprep.subr.bf16.mxu1 %v7707_v11 }
 0x2d0   :  { %2571 = vmatpush1.bf16.msra.mxu1 %v7705_v12 }
 0x2d1   :  { %2583 = vmatprep.subr.bf16.mxu1 %v7710_v14 }
 0x2d3   :  { %2573 = vmatmul.mubr.bf16.vlgmr.msra.gmra.mrb[8].mxu1 %v8950_v10  ;;  %v7723_v10 = vld [vmem:[#allocation10 + $0x700] ss:$24 sps:$4 sm:$0xff]  }
 0x2d4   :  { %2584 = vmatpush1.bf16.msra.mxu1 %v7708_v15  ;;  %2615 = vmatprep.mubr.bf16.mxu1 %v8960_v32  ;;  %v7726_v32 = vld [vmem:[#allocation10 + $0x730] ss:$24 sps:$4 sm:$0xff]  }
 0x2d5   :  { %2585 = vmatprep.subr.bf16.mxu1 %v7713_v16 }
 0x2d8   :  { %2586 = vmatpush1.bf16.msra.mxu1 %v7711_v17  ;;  %v7783_v17 = vld [vmem:[%s9381_s6 + $0x30] sm:$0xff]  }
 0x2d9   :  { %2587 = vmatprep.subr.bf16.mxu1 %v7716_v18 }
 0x2dc   :  { %2588 = vmatpush1.bf16.msra.mxu1 %v7714_v19 }
 0x2dd   :  { %2589 = vmatprep.subr.bf16.mxu1 %v7719_v20 }
 0x2e0   :  { %2590 = vmatpush1.bf16.msra.mxu1 %v7717_v21 }
 0x2e1   :  { %2591 = vmatprep.subr.bf16.mxu1 %v7722_v22  ;;  %v7786_v22 = vld [vmem:[%s9381_s6 + $0x78] sm:$0xff]  }
 0x2e4   :  { %2592 = vmatpush1.bf16.msra.mxu1 %v7720_v23 }
 0x2e5   :  { %2593 = vmatprep.subr.bf16.mxu1 %v7725_v24 }
 0x2e8   :  { %2594 = vmatpush1.bf16.msra.mxu1 %v7723_v10 }
 0x2e9   :  { %2595 = vmatprep.subr.bf16.mxu1 %v7728_v29 }
 0x2ec   :  { %2596 = vmatpush1.bf16.msra.mxu1 %v7726_v32 }
 0x2ed   :  { %2597 = vmatprep.subr.bf16.mxu1 %v7731_v31 }
 0x2f0   :  { %2598 = vmatpush1.bf16.msra.mxu1 %v7729_v33 }
 0x2f1   :  { %2599 = vmatprep.subr.bf16.mxu1 %v7734_v60 }
 0x2f4   :  { %2600 = vmatpush1.bf16.msra.mxu1 %v7732_v35 }
 0x2f5   :  { %2601 = vmatprep.subr.bf16.mxu1 %v7737_v36 }
 0x2f8   :  { %2602 = vmatpush1.bf16.msra.mxu1 %v7735_v13  ;;  %v7787_v13 = vld [vmem:[%s9381_s6 + $0x38] sm:$0xff]  }
 0x2f9   :  { %2603 = vmatprep.subr.bf16.mxu1 %v7740_v37 }
 0x2fc   :  { %2604 = vmatpush1.bf16.msra.mxu1 %v7738_v38 }
 0x2fd   :  { %2605 = vmatprep.subr.bf16.mxu1 %v7743_v39 }
 0x300   :  { %2606 = vmatpush1.bf16.msra.mxu1 %v7741_v41 }
 0x301   :  { %2607 = vmatprep.subr.bf16.mxu1 %v7746_v42  ;;  %v7789_v42 = vld [vmem:[%s9381_s6 + $0x100] sm:$0xff]  }
 0x304   :  { %2608 = vmatpush1.bf16.msra.mxu1 %v7744_v43  ;;  %v7790_v43 = vld [vmem:[%s9381_s6 + $0x148] sm:$0xff]  }
 0x305   :  { %2609 = vmatprep.subr.bf16.mxu1 %v7749_v44  ;;  %v7791_v44 = vld [vmem:[%s9381_s6 + $0x108] sm:$0xff]  }
 0x308   :  { %2610 = vmatpush1.bf16.msra.mxu1 %v7747_v45  ;;  %v7792_v45 = vld [vmem:[%s9381_s6 + $0x150] sm:$0xff]  }
 0x309   :  { %2611 = vmatprep.subr.bf16.mxu1 %v7752_v46  ;;  %v7793_v46 = vld [vmem:[%s9381_s6 + $0x110] sm:$0xff]  }
 0x30c   :  { %2612 = vmatpush1.bf16.msra.mxu1 %v7750_v47  ;;  %v7794_v47 = vld [vmem:[%s9381_s6 + $0x158] sm:$0xff]  }
 0x30d   :  { %2613 = vmatprep.subr.bf16.mxu1 %v7755_v48  ;;  %v7795_v48 = vld [vmem:[%s9381_s6 + $0x118] sm:$0xff]  }
 0x310   :  { %2614 = vmatpush1.bf16.msra.mxu1 %v7753_v49  ;;  %v7796_v49 = vld [vmem:[%s9381_s6 + $0x160] sm:$0xff]  }
 0x311   :  { %7069 = vmatprep.subr.bf16.mxu1 %v7758_v50  ;;  %v7797_v50 = vld [vmem:[%s9381_s6 + $0x120] sm:$0xff]  }
 0x313   :  { %2616 = vmatmul.mubr.bf16.vlgmr.msra.gmra.mrb[8].mxu1 %v8958_v25  ;;  %v7770_v25 = vld [vmem:[%s9381_s6 + $0x58] sm:$0xff]  }
 0x314   :  { %7070 = vmatpush3.bf16.msra.mxu1 %v7759_v51  ;;  %v7798_v51 = vld [vmem:[%s9381_s6 + $0x168] sm:$0xff]  }
 0x315   :  { %7071 = vmatprep.subr.bf16.mxu1 %v7762_v52  ;;  %v7799_v52 = vld [vmem:[%s9381_s6 + $0x128] sm:$0xff]  }
 0x318   :  { %7072 = vmatpush3.bf16.msra.mxu1 %v7763_v53  ;;  %v7800_v53 = vld [vmem:[%s9381_s6 + $0x170] sm:$0xff]  }
 0x319   :  { %7073 = vmatprep.subr.bf16.mxu1 %v7766_v54  ;;  %v7801_v54 = vld [vmem:[%s9381_s6 + $0x130] sm:$0xff]  }
 0x31c   :  { %7074 = vmatpush3.bf16.msra.mxu1 %v7767_v55  ;;  %v7802_v55 = vld [vmem:[%s9381_s6 + $0x178] sm:$0xff]  }
 0x31d   :  { %7075 = vmatprep.subr.bf16.mxu1 %v7770_v25  ;;  %v7803_v25 = vld [vmem:[%s9381_s6 + $0x138] sm:$0xff]   ;;  %s8658_s6 = smov 112  }
 0x320   :  { %7076 = vmatpush3.bf16.msra.mxu1 %v7771_v56  ;;  %v3166_v56 = vld [vmem:[#allocation5] sm:$0xff] }
 0x321   :  { %7077 = vmatprep.subr.bf16.mxu1 %v7774_v57  ;;  %3170 = vrot.lane.b32.xlu0 %v3166_v56, %s8657_s30  ;;  %v3167_v57 = vld [vmem:[#allocation5 + $0x8] sm:$0xff] }
 0x324   :  { %7078 = vmatpush3.bf16.msra.mxu1 %v7775_v58  ;;  %v788_v58 = vrot.slane %v9055_v59, %v8937_v34 }
 0x325   :  { %7079 = vmatprep.subr.bf16.mxu1 %v7778_v1  ;;  %3172 = vrot.lane.b32.xlu0 %v3167_v57, %s8657_s30  ;;  %v792_v1 = vrot.slane %v9055_v59, %v8940_v40  ;;  %v7831_v57 = vld [vmem:[#allocation19 + $0x8] ss:$24 sps:$4 sm:$0xff]  }
 0x326   :  { %v2359_v5 = vpop.f32.mrb[4].mxu1  ;;  %v2488_v6 = vpop.f32.mrb[8].mxu0 }
 0x327   :  { %v7201_v7 = vadd.f32 %v2359_v5, %v772_v61  ;;  %v7205_v8 = vadd.f32 %v2488_v6, %v780_v62  ;;  %v2361_v9 = vpop.f32.mrb[5].mxu1  ;;  %v2490_v11 = vpop.f32.mrb[9].mxu0 }
 0x328   :  { %v7202_v12 = vadd.f32 %v2361_v9, %v776_v63  ;;  %v7206_v14 = vadd.f32 %v2490_v11, %v784_v2  ;;  %v2363_v15 = vpop.f32.mrb[6].mxu1  ;;  %v2492_v16 = vpop.f32.mrb[10].mxu0  ;;  %7080 = vmatpush3.bf16.msra.mxu1 %v7779_v3 }
 0x329   :  { %v7203_v18 = vadd.f32 %v2363_v15, %v772_v61  ;;  %v7207_v19 = vadd.f32 %v2492_v16, %v780_v62  ;;  %v2365_v20 = vpop.f32.mrb[7].mxu1  ;;  %v2494_v21 = vpop.f32.mrb[11].mxu0  ;;  %7081 = vmatprep.subr.bf16.mxu1 %v7782_v4  ;;  %v2626_v10 = vmax.f32 %v7201_v7, 0.0  ;;  %v2628_v29 = vmax.f32 %v7205_v8, 0.0 }
 0x32a   :  { %v7204_v23 = vadd.f32 %v2365_v20, %v776_v63  ;;  %v7208_v24 = vadd.f32 %v2494_v21, %v784_v2  ;;  %v2627_v33 = vmax.f32 %v7202_v12, 0.0  ;;  %v2629_v60 = vmax.f32 %v7206_v14, 0.0 }
 0x32b   :  { %v2632_v32 = vmax.f32 %v7203_v18, 0.0  ;;  %v2634_v31 = vmax.f32 %v7207_v19, 0.0  ;;  %v6656_v19 = vld [vmem:[#allocation13] ss:$0 sm:$0xff] }
 0x32c   :  { %v2633_v35 = vmax.f32 %v7204_v23, 0.0  ;;  %v2635_v36 = vmax.f32 %v7208_v24, 0.0  ;;  %7082 = vmatpush3.bf16.msra.mxu1 %v7783_v17 }
 0x32d   :  { %v2638_v37 = vpack.c.bf16 %v2632_v32, %v2626_v10  ;;  %v2640_v38 = vpack.c.bf16 %v2634_v31, %v2628_v29  ;;  %7083 = vmatprep.subr.bf16.mxu1 %v7786_v22 }
 0x32e   :  { %v2639_v39 = vpack.c.bf16 %v2633_v35, %v2627_v33  ;;  %v2641_v41 = vpack.c.bf16 %v2635_v36, %v2629_v60 }
 0x330   :  { %7084 = vmatpush3.bf16.msra.mxu1 %v7787_v13  ;;  %3067 = vmatprep.mubr.bf16.mxu1 %v2639_v39 }
 0x331   :  { %3108 = vmatprep.mubr.bf16.mxu0 %v2641_v41 }
 0x332   :  { %3109 = vmatmul.mubr.bf16.vlgmr.msra.gmra.mrb[12].mxu0 %v2640_v38 }
 0x333   :  { %3068 = vmatmul.mubr.bf16.vlgmr.msra.gmra.mrb[12].mxu1 %v2638_v37  ;;  %7114 = vmatpush3.bf16.msra.mxu0 %v7789_v42 }
 0x334   :  { %7115 = vmatprep.subr.bf16.mxu0 %v7790_v43 }
 0x337   :  { %7116 = vmatpush3.bf16.msra.mxu0 %v7791_v44 }
 0x338   :  { %7117 = vmatprep.subr.bf16.mxu0 %v7792_v45 }
 0x33b   :  { %7118 = vmatpush3.bf16.msra.mxu0 %v7793_v46  ;;  %v7804_v46 = vld [vmem:[#allocation16] ss:$24 sps:$4 sm:$0xff]  }
 0x33c   :  { %7119 = vmatprep.subr.bf16.mxu0 %v7794_v47  ;;  %v7806_v47 = vld [vmem:[#allocation16 + $0x4] ss:$24 sps:$4 sm:$0xff]  }
 0x33f   :  { %7120 = vmatpush3.bf16.msra.mxu0 %v7795_v48 }
 0x340   :  { %7121 = vmatprep.subr.bf16.mxu0 %v7796_v49 }
 0x343   :  { %7122 = vmatpush3.bf16.msra.mxu0 %v7797_v50 }
 0x344   :  { %7123 = vmatprep.subr.bf16.mxu0 %v7798_v51 }
 0x347   :  { %7124 = vmatpush3.bf16.msra.mxu0 %v7799_v52  ;;  %v7809_v52 = vld [vmem:[#allocation16 + $0xc] ss:$24 sps:$4 sm:$0xff]  }
 0x348   :  { %7125 = vmatprep.subr.bf16.mxu0 %v7800_v53 }
 0x34b   :  { %7126 = vmatpush3.bf16.msra.mxu0 %v7801_v54 }
 0x34c   :  { %7127 = vmatprep.subr.bf16.mxu0 %v7802_v55 }
 0x34f   :  { %7128 = vmatpush3.bf16.msra.mxu0 %v7803_v25 }
 0x350   :  { %3238 = vmatprep.subr.bf16.mxu0 %v7806_v47 }
 0x393   :  { %v3171_v51 = vpop.permute.xlu0 %3170 }
 0x397   :  { %v3173_v25 = vpop.permute.xlu0 %3172 }
 0x3e6   :  { %v2617_v61 = vpop.f32.mrb[8].mxu1 }
 0x3e7   :  { %v7209_v62 = vadd.f32 %v2617_v61, %v788_v58  ;;  %v2619_v63 = vpop.f32.mrb[9].mxu1  ;;  %v7837_v61 = vld [vmem:[#allocation19 + $0x38] ss:$24 sps:$4 sm:$0xff]  }
 0x3e8   :  { %v7210_v2 = vadd.f32 %v2619_v63, %v792_v1  ;;  %v2621_v3 = vpop.f32.mrb[10].mxu1  ;;  %v7843_v63 = vld [vmem:[#allocation19 + $0x68] ss:$24 sps:$4 sm:$0xff]  }
 0x3e9   :  { %v7211_v4 = vadd.f32 %v2621_v3, %v788_v58  ;;  %v2623_v5 = vpop.f32.mrb[11].mxu1  ;;  %v2630_v7 = vmax.f32 %v7209_v62, 0.0  ;;  %v7833_v58 = vld [vmem:[#allocation19 + $0xc] ss:$24 sps:$4 sm:$0xff]   ;;  %v7849_v3 = vld [vmem:[#allocation19 + $0x98] ss:$24 sps:$4 sm:$0xff]  }
 0x3ea   :  { %v7212_v6 = vadd.f32 %v2623_v5, %v792_v1  ;;  %v2631_v9 = vmax.f32 %v7210_v2, 0.0  ;;  %v7839_v1 = vld [vmem:[#allocation19 + $0x3c] ss:$24 sps:$4 sm:$0xff]   ;;  %5510 = vmatprep.subr.bf16.mxu1 %v7833_v58  ;;  %v7845_v62 = vld [vmem:[#allocation19 + $0x6c] ss:$24 sps:$4 sm:$0xff]  }
 0x3eb   :  { %v2636_v8 = vmax.f32 %v7211_v4, 0.0  ;;  %5511 = vmatpush1.bf16.msra.mxu1 %v7831_v57  ;;  %v7851_v2 = vld [vmem:[#allocation19 + $0x9c] ss:$24 sps:$4 sm:$0xff]   ;;  %v7857_v4 = vld [vmem:[#allocation19 + $0xcc] ss:$24 sps:$4 sm:$0xff]  }
 0x3ec   :  { %v2637_v11 = vmax.f32 %v7212_v6, 0.0  ;;  %5512 = vmatprep.subr.bf16.mxu1 %v7839_v1  ;;  %v7855_v5 = vld [vmem:[#allocation19 + $0xc8] ss:$24 sps:$4 sm:$0xff]   ;;  %v7863_v6 = vld [vmem:[#allocation19 + $0xfc] ss:$24 sps:$4 sm:$0xff]  }
 0x3ed   :  { %v2642_v12 = vpack.c.bf16 %v2636_v8, %v2630_v7  ;;  %v7861_v7 = vld [vmem:[#allocation19 + $0xf8] ss:$24 sps:$4 sm:$0xff]   ;;  %v7869_v8 = vld [vmem:[#allocation19 + $0x12c] ss:$24 sps:$4 sm:$0xff]  }
 0x3ee   :  { %v2643_v14 = vpack.c.bf16 %v2637_v11, %v2631_v9  ;;  %v7867_v9 = vld [vmem:[#allocation19 + $0x128] ss:$24 sps:$4 sm:$0xff]   ;;  %v7875_v11 = vld [vmem:[#allocation19 + $0x15c] ss:$24 sps:$4 sm:$0xff]  }
 0x3ef   :  { %5513 = vmatpush1.bf16.msra.mxu1 %v7837_v61  ;;  %v7836_v57 = vld [vmem:[#allocation19 + $0x34] ss:$24 sps:$4 sm:$0xff]   ;;  %v7834_v58 = vld [vmem:[#allocation19 + $0x30] ss:$24 sps:$4 sm:$0xff]   ;;  %v7842_v1 = vld [vmem:[#allocation19 + $0x64] ss:$24 sps:$4 sm:$0xff]  }
 0x3f0   :  { %3149 = vmatprep.mubr.bf16.mxu0 %v2643_v14  ;;  %5514 = vmatprep.subr.bf16.mxu1 %v7845_v62  ;;  %v7881_v14 = vld [vmem:[#allocation19 + $0x18c] ss:$24 sps:$4 sm:$0xff]   ;;  %v7840_v61 = vld [vmem:[#allocation19 + $0x60] ss:$24 sps:$4 sm:$0xff]  }
 0x3f1   :  { %3150 = vmatmul.mubr.bf16.vlgmr.msra.gmra.mrb[16].mxu0 %v2642_v12  ;;  %v7873_v12 = vld [vmem:[#allocation19 + $0x158] ss:$24 sps:$4 sm:$0xff]   ;;  %v7848_v62 = vld [vmem:[#allocation19 + $0x94] ss:$24 sps:$4 sm:$0xff]  }
 0x3f2   :  { %3270 = vmatprep.mubr.bf16.mxu0 %v8656_v0  ;;  %3239 = vmatpush1.bf16.msra.mxu0 %v7804_v46 }
 0x3f3   :  { %3281 = vmatprep.subr.bf16.mxu0 %v7809_v52  ;;  %5515 = vmatpush1.bf16.msra.mxu1 %v7843_v63  ;;  %v7823_v52 = vld [vmem:[#allocation14 + $0x10] ss:$24 sps:$4 sm:$0xff]   ;;  %v7854_v63 = vld [vmem:[#allocation19 + $0xc4] ss:$24 sps:$4 sm:$0xff]  }
 0x3f4   :  { %5516 = vmatprep.subr.bf16.mxu1 %v7851_v2  ;;  %v7852_v2 = vld [vmem:[#allocation19 + $0xc0] ss:$24 sps:$4 sm:$0xff]  }
 0x3f7   :  { %5517 = vmatpush1.bf16.msra.mxu1 %v7849_v3  ;;  %v7860_v3 = vld [vmem:[#allocation19 + $0xf4] ss:$24 sps:$4 sm:$0xff]  }
 0x3f8   :  { %5518 = vmatprep.subr.bf16.mxu1 %v7857_v4  ;;  %v7858_v4 = vld [vmem:[#allocation19 + $0xf0] ss:$24 sps:$4 sm:$0xff]  }
 0x3fb   :  { %5519 = vmatpush1.bf16.msra.mxu1 %v7855_v5  ;;  %v7866_v5 = vld [vmem:[#allocation19 + $0x124] ss:$24 sps:$4 sm:$0xff]  }
 0x3fc   :  { %5520 = vmatprep.subr.bf16.mxu1 %v7863_v6  ;;  %v7864_v6 = vld [vmem:[#allocation19 + $0x120] ss:$24 sps:$4 sm:$0xff]  }
 0x3ff   :  { %5521 = vmatpush1.bf16.msra.mxu1 %v7861_v7  ;;  %v7872_v7 = vld [vmem:[#allocation19 + $0x154] ss:$24 sps:$4 sm:$0xff]  }
 0x400   :  { %5522 = vmatprep.subr.bf16.mxu1 %v7869_v8  ;;  %v7870_v8 = vld [vmem:[#allocation19 + $0x150] ss:$24 sps:$4 sm:$0xff]  }
 0x403   :  { %5523 = vmatpush1.bf16.msra.mxu1 %v7867_v9  ;;  %v7878_v9 = vld [vmem:[#allocation19 + $0x184] ss:$24 sps:$4 sm:$0xff]  }
 0x404   :  { %5524 = vmatprep.subr.bf16.mxu1 %v7875_v11  ;;  %v7876_v11 = vld [vmem:[#allocation19 + $0x180] ss:$24 sps:$4 sm:$0xff]  }
 0x405   :  { %v7107_v15 = vpop.f32.mrb[12].mxu0 }
 0x406   :  { %v7108_v59 = vpop.f32.mrb[13].mxu0  ;;  %v7085_v16 = vpop.f32.mrb[12].mxu1 }
 0x407   :  { %v7109_v17 = vadd.f32 %v7108_v59, %v7107_v15  ;;  %v7110_v18 = vpop.f32.mrb[14].mxu0  ;;  %v7086_v20 = vpop.f32.mrb[13].mxu1  ;;  %5525 = vmatpush1.bf16.msra.mxu1 %v7873_v12  ;;  %v7879_v15 = vld [vmem:[#allocation19 + $0x188] ss:$24 sps:$4 sm:$0xff]   ;;  %v7887_v59 = vld [vmem:[#allocation19 + $0x1bc] ss:$24 sps:$4 sm:$0xff]  }
 0x408   :  { %v7087_v21 = vadd.f32 %v7086_v20, %v7085_v16  ;;  %v7111_v22 = vpop.f32.mrb[15].mxu0  ;;  %v7088_v23 = vpop.f32.mrb[14].mxu1  ;;  %5526 = vmatprep.subr.bf16.mxu1 %v7881_v14  ;;  %v7885_v16 = vld [vmem:[#allocation19 + $0x1b8] ss:$24 sps:$4 sm:$0xff]   ;;  %v7884_v12 = vld [vmem:[#allocation19 + $0x1b4] ss:$24 sps:$4 sm:$0xff]  }
 0x409   :  { %v7112_v24 = vadd.f32 %v7111_v22, %v7110_v18  ;;  %v7089_v10 = vpop.f32.mrb[15].mxu1  ;;  %v7891_v18 = vld [vmem:[#allocation19 + $0x1e8] ss:$24 sps:$4 sm:$0xff]   ;;  %v7897_v20 = vld [vmem:[#allocation19 + $0x218] ss:$24 sps:$4 sm:$0xff]  }
 0x40a   :  { %v3070_v29 = vadd.f32 %v7087_v21, %v6656_v19  ;;  %v7090_v32 = vadd.f32 %v7089_v10, %v7088_v23  ;;  %v7905_v21 = vld [vmem:[#allocation19 + $0x24c] ss:$24 sps:$4 sm:$0xff]   ;;  %v7903_v22 = vld [vmem:[#allocation19 + $0x248] ss:$24 sps:$4 sm:$0xff]   ;;  %v7911_v23 = vld [vmem:[#allocation19 + $0x27c] ss:$24 sps:$4 sm:$0xff]  }
 0x40b   :  { %5527 = vmatpush1.bf16.msra.mxu1 %v7879_v15  ;;  %v7882_v14 = vld [vmem:[#allocation19 + $0x1b0] ss:$24 sps:$4 sm:$0xff]   ;;  %v7890_v15 = vld [vmem:[#allocation19 + $0x1e4] ss:$24 sps:$4 sm:$0xff]  }
 0x40c   :  { %v3073_v31 = vadd.f32 %v7090_v32, %v6656_v19  ;;  %v3111_v33 = vadd.f32 %v7109_v17, %v3070_v29  ;;  %5528 = vmatprep.subr.bf16.mxu1 %v7887_v59  ;;  %v7893_v17 = vld [vmem:[#allocation19 + $0x1ec] ss:$24 sps:$4 sm:$0xff]   ;;  %v7899_v19 = vld [vmem:[#allocation19 + $0x21c] ss:$24 sps:$4 sm:$0xff]   ;;  %v7888_v59 = vld [vmem:[#allocation19 + $0x1e0] ss:$24 sps:$4 sm:$0xff]  }
 0x40e   :  { %v3114_v60 = vadd.f32 %v7112_v24, %v3073_v31  ;;  %v7909_v24 = vld [vmem:[#allocation19 + $0x278] ss:$24 sps:$4 sm:$0xff]  }
 0x40f   :  { %5529 = vmatpush1.bf16.msra.mxu1 %v7885_v16  ;;  %v7896_v16 = vld [vmem:[#allocation19 + $0x214] ss:$24 sps:$4 sm:$0xff]  }
 0x410   :  { %5530 = vmatprep.subr.bf16.mxu1 %v7893_v17  ;;  %v7894_v17 = vld [vmem:[#allocation19 + $0x210] ss:$24 sps:$4 sm:$0xff]  }
 0x413   :  { %5531 = vmatpush1.bf16.msra.mxu1 %v7891_v18  ;;  %v7902_v18 = vld [vmem:[#allocation19 + $0x244] ss:$24 sps:$4 sm:$0xff]  }
 0x414   :  { %5532 = vmatprep.subr.bf16.mxu1 %v7899_v19  ;;  %v7900_v19 = vld [vmem:[#allocation19 + $0x240] ss:$24 sps:$4 sm:$0xff]  }
 0x417   :  { %5533 = vmatpush1.bf16.msra.mxu1 %v7897_v20  ;;  %v7908_v20 = vld [vmem:[#allocation19 + $0x274] ss:$24 sps:$4 sm:$0xff]  }
 0x418   :  { %5534 = vmatprep.subr.bf16.mxu1 %v7905_v21  ;;  %v7906_v21 = vld [vmem:[#allocation19 + $0x270] ss:$24 sps:$4 sm:$0xff]  }
 0x41b   :  { %5535 = vmatpush1.bf16.msra.mxu1 %v7903_v22  ;;  %v7914_v22 = vld [vmem:[#allocation19 + $0x2a4] ss:$24 sps:$4 sm:$0xff]  }
 0x41c   :  { %5536 = vmatprep.subr.bf16.mxu1 %v7911_v23  ;;  %v7917_v23 = vld [vmem:[#allocation19 + $0x2ac] ss:$24 sps:$4 sm:$0xff]  }
 0x41f   :  { %5537 = vmatpush1.bf16.msra.mxu1 %v7909_v24  ;;  %v7912_v24 = vld [vmem:[#allocation19 + $0x2a0] ss:$24 sps:$4 sm:$0xff]  }
 0x420   :  { %5538 = vmatprep.subr.bf16.mxu1 %v7917_v23  ;;  %v7947_v23 = vld [vmem:[#allocation19 + $0x39c] ss:$24 sps:$4 sm:$0xff]  }
 0x4c4   :  { %v7129_v35 = vpop.f32.mrb[16].mxu0 }
 0x4c5   :  { %v7130_v36 = vpop.f32.mrb[17].mxu0 }
 0x4c6   :  { %v7131_v13 = vadd.f32 %v7130_v36, %v7129_v35  ;;  %v7132_v37 = vpop.f32.mrb[18].mxu0  ;;  %v7812_v35 = vld [vmem:[#allocation16 + $0x14] ss:$24 sps:$4 sm:$0xff]   ;;  %v7810_v36 = vld [vmem:[#allocation16 + $0x10] ss:$24 sps:$4 sm:$0xff]  }
 0x4c7   :  { %v7133_v38 = vpop.f32.mrb[19].mxu0 }
 0x4c8   :  { %v9133_v39 = vadd.f32 %v7131_v13, %v3111_v33  ;;  %v7134_v41 = vadd.f32 %v7133_v38, %v7132_v37  ;;  %v7807_v33 = vld [vmem:[#allocation16 + $0x8] ss:$24 sps:$4 sm:$0xff]   ;;  %v7815_v13 = vld [vmem:[#allocation14 + $0x4] ss:$24 sps:$4 sm:$0xff]   ;;  %v7813_v38 = vld [vmem:[#allocation14] ss:$24 sps:$4 sm:$0xff]  }
 0x4c9   :  { %v3194_v37 = vld [vmem:[#allocation14 + $0x30] sm:$0xff] }
 0x4ca   :  { %v3158_v42 = vmax.f32 %v9133_v39, -4.0  ;;  %v9136_v43 = vadd.f32 %v7134_v41, %v3114_v60  ;;  %6302 = vrot.lane.b32.xlu0 %v9133_v39, %s8639_s29  ;;  %v6720_v41 = vcombine.low %v3194_v37, %v3194_v37 }
 0x4cc   :  { %v3160_v44 = vmin.f32 %v3158_v42, 15.0  ;;  %v3159_v45 = vmax.f32 %v9136_v43, -4.0  ;;  %v3413_v42 = vsel %vm313_vm0, %v6720_v41, 0 }
 0x4ce   :  { %v3162_v48 = vmul.f32 1.442695, %v3160_v44  ;;  %v3161_v49 = vmin.f32 %v3159_v45, 15.0  ;;  %v3195_v44 = vld [vmem:[#allocation14 + $0x38] sm:$0xff]  ;;  %v7818_v45 = vld [vmem:[#allocation14 + $0x8] ss:$24 sps:$4 sm:$0xff]  }
 0x4cf   :  { %v6723_v46 = vcombine.high %v3195_v44, %v3195_v44  ;;  %v6722_v47 = vcombine.low %v3195_v44, %v3195_v44 }
 0x4d0   :  { %8308 = vpow2.f32 %v3162_v48  ;;  %v3164_v50 = vmul.f32 1.442695, %v3161_v49  ;;  %v8312_v48 = vld [vmem:[#allocation2] sm:$0xff]  }
 0x4d1   :  { %v3419_v49 = vsel %vm313_vm0, %v6722_v47, 0 }
 0x4d2   :  { %8310 = vpow2.f32 %v3164_v50  ;;  %v7825_v50 = vld [vmem:[#allocation14 + $0x14] ss:$24 sps:$4 sm:$0xff]  }
 0x4da   :  { %v8309_v53 = vpop.eup %8308 }
 0x4db   :  { %v3176_v54 = vmul.f32 %v8309_v53, %v3171_v51  ;;  %6310 = vrot.lane.b32.xlu0 %v8309_v53, %s8639_s29  ;;  %v3196_v51 = vld [vmem:[#allocation14 + $0x40] sm:$0xff] }
 0x4dc   :  { %v8311_v55 = vpop.eup %8310  ;;  %v6725_v53 = vcombine.high %v3196_v51, %v3196_v51 }
 0x4dd   :  { %3180 = vrot.lane.b32.xlu1 %v3176_v54, %s8658_s6  ;;  %v3177_v56 = vmul.f32 %v8311_v55, %v3173_v25  ;;  %v6724_v54 = vcombine.low %v3196_v51, %v3196_v51  ;;  %v7830_v25 = vld [vmem:[#allocation19 + $0x4] ss:$24 sps:$4 sm:$0xff]  }
 0x4e1   :  { %3182 = vrot.lane.b32.xlu1 %v3177_v56, %s8658_s6  ;;  %v7828_v56 = vld [vmem:[#allocation19] ss:$24 sps:$4 sm:$0xff]  }
 0x4e5   :  { %6304 = vrot.lane.b32.xlu1 %v9136_v43, %s8639_s29 }
 0x4e9   :  { %6312 = vrot.lane.b32.xlu1 %v8311_v55, %s8639_s29  ;;  %v3425_v55 = vsel %vm313_vm0, %v6724_v54, 0 }
 0x54f   :  { %v3181_v10 = vpop.permute.xlu1 %3180 }
 0x550   :  { %v3186_v32 = vadd.f32 %v3181_v10, %v9133_v39  ;;  %v6721_v39 = vcombine.high %v3194_v37, %v3194_v37  ;;  %v7915_v10 = vld [vmem:[#allocation19 + $0x2a8] ss:$24 sps:$4 sm:$0xff]  }
 0x551   :  { %5539 = vmatpush1.bf16.msra.mxu1 %v7915_v10 }
 0x553   :  { %v3183_v29 = vpop.permute.xlu1 %3182 }
 0x554   :  { %v3187_v31 = vadd.f32 %v3183_v29, %v9136_v43  ;;  %v7820_v43 = vld [vmem:[#allocation14 + $0xc] ss:$24 sps:$4 sm:$0xff]  }
 0x555   :  { %v7920_v29 = vld [vmem:[#allocation19 + $0x2d4] ss:$24 sps:$4 sm:$0xff]  }
 0x556   :  { %v3197_v60 = vpack.c.bf16 %v3187_v31, %v3186_v32  ;;  %v7923_v32 = vld [vmem:[#allocation19 + $0x2dc] ss:$24 sps:$4 sm:$0xff]   ;;  %v7918_v31 = vld [vmem:[#allocation19 + $0x2d0] ss:$24 sps:$4 sm:$0xff]  }
 0x557   :  { %5540 = vmatprep.subr.bf16.mxu1 %v7923_v32 }
 0x558   :  { %6711 = vmatmul.mubr.msk.bf16.vlgmr.msra.gmra.mrb[20].mxu0 %vm3234_vm2, %v3197_v60 }
 0x559   :  { %3282 = vmatpush1.bf16.msra.mxu0 %v7807_v33  ;;  %3313 = vmatprep.mubr.bf16.mxu0 %v8656_v0  ;;  %v7921_v33 = vld [vmem:[#allocation19 + $0x2d8] ss:$24 sps:$4 sm:$0xff]  }
 0x55a   :  { %3324 = vmatprep.subr.bf16.mxu0 %v7812_v35  ;;  %5541 = vmatpush1.bf16.msra.mxu1 %v7921_v33  ;;  %v7929_v35 = vld [vmem:[#allocation19 + $0x30c] ss:$24 sps:$4 sm:$0xff]   ;;  %v7942_v33 = vld [vmem:[#allocation19 + $0x390] ss:$24 sps:$4 sm:$0xff]  }
 0x55b   :  { %5553 = vmatprep.subr.bf16.mxu1 %v7929_v35 }
 0x560   :  { %6712 = vmatmul.mubr.msk.bf16.vlgmr.msra.gmra.mrb[24].mxu0 %vm3234_vm2, %v3197_v60 }
 0x561   :  { %3325 = vmatpush1.bf16.msra.mxu0 %v7810_v36  ;;  %3356 = vmatprep.mubr.bf16.mxu0 %v8656_v0  ;;  %v3559_v36 = vld [vmem:[#allocation17] sm:$0x3f] }
 0x562   :  { %3430 = vmatprep.subr.bf16.mxu0 %v7815_v13  ;;  %v3564_v13 = vrot.slane %v3559_v36, %v8926_v26  ;;  %v3568_v37 = vrot.slane %v3559_v36, %v8928_v27 }
 0x568   :  { %6713 = vmatmul.mubr.msk.bf16.vlgmr.msra.gmra.mrb[28].mxu0 %vm3234_vm2, %v3197_v60  ;;  %v7926_v60 = vld [vmem:[#allocation19 + $0x304] ss:$24 sps:$4 sm:$0xff]  }
 0x569   :  { %3431 = vmatpush1.bf16.msra.mxu0 %v7813_v38  ;;  %3462 = vmatprep.mubr.bf16.mxu0 %v8656_v0 }
 0x56a   :  { %6726 = vmatprep.subr.msk.bf16.mxu0 %vm313_vm0, %v6721_v39 }
 0x56d   :  { %3433 = vmatpush1.bf16.msra.mxu0 %v3413_v42 }
 0x56e   :  { %3473 = vmatprep.subr.bf16.mxu0 %v7820_v43 }
 0x570   :  { %6727 = vmatmul.mubr.msk.bf16.vlgmr.msra.gmra.mrb[20].mxu0 %vm309_vm1, %v8312_v48 }
 0x571   :  { %3474 = vmatpush1.bf16.msra.mxu0 %v7818_v45  ;;  %3505 = vmatprep.mubr.bf16.mxu0 %v8656_v0 }
 0x572   :  { %6728 = vmatprep.subr.msk.bf16.mxu0 %vm313_vm0, %v6723_v46 }
 0x575   :  { %3476 = vmatpush1.bf16.msra.mxu0 %v3419_v49  ;;  %v3572_v49 = vrot.slane %v3559_v36, %v8930_v28 }
 0x576   :  { %3516 = vmatprep.subr.bf16.mxu0 %v7825_v50 }
 0x578   :  { %6729 = vmatmul.mubr.msk.bf16.vlgmr.msra.gmra.mrb[24].mxu0 %vm309_vm1, %v8312_v48 }
 0x579   :  { %3517 = vmatpush1.bf16.msra.mxu0 %v7823_v52  ;;  %3548 = vmatprep.mubr.bf16.mxu0 %v8656_v0  ;;  %v7846_v0 = vld [vmem:[#allocation19 + $0x90] ss:$24 sps:$4 sm:$0xff]   ;;  %v3576_v52 = vrot.slane %v3559_v36, %v8933_v30 }
 0x57a   :  { %6730 = vmatprep.subr.msk.bf16.mxu0 %vm313_vm0, %v6725_v53 }
 0x57d   :  { %3519 = vmatpush1.bf16.msra.mxu0 %v3425_v55 }
 0x57e   :  { %5381 = vmatprep.subr.bf16.mxu0 %v7830_v25  ;;  %v7924_v25 = vld [vmem:[#allocation19 + $0x300] ss:$24 sps:$4 sm:$0xff]  }
 0x580   :  { %6731 = vmatmul.mubr.msk.bf16.vlgmr.msra.gmra.mrb[28].mxu0 %vm309_vm1, %v8312_v48 }
 0x581   :  { %5382 = vmatpush1.bf16.msra.mxu0 %v7828_v56  ;;  %v7927_v56 = vld [vmem:[#allocation19 + $0x308] ss:$24 sps:$4 sm:$0xff]  }
 0x582   :  { %5383 = vmatprep.subr.bf16.mxu0 %v7836_v57 }
 0x585   :  { %5384 = vmatpush1.bf16.msra.mxu0 %v7834_v58 }
 0x586   :  { %5385 = vmatprep.subr.bf16.mxu0 %v7842_v1  ;;  %v7932_v1 = vld [vmem:[#allocation19 + $0x334] ss:$24 sps:$4 sm:$0xff]  }
 0x589   :  { %5386 = vmatpush1.bf16.msra.mxu0 %v7840_v61  ;;  %v7935_v61 = vld [vmem:[#allocation19 + $0x33c] ss:$24 sps:$4 sm:$0xff]  }
 0x58a   :  { %5387 = vmatprep.subr.bf16.mxu0 %v7848_v62 }
 0x58d   :  { %5388 = vmatpush1.bf16.msra.mxu0 %v7846_v0 }
 0x58e   :  { %5389 = vmatprep.subr.bf16.mxu0 %v7854_v63 }
 0x591   :  { %5390 = vmatpush1.bf16.msra.mxu0 %v7852_v2 }
 0x592   :  { %5391 = vmatprep.subr.bf16.mxu0 %v7860_v3 }
 0x595   :  { %5392 = vmatpush1.bf16.msra.mxu0 %v7858_v4  ;;  %v7930_v4 = vld [vmem:[#allocation19 + $0x330] ss:$24 sps:$4 sm:$0xff]  }
 0x596   :  { %5393 = vmatprep.subr.bf16.mxu0 %v7866_v5  ;;  %v7933_v5 = vld [vmem:[#allocation19 + $0x338] ss:$24 sps:$4 sm:$0xff]  }
 0x599   :  { %5394 = vmatpush1.bf16.msra.mxu0 %v7864_v6 }
 0x59a   :  { %5395 = vmatprep.subr.bf16.mxu0 %v7872_v7 }
 0x59d   :  { %5396 = vmatpush1.bf16.msra.mxu0 %v7870_v8  ;;  %v3580_v8 = vrot.slane %v3559_v36, %v8937_v34 }
 0x59e   :  { %5397 = vmatprep.subr.bf16.mxu0 %v7878_v9  ;;  %v7938_v9 = vld [vmem:[#allocation19 + $0x364] ss:$24 sps:$4 sm:$0xff]  }
 0x5a1   :  { %5398 = vmatpush1.bf16.msra.mxu0 %v7876_v11  ;;  %v7941_v11 = vld [vmem:[#allocation19 + $0x36c] ss:$24 sps:$4 sm:$0xff]  }
 0x5a2   :  { %5399 = vmatprep.subr.bf16.mxu0 %v7884_v12 }
 0x5a5   :  { %5400 = vmatpush1.bf16.msra.mxu0 %v7882_v14 }
 0x5a6   :  { %5401 = vmatprep.subr.bf16.mxu0 %v7890_v15  ;;  %v3584_v15 = vrot.slane %v3559_v36, %v8940_v40 }
 0x5a9   :  { %5402 = vmatpush1.bf16.msra.mxu0 %v7888_v59 }
 0x5aa   :  { %5403 = vmatprep.subr.bf16.mxu0 %v7896_v16 }
 0x5ad   :  { %5404 = vmatpush1.bf16.msra.mxu0 %v7894_v17 }
 0x5ae   :  { %5405 = vmatprep.subr.bf16.mxu0 %v7902_v18  ;;  %v7936_v18 = vld [vmem:[#allocation19 + $0x360] ss:$24 sps:$4 sm:$0xff]  }
 0x5b1   :  { %5406 = vmatpush1.bf16.msra.mxu0 %v7900_v19  ;;  %v7939_v19 = vld [vmem:[#allocation19 + $0x368] ss:$24 sps:$4 sm:$0xff]  }
 0x5b2   :  { %5407 = vmatprep.subr.bf16.mxu0 %v7908_v20 }
 0x5b5   :  { %5408 = vmatpush1.bf16.msra.mxu0 %v7906_v21 }
 0x5b6   :  { %5409 = vmatprep.subr.bf16.mxu0 %v7914_v22  ;;  %v7944_v22 = vld [vmem:[#allocation19 + $0x394] ss:$24 sps:$4 sm:$0xff]  }
 0x5b9   :  { %5410 = vmatpush1.bf16.msra.mxu0 %v7912_v24 }
 0x5ba   :  { %5411 = vmatprep.subr.bf16.mxu0 %v7920_v29 }
 0x5bd   :  { %5412 = vmatpush1.bf16.msra.mxu0 %v7918_v31 }
 0x5be   :  { %5424 = vmatprep.subr.bf16.mxu0 %v7926_v60  ;;  %v7945_v60 = vld [vmem:[#allocation19 + $0x398] ss:$24 sps:$4 sm:$0xff]  }
 0x643   :  { %v3464_v38 = vpop.f32.mrb[20].mxu0 }
 0x644   :  { %v3591_v39 = vadd.f32 %v3564_v13, %v3464_v38  ;;  %v3466_v41 = vpop.f32.mrb[21].mxu0 }
 0x645   :  { %v3592_v42 = vadd.f32 %v3568_v37, %v3466_v41  ;;  %v3468_v43 = vpop.f32.mrb[22].mxu0 }
 0x646   :  { %v3597_v44 = vadd.f32 %v3564_v13, %v3468_v43  ;;  %v3470_v45 = vpop.f32.mrb[23].mxu0  ;;  %v3603_v47 = vmax.f32 %v3591_v39, 0.0  ;;  %v7950_v13 = vld [vmem:[#allocation19 + $0x3c4] ss:$24 sps:$4 sm:$0xff]   ;;  %v7948_v43 = vld [vmem:[#allocation19 + $0x3c0] ss:$24 sps:$4 sm:$0xff]  }
 0x647   :  { %v3598_v46 = vadd.f32 %v3568_v37, %v3470_v45  ;;  %v3604_v50 = vmax.f32 %v3592_v42, 0.0  ;;  %v7953_v37 = vld [vmem:[#allocation19 + $0x3cc] ss:$24 sps:$4 sm:$0xff]  }
 0x648   :  { %v3609_v48 = vmax.f32 %v3597_v44, 0.0  ;;  %v7951_v44 = vld [vmem:[#allocation19 + $0x3c8] ss:$24 sps:$4 sm:$0xff]   ;;  %v7956_v45 = vld [vmem:[#allocation19 + $0x3f4] ss:$24 sps:$4 sm:$0xff]  }
 0x649   :  { %v3610_v51 = vmax.f32 %v3598_v46, 0.0  ;;  %v7959_v46 = vld [vmem:[#allocation19 + $0x3fc] ss:$24 sps:$4 sm:$0xff]  }
 0x64a   :  { %v9168_v53 = vpack.c.bf16 %v3609_v48, %v3603_v47  ;;  %v7954_v47 = vld [vmem:[#allocation19 + $0x3f0] ss:$24 sps:$4 sm:$0xff]  }
 0x64b   :  { %v9170_v54 = vpack.c.bf16 %v3610_v51, %v3604_v50  ;;  %v3507_v55 = vpop.f32.mrb[24].mxu0  ;;  %v7957_v48 = vld [vmem:[#allocation19 + $0x3f8] ss:$24 sps:$4 sm:$0xff]   ;;  %v7965_v50 = vld [vmem:[#allocation19 + $0x42c] ss:$24 sps:$4 sm:$0xff]  }
 0x64c   :  { %v3593_v57 = vadd.f32 %v3572_v49, %v3507_v55  ;;  %v3509_v58 = vpop.f32.mrb[25].mxu0  ;;  %v7960_v51 = vld [vmem:[#allocation19 + $0x420] ss:$24 sps:$4 sm:$0xff]   ;;  %v7968_v55 = vld [vmem:[#allocation19 + $0x454] ss:$24 sps:$4 sm:$0xff]  }
 0x64d   :  { %v3594_v62 = vadd.f32 %v3576_v52, %v3509_v58  ;;  %v3511_v0 = vpop.f32.mrb[26].mxu0  ;;  %5413 = vmatprep.mubr.bf16.mxu0 %v9170_v54  ;;  %5542 = vmatprep.mubr.bf16.mxu1 %v9170_v54  ;;  %v7974_v58 = vld [vmem:[#allocation19 + $0x484] ss:$24 sps:$4 sm:$0xff]  }
 0x64e   :  { %v3599_v63 = vadd.f32 %v3572_v49, %v3511_v0  ;;  %v3513_v2 = vpop.f32.mrb[27].mxu0  ;;  %5414 = vmatmul.mubr.bf16.vlgmr.msra.gmra.mrb[32].mxu0 %v9168_v53  ;;  %5543 = vmatmul.mubr.bf16.vlgmr.msra.gmra.mrb[16].mxu1 %v9168_v53  ;;  %v3605_v6 = vmax.f32 %v3593_v57, 0.0  ;;  %v7962_v49 = vld [vmem:[#allocation19 + $0x424] ss:$24 sps:$4 sm:$0xff]   ;;  %v7969_v57 = vld [vmem:[#allocation19 + $0x458] ss:$24 sps:$4 sm:$0xff]  }
 0x64f   :  { %v3600_v3 = vadd.f32 %v3576_v52, %v3513_v2  ;;  %5425 = vmatpush1.bf16.msra.mxu0 %v7924_v25  ;;  %5554 = vmatpush1.bf16.msra.mxu1 %v7927_v56  ;;  %v3606_v12 = vmax.f32 %v3594_v62, 0.0  ;;  %v7963_v52 = vld [vmem:[#allocation19 + $0x428] ss:$24 sps:$4 sm:$0xff]   ;;  %v7971_v25 = vld [vmem:[#allocation19 + $0x45c] ss:$24 sps:$4 sm:$0xff]  }
 0x650   :  { %v3611_v7 = vmax.f32 %v3599_v63, 0.0  ;;  %5426 = vmatprep.subr.bf16.mxu0 %v7932_v1  ;;  %5555 = vmatprep.subr.bf16.mxu1 %v7935_v61  ;;  %v7966_v56 = vld [vmem:[#allocation19 + $0x450] ss:$24 sps:$4 sm:$0xff]   ;;  %v7977_v1 = vld [vmem:[#allocation19 + $0x48c] ss:$24 sps:$4 sm:$0xff]  }
 0x651   :  { %v3612_v14 = vmax.f32 %v3600_v3, 0.0  ;;  %v7972_v61 = vld [vmem:[#allocation19 + $0x480] ss:$24 sps:$4 sm:$0xff]   ;;  %v7980_v0 = vld [vmem:[#allocation19 + $0x4b4] ss:$24 sps:$4 sm:$0xff]  }
 0x652   :  { %v9178_v59 = vpack.c.bf16 %v3611_v7, %v3605_v6  ;;  %v7975_v62 = vld [vmem:[#allocation19 + $0x488] ss:$24 sps:$4 sm:$0xff]   ;;  %v7983_v63 = vld [vmem:[#allocation19 + $0x4bc] ss:$24 sps:$4 sm:$0xff]   ;;  %v7981_v3 = vld [vmem:[#allocation19 + $0x4b8] ss:$24 sps:$4 sm:$0xff]  }
 0x653   :  { %v9180_v16 = vpack.c.bf16 %v3612_v14, %v3606_v12  ;;  %5427 = vmatpush1.bf16.msra.mxu0 %v7930_v4  ;;  %5556 = vmatpush1.bf16.msra.mxu1 %v7933_v5  ;;  %v3550_v17 = vpop.f32.mrb[28].mxu0  ;;  %v7978_v2 = vld [vmem:[#allocation19 + $0x4b0] ss:$24 sps:$4 sm:$0xff]   ;;  %v7986_v4 = vld [vmem:[#allocation19 + $0x4e4] ss:$24 sps:$4 sm:$0xff]  }
 0x654   :  { %v3595_v20 = vadd.f32 %v3580_v8, %v3550_v17  ;;  %v3552_v21 = vpop.f32.mrb[29].mxu0  ;;  %5428 = vmatprep.subr.bf16.mxu0 %v7938_v9  ;;  %5557 = vmatprep.subr.bf16.mxu1 %v7941_v11  ;;  %v7989_v5 = vld [vmem:[#allocation19 + $0x4ec] ss:$24 sps:$4 sm:$0xff]   ;;  %v7984_v6 = vld [vmem:[#allocation19 + $0x4e0] ss:$24 sps:$4 sm:$0xff]  }
 0x655   :  { %v3596_v24 = vadd.f32 %v3584_v15, %v3552_v21  ;;  %v3554_v10 = vpop.f32.mrb[30].mxu0  ;;  %5456 = vmatprep.mubr.bf16.mxu0 %v9180_v16  ;;  %5585 = vmatprep.mubr.bf16.mxu1 %v9180_v16  ;;  %v7987_v7 = vld [vmem:[#allocation19 + $0x4e8] ss:$24 sps:$4 sm:$0xff]   ;;  %v7995_v9 = vld [vmem:[#allocation19 + $0x51c] ss:$24 sps:$4 sm:$0xff]  }
 0x656   :  { %v3601_v29 = vadd.f32 %v3580_v8, %v3554_v10  ;;  %v3556_v32 = vpop.f32.mrb[31].mxu0  ;;  %v3607_v35 = vmax.f32 %v3595_v20, 0.0  ;;  %v7992_v8 = vld [vmem:[#allocation19 + $0x514] ss:$24 sps:$4 sm:$0xff]   ;;  %v7990_v11 = vld [vmem:[#allocation19 + $0x510] ss:$24 sps:$4 sm:$0xff]  }
 0x657   :  { %v3602_v31 = vadd.f32 %v3584_v15, %v3556_v32  ;;  %5429 = vmatpush1.bf16.msra.mxu0 %v7936_v18  ;;  %5558 = vmatpush1.bf16.msra.mxu1 %v7939_v19  ;;  %v3608_v38 = vmax.f32 %v3596_v24, 0.0  ;;  %v7993_v12 = vld [vmem:[#allocation19 + $0x518] ss:$24 sps:$4 sm:$0xff]   ;;  %v7998_v14 = vld [vmem:[#allocation19 + $0x544] ss:$24 sps:$4 sm:$0xff]  }
 0x658   :  { %v3613_v36 = vmax.f32 %v3601_v29, 0.0  ;;  %5430 = vmatprep.subr.bf16.mxu0 %v7944_v22  ;;  %5559 = vmatprep.subr.bf16.mxu1 %v7947_v23  ;;  %v8001_v15 = vld [vmem:[#allocation19 + $0x54c] ss:$24 sps:$4 sm:$0xff]   ;;  %v7996_v17 = vld [vmem:[#allocation19 + $0x540] ss:$24 sps:$4 sm:$0xff]  }
 0x659   :  { %v3614_v39 = vmax.f32 %v3602_v31, 0.0  ;;  %v7999_v18 = vld [vmem:[#allocation19 + $0x548] ss:$24 sps:$4 sm:$0xff]   ;;  %v8004_v19 = vld [vmem:[#allocation19 + $0x574] ss:$24 sps:$4 sm:$0xff]  }
 0x65a   :  { %v9184_v41 = vpack.c.bf16 %v3613_v36, %v3607_v35  ;;  %v8007_v20 = vld [vmem:[#allocation19 + $0x57c] ss:$24 sps:$4 sm:$0xff]   ;;  %v8002_v21 = vld [vmem:[#allocation19 + $0x570] ss:$24 sps:$4 sm:$0xff]   ;;  %v8013_v24 = vld [vmem:[#allocation19 + $0x5ac] ss:$24 sps:$4 sm:$0xff]  }
 0x65b   :  { %v9186_v42 = vpack.c.bf16 %v3614_v39, %v3608_v38  ;;  %5431 = vmatpush1.bf16.msra.mxu0 %v7942_v33  ;;  %5560 = vmatpush1.bf16.msra.mxu1 %v7945_v60  ;;  %v8005_v22 = vld [vmem:[#allocation19 + $0x578] ss:$24 sps:$4 sm:$0xff]   ;;  %v8010_v23 = vld [vmem:[#allocation19 + $0x5a4] ss:$24 sps:$4 sm:$0xff]   ;;  %v8011_v29 = vld [vmem:[#allocation19 + $0x5a8] ss:$24 sps:$4 sm:$0xff]  }
 0x65c   :  { %5432 = vmatprep.subr.bf16.mxu0 %v7950_v13  ;;  %5561 = vmatprep.subr.bf16.mxu1 %v7953_v37  ;;  %v8008_v10 = vld [vmem:[#allocation19 + $0x5a0] ss:$24 sps:$4 sm:$0xff]   ;;  %v8016_v32 = vld [vmem:[#allocation19 + $0x5d4] ss:$24 sps:$4 sm:$0xff]   ;;  %v8014_v33 = vld [vmem:[#allocation19 + $0x5d0] ss:$24 sps:$4 sm:$0xff]  }
 0x65d   :  { %v8019_v31 = vld [vmem:[#allocation19 + $0x5dc] ss:$24 sps:$4 sm:$0xff]   ;;  %v8017_v60 = vld [vmem:[#allocation19 + $0x5d8] ss:$24 sps:$4 sm:$0xff]   ;;  %v8025_v36 = vld [vmem:[#allocation19 + $0x60c] ss:$24 sps:$4 sm:$0xff]  }
 0x65e   :  { %v8022_v35 = vld [vmem:[#allocation19 + $0x604] ss:$24 sps:$4 sm:$0xff]   ;;  %v8020_v13 = vld [vmem:[#allocation19 + $0x600] ss:$24 sps:$4 sm:$0xff]   ;;  %v8028_v38 = vld [vmem:[#allocation19 + $0x634] ss:$24 sps:$4 sm:$0xff]  }
 0x65f   :  { %5433 = vmatpush1.bf16.msra.mxu0 %v7948_v43  ;;  %5562 = vmatpush1.bf16.msra.mxu1 %v7951_v44  ;;  %v8023_v37 = vld [vmem:[#allocation19 + $0x608] ss:$24 sps:$4 sm:$0xff]   ;;  %v8031_v39 = vld [vmem:[#allocation19 + $0x63c] ss:$24 sps:$4 sm:$0xff]   ;;  %v8029_v44 = vld [vmem:[#allocation19 + $0x638] ss:$24 sps:$4 sm:$0xff]  }
 0x660   :  { %5434 = vmatprep.subr.bf16.mxu0 %v7956_v45  ;;  %5563 = vmatprep.subr.bf16.mxu1 %v7959_v46  ;;  %v8026_v43 = vld [vmem:[#allocation19 + $0x630] ss:$24 sps:$4 sm:$0xff]   ;;  %v8034_v45 = vld [vmem:[#allocation19 + $0x664] ss:$24 sps:$4 sm:$0xff]  }
 0x661   :  { %v8037_v46 = vld [vmem:[#allocation19 + $0x66c] ss:$24 sps:$4 sm:$0xff]  }
 0x663   :  { %5435 = vmatpush1.bf16.msra.mxu0 %v7954_v47  ;;  %5564 = vmatpush1.bf16.msra.mxu1 %v7957_v48  ;;  %v8032_v47 = vld [vmem:[#allocation19 + $0x660] ss:$24 sps:$4 sm:$0xff]  }
 0x664   :  { %5436 = vmatprep.subr.bf16.mxu0 %v7962_v49  ;;  %5565 = vmatprep.subr.bf16.mxu1 %v7965_v50  ;;  %v8035_v48 = vld [vmem:[#allocation19 + $0x668] ss:$24 sps:$4 sm:$0xff]   ;;  %v8040_v49 = vld [vmem:[#allocation19 + $0x694] ss:$24 sps:$4 sm:$0xff]  }
 0x665   :  { %v8043_v50 = vld [vmem:[#allocation19 + $0x69c] ss:$24 sps:$4 sm:$0xff]  }
 0x667   :  { %5437 = vmatpush1.bf16.msra.mxu0 %v7960_v51  ;;  %5566 = vmatpush1.bf16.msra.mxu1 %v7963_v52  ;;  %v8038_v51 = vld [vmem:[#allocation19 + $0x690] ss:$24 sps:$4 sm:$0xff]  }
 0x668   :  { %5438 = vmatprep.subr.bf16.mxu0 %v7968_v55  ;;  %5567 = vmatprep.subr.bf16.mxu1 %v7971_v25  ;;  %v8041_v52 = vld [vmem:[#allocation19 + $0x698] ss:$24 sps:$4 sm:$0xff]   ;;  %v8046_v55 = vld [vmem:[#allocation19 + $0x6c4] ss:$24 sps:$4 sm:$0xff]  }
 0x669   :  { %v8049_v25 = vld [vmem:[#allocation19 + $0x6cc] ss:$24 sps:$4 sm:$0xff]  }
 0x66b   :  { %5439 = vmatpush1.bf16.msra.mxu0 %v7966_v56  ;;  %5568 = vmatpush1.bf16.msra.mxu1 %v7969_v57  ;;  %v8044_v56 = vld [vmem:[#allocation19 + $0x6c0] ss:$24 sps:$4 sm:$0xff]  }
 0x66c   :  { %5440 = vmatprep.subr.bf16.mxu0 %v7974_v58  ;;  %5569 = vmatprep.subr.bf16.mxu1 %v7977_v1  ;;  %v8047_v57 = vld [vmem:[#allocation19 + $0x6c8] ss:$24 sps:$4 sm:$0xff]   ;;  %v8052_v58 = vld [vmem:[#allocation19 + $0x6f4] ss:$24 sps:$4 sm:$0xff]  }
 0x66d   :  { %v8055_v1 = vld [vmem:[#allocation19 + $0x6fc] ss:$24 sps:$4 sm:$0xff]  }
 0x66f   :  { %5441 = vmatpush1.bf16.msra.mxu0 %v7972_v61  ;;  %5570 = vmatpush1.bf16.msra.mxu1 %v7975_v62  ;;  %v8050_v61 = vld [vmem:[#allocation19 + $0x6f0] ss:$24 sps:$4 sm:$0xff]  }
 0x670   :  { %5442 = vmatprep.subr.bf16.mxu0 %v7980_v0  ;;  %5571 = vmatprep.subr.bf16.mxu1 %v7983_v63  ;;  %v8053_v62 = vld [vmem:[#allocation19 + $0x6f8] ss:$24 sps:$4 sm:$0xff]   ;;  %v8058_v0 = vld [vmem:[#allocation19 + $0x724] ss:$24 sps:$4 sm:$0xff]  }
 0x671   :  { %v8061_v63 = vld [vmem:[#allocation19 + $0x72c] ss:$24 sps:$4 sm:$0xff]  }
 0x673   :  { %5443 = vmatpush1.bf16.msra.mxu0 %v7978_v2  ;;  %5572 = vmatpush1.bf16.msra.mxu1 %v7981_v3  ;;  %v8056_v2 = vld [vmem:[#allocation19 + $0x720] ss:$24 sps:$4 sm:$0xff]  }
 0x674   :  { %5444 = vmatprep.subr.bf16.mxu0 %v7986_v4  ;;  %5573 = vmatprep.subr.bf16.mxu1 %v7989_v5  ;;  %v8059_v3 = vld [vmem:[#allocation19 + $0x728] ss:$24 sps:$4 sm:$0xff]   ;;  %v8064_v4 = vld [vmem:[#allocation19 + $0x754] ss:$24 sps:$4 sm:$0xff]  }
 0x675   :  { %v8067_v5 = vld [vmem:[#allocation19 + $0x75c] ss:$24 sps:$4 sm:$0xff]  }
 0x677   :  { %5445 = vmatpush1.bf16.msra.mxu0 %v7984_v6  ;;  %5574 = vmatpush1.bf16.msra.mxu1 %v7987_v7  ;;  %v8062_v6 = vld [vmem:[#allocation19 + $0x750] ss:$24 sps:$4 sm:$0xff]  }
 0x678   :  { %5446 = vmatprep.subr.bf16.mxu0 %v7992_v8  ;;  %5575 = vmatprep.subr.bf16.mxu1 %v7995_v9  ;;  %v8065_v7 = vld [vmem:[#allocation19 + $0x758] ss:$24 sps:$4 sm:$0xff]   ;;  %v8070_v8 = vld [vmem:[#allocation19 + $0x784] ss:$24 sps:$4 sm:$0xff]  }
 0x679   :  { %v8073_v9 = vld [vmem:[#allocation19 + $0x78c] ss:$24 sps:$4 sm:$0xff]  }
 0x67b   :  { %5447 = vmatpush1.bf16.msra.mxu0 %v7990_v11  ;;  %5576 = vmatpush1.bf16.msra.mxu1 %v7993_v12  ;;  %v8068_v11 = vld [vmem:[#allocation19 + $0x780] ss:$24 sps:$4 sm:$0xff]  }
 0x67c   :  { %5448 = vmatprep.subr.bf16.mxu0 %v7998_v14  ;;  %5577 = vmatprep.subr.bf16.mxu1 %v8001_v15  ;;  %v8071_v12 = vld [vmem:[#allocation19 + $0x788] ss:$24 sps:$4 sm:$0xff]   ;;  %v8076_v14 = vld [vmem:[#allocation19 + $0x7b4] ss:$24 sps:$4 sm:$0xff]  }
 0x67d   :  { %v8079_v15 = vld [vmem:[#allocation19 + $0x7bc] ss:$24 sps:$4 sm:$0xff]  }
 0x67f   :  { %5449 = vmatpush1.bf16.msra.mxu0 %v7996_v17  ;;  %5578 = vmatpush1.bf16.msra.mxu1 %v7999_v18  ;;  %v8074_v17 = vld [vmem:[#allocation19 + $0x7b0] ss:$24 sps:$4 sm:$0xff]  }
 0x680   :  { %5450 = vmatprep.subr.bf16.mxu0 %v8004_v19  ;;  %5579 = vmatprep.subr.bf16.mxu1 %v8007_v20  ;;  %v8077_v18 = vld [vmem:[#allocation19 + $0x7b8] ss:$24 sps:$4 sm:$0xff]   ;;  %v8082_v19 = vld [vmem:[#allocation19 + $0x7e4] ss:$24 sps:$4 sm:$0xff]  }
 0x681   :  { %v8085_v20 = vld [vmem:[#allocation19 + $0x7ec] ss:$24 sps:$4 sm:$0xff]  }
 0x683   :  { %5451 = vmatpush1.bf16.msra.mxu0 %v8002_v21  ;;  %5580 = vmatpush1.bf16.msra.mxu1 %v8005_v22  ;;  %v8080_v21 = vld [vmem:[#allocation19 + $0x7e0] ss:$24 sps:$4 sm:$0xff]  }
 0x684   :  { %5452 = vmatprep.subr.bf16.mxu0 %v8010_v23  ;;  %5581 = vmatprep.subr.bf16.mxu1 %v8013_v24  ;;  %v8083_v22 = vld [vmem:[#allocation19 + $0x7e8] ss:$24 sps:$4 sm:$0xff]   ;;  %v8088_v23 = vld [vmem:[#allocation19 + $0x814] ss:$24 sps:$4 sm:$0xff]  }
 0x685   :  { %v8091_v24 = vld [vmem:[#allocation19 + $0x81c] ss:$24 sps:$4 sm:$0xff]  }
 0x687   :  { %5453 = vmatpush1.bf16.msra.mxu0 %v8008_v10  ;;  %5582 = vmatpush1.bf16.msra.mxu1 %v8011_v29  ;;  %v8086_v10 = vld [vmem:[#allocation19 + $0x810] ss:$24 sps:$4 sm:$0xff]  }
 0x688   :  { %5454 = vmatprep.subr.bf16.mxu0 %v8016_v32  ;;  %5583 = vmatprep.subr.bf16.mxu1 %v8019_v31  ;;  %v8089_v29 = vld [vmem:[#allocation19 + $0x818] ss:$24 sps:$4 sm:$0xff]   ;;  %v8094_v32 = vld [vmem:[#allocation19 + $0x844] ss:$24 sps:$4 sm:$0xff]  }
 0x689   :  { %v8097_v31 = vld [vmem:[#allocation19 + $0x84c] ss:$24 sps:$4 sm:$0xff]  }
 0x68b   :  { %5455 = vmatpush1.bf16.msra.mxu0 %v8014_v33  ;;  %5584 = vmatpush1.bf16.msra.mxu1 %v8017_v60  ;;  %v8092_v33 = vld [vmem:[#allocation19 + $0x840] ss:$24 sps:$4 sm:$0xff]  }
 0x68c   :  { %5467 = vmatprep.subr.bf16.mxu0 %v8022_v35  ;;  %5596 = vmatprep.subr.bf16.mxu1 %v8025_v36  ;;  %v8095_v60 = vld [vmem:[#allocation19 + $0x848] ss:$24 sps:$4 sm:$0xff]   ;;  %v8100_v35 = vld [vmem:[#allocation19 + $0x874] ss:$24 sps:$4 sm:$0xff]  }
 0x68d   :  { %v8103_v36 = vld [vmem:[#allocation19 + $0x87c] ss:$24 sps:$4 sm:$0xff]  }
 0x68e   :  { %5457 = vmatmul.mubr.bf16.vlgmr.msra.gmra.mrb[32].mxu0 %v9178_v59  ;;  %5586 = vmatmul.mubr.bf16.vlgmr.msra.gmra.mrb[16].mxu1 %v9178_v59 }
 0x68f   :  { %5468 = vmatpush1.bf16.msra.mxu0 %v8020_v13  ;;  %5499 = vmatprep.mubr.bf16.mxu0 %v9186_v42  ;;  %v8098_v13 = vld [vmem:[#allocation19 + $0x870] ss:$24 sps:$4 sm:$0xff]  }
 0x690   :  { %5597 = vmatpush1.bf16.msra.mxu1 %v8023_v37  ;;  %5628 = vmatprep.mubr.bf16.mxu1 %v9186_v42  ;;  %v8101_v37 = vld [vmem:[#allocation19 + $0x878] ss:$24 sps:$4 sm:$0xff]  }
 0x691   :  { %5469 = vmatprep.subr.bf16.mxu0 %v8028_v38  ;;  %5598 = vmatprep.subr.bf16.mxu1 %v8031_v39  ;;  %v8106_v38 = vld [vmem:[#allocation19 + $0x8a4] ss:$24 sps:$4 sm:$0xff]  }
 0x692   :  { %v8109_v39 = vld [vmem:[#allocation19 + $0x8ac] ss:$24 sps:$4 sm:$0xff]  }
 0x693   :  { %5470 = vmatpush1.bf16.msra.mxu0 %v8026_v43  ;;  %v8104_v43 = vld [vmem:[#allocation19 + $0x8a0] ss:$24 sps:$4 sm:$0xff]  }
 0x694   :  { %5599 = vmatpush1.bf16.msra.mxu1 %v8029_v44  ;;  %5471 = vmatprep.subr.bf16.mxu0 %v8034_v45  ;;  %v8107_v44 = vld [vmem:[#allocation19 + $0x8a8] ss:$24 sps:$4 sm:$0xff]   ;;  %v8112_v45 = vld [vmem:[#allocation19 + $0x8d4] ss:$24 sps:$4 sm:$0xff]  }
 0x695   :  { %5600 = vmatprep.subr.bf16.mxu1 %v8037_v46  ;;  %v8115_v46 = vld [vmem:[#allocation19 + $0x8dc] ss:$24 sps:$4 sm:$0xff]  }
 0x697   :  { %5472 = vmatpush1.bf16.msra.mxu0 %v8032_v47  ;;  %v8110_v47 = vld [vmem:[#allocation19 + $0x8d0] ss:$24 sps:$4 sm:$0xff]  }
 0x698   :  { %5601 = vmatpush1.bf16.msra.mxu1 %v8035_v48  ;;  %5473 = vmatprep.subr.bf16.mxu0 %v8040_v49  ;;  %v8113_v48 = vld [vmem:[#allocation19 + $0x8d8] ss:$24 sps:$4 sm:$0xff]   ;;  %v8118_v49 = vld [vmem:[#allocation19 + $0x14] ss:$24 sps:$4 sm:$0xff]  }
 0x699   :  { %5602 = vmatprep.subr.bf16.mxu1 %v8043_v50  ;;  %v8116_v50 = vld [vmem:[#allocation19 + $0x10] ss:$24 sps:$4 sm:$0xff]  }
 0x69b   :  { %5474 = vmatpush1.bf16.msra.mxu0 %v8038_v51  ;;  %v8121_v51 = vld [vmem:[#allocation19 + $0x44] ss:$24 sps:$4 sm:$0xff]  }
 0x69c   :  { %5603 = vmatpush1.bf16.msra.mxu1 %v8041_v52  ;;  %5475 = vmatprep.subr.bf16.mxu0 %v8046_v55  ;;  %v8119_v52 = vld [vmem:[#allocation19 + $0x40] ss:$24 sps:$4 sm:$0xff]   ;;  %v8124_v55 = vld [vmem:[#allocation19 + $0x74] ss:$24 sps:$4 sm:$0xff]  }
 0x69d   :  { %5604 = vmatprep.subr.bf16.mxu1 %v8049_v25  ;;  %v8122_v25 = vld [vmem:[#allocation19 + $0x70] ss:$24 sps:$4 sm:$0xff]  }
 0x69f   :  { %5476 = vmatpush1.bf16.msra.mxu0 %v8044_v56  ;;  %v8127_v56 = vld [vmem:[#allocation19 + $0xa4] ss:$24 sps:$4 sm:$0xff]  }
 0x6a0   :  { %5605 = vmatpush1.bf16.msra.mxu1 %v8047_v57  ;;  %5477 = vmatprep.subr.bf16.mxu0 %v8052_v58  ;;  %v8125_v57 = vld [vmem:[#allocation19 + $0xa0] ss:$24 sps:$4 sm:$0xff]   ;;  %v8130_v58 = vld [vmem:[#allocation19 + $0xd4] ss:$24 sps:$4 sm:$0xff]  }
 0x6a1   :  { %5606 = vmatprep.subr.bf16.mxu1 %v8055_v1  ;;  %v8128_v1 = vld [vmem:[#allocation19 + $0xd0] ss:$24 sps:$4 sm:$0xff]  }
 0x6a3   :  { %5478 = vmatpush1.bf16.msra.mxu0 %v8050_v61  ;;  %v8133_v61 = vld [vmem:[#allocation19 + $0x104] ss:$24 sps:$4 sm:$0xff]  }
 0x6a4   :  { %5607 = vmatpush1.bf16.msra.mxu1 %v8053_v62  ;;  %5479 = vmatprep.subr.bf16.mxu0 %v8058_v0  ;;  %v8131_v62 = vld [vmem:[#allocation19 + $0x100] ss:$24 sps:$4 sm:$0xff]   ;;  %v8136_v0 = vld [vmem:[#allocation19 + $0x134] ss:$24 sps:$4 sm:$0xff]  }
 0x6a5   :  { %5608 = vmatprep.subr.bf16.mxu1 %v8061_v63  ;;  %v8139_v63 = vld [vmem:[#allocation19 + $0x164] ss:$24 sps:$4 sm:$0xff]  }
 0x6a7   :  { %5480 = vmatpush1.bf16.msra.mxu0 %v8056_v2  ;;  %v8137_v2 = vld [vmem:[#allocation19 + $0x160] ss:$24 sps:$4 sm:$0xff]  }
 0x6a8   :  { %5609 = vmatpush1.bf16.msra.mxu1 %v8059_v3  ;;  %5481 = vmatprep.subr.bf16.mxu0 %v8064_v4  ;;  %v8142_v3 = vld [vmem:[#allocation19 + $0x194] ss:$24 sps:$4 sm:$0xff]   ;;  %v8140_v4 = vld [vmem:[#allocation19 + $0x190] ss:$24 sps:$4 sm:$0xff]  }
 0x6a9   :  { %5610 = vmatprep.subr.bf16.mxu1 %v8067_v5  ;;  %v8145_v5 = vld [vmem:[#allocation19 + $0x1c4] ss:$24 sps:$4 sm:$0xff]  }
 0x6ab   :  { %5482 = vmatpush1.bf16.msra.mxu0 %v8062_v6  ;;  %v8143_v6 = vld [vmem:[#allocation19 + $0x1c0] ss:$24 sps:$4 sm:$0xff]  }
 0x6ac   :  { %5611 = vmatpush1.bf16.msra.mxu1 %v8065_v7  ;;  %5483 = vmatprep.subr.bf16.mxu0 %v8070_v8  ;;  %v8148_v7 = vld [vmem:[#allocation19 + $0x1f4] ss:$24 sps:$4 sm:$0xff]   ;;  %v8146_v8 = vld [vmem:[#allocation19 + $0x1f0] ss:$24 sps:$4 sm:$0xff]  }
 0x6ad   :  { %5612 = vmatprep.subr.bf16.mxu1 %v8073_v9  ;;  %v8151_v9 = vld [vmem:[#allocation19 + $0x224] ss:$24 sps:$4 sm:$0xff]  }
 0x6af   :  { %5484 = vmatpush1.bf16.msra.mxu0 %v8068_v11  ;;  %v8149_v11 = vld [vmem:[#allocation19 + $0x220] ss:$24 sps:$4 sm:$0xff]  }
 0x6b0   :  { %5613 = vmatpush1.bf16.msra.mxu1 %v8071_v12  ;;  %5485 = vmatprep.subr.bf16.mxu0 %v8076_v14  ;;  %v8154_v12 = vld [vmem:[#allocation19 + $0x254] ss:$24 sps:$4 sm:$0xff]   ;;  %v8152_v14 = vld [vmem:[#allocation19 + $0x250] ss:$24 sps:$4 sm:$0xff]  }
 0x6b1   :  { %5614 = vmatprep.subr.bf16.mxu1 %v8079_v15  ;;  %v8157_v15 = vld [vmem:[#allocation19 + $0x284] ss:$24 sps:$4 sm:$0xff]  }
 0x6b3   :  { %5486 = vmatpush1.bf16.msra.mxu0 %v8074_v17  ;;  %v8155_v17 = vld [vmem:[#allocation19 + $0x280] ss:$24 sps:$4 sm:$0xff]  }
 0x6b4   :  { %5615 = vmatpush1.bf16.msra.mxu1 %v8077_v18  ;;  %5487 = vmatprep.subr.bf16.mxu0 %v8082_v19  ;;  %v8160_v18 = vld [vmem:[#allocation19 + $0x2b4] ss:$24 sps:$4 sm:$0xff]   ;;  %v8158_v19 = vld [vmem:[#allocation19 + $0x2b0] ss:$24 sps:$4 sm:$0xff]  }
 0x6b5   :  { %5616 = vmatprep.subr.bf16.mxu1 %v8085_v20  ;;  %v8163_v20 = vld [vmem:[#allocation19 + $0x2e4] ss:$24 sps:$4 sm:$0xff]  }
 0x6b7   :  { %5488 = vmatpush1.bf16.msra.mxu0 %v8080_v21  ;;  %v8161_v21 = vld [vmem:[#allocation19 + $0x2e0] ss:$24 sps:$4 sm:$0xff]  }
 0x6b8   :  { %5617 = vmatpush1.bf16.msra.mxu1 %v8083_v22  ;;  %5489 = vmatprep.subr.bf16.mxu0 %v8088_v23  ;;  %v8166_v22 = vld [vmem:[#allocation19 + $0x314] ss:$24 sps:$4 sm:$0xff]  }
 0x6b9   :  { %5618 = vmatprep.subr.bf16.mxu1 %v8091_v24  ;;  %v8260_v23 = vld [vmem:[%s9388_s13 + $0x40] sm:$0xff]   ;;  %v8164_v24 = vld [vmem:[#allocation19 + $0x310] ss:$24 sps:$4 sm:$0xff]  }
 0x6bb   :  { %5490 = vmatpush1.bf16.msra.mxu0 %v8086_v10  ;;  %v8261_v10 = vld [vmem:[%s9388_s13] sm:$0xff]  }
 0x6bc   :  { %5619 = vmatpush1.bf16.msra.mxu1 %v8089_v29  ;;  %5491 = vmatprep.subr.bf16.mxu0 %v8094_v32  ;;  %v8169_v29 = vld [vmem:[#allocation19 + $0x344] ss:$24 sps:$4 sm:$0xff]  }
 0x6bd   :  { %5620 = vmatprep.subr.bf16.mxu1 %v8097_v31  ;;  %v8262_v32 = vld [vmem:[%s9388_s13 + $0x48] sm:$0xff]  }
 0x6be   :  { %v8263_v31 = vld [vmem:[%s9388_s13 + $0x8] sm:$0xff]  }
 0x6bf   :  { %5492 = vmatpush1.bf16.msra.mxu0 %v8092_v33  ;;  %v8264_v33 = vld [vmem:[%s9388_s13 + $0x50] sm:$0xff]  }
 0x6c0   :  { %5621 = vmatpush1.bf16.msra.mxu1 %v8095_v60  ;;  %5493 = vmatprep.subr.bf16.mxu0 %v8100_v35  ;;  %v8167_v60 = vld [vmem:[#allocation19 + $0x340] ss:$24 sps:$4 sm:$0xff]   ;;  %v8172_v35 = vld [vmem:[#allocation19 + $0x374] ss:$24 sps:$4 sm:$0xff]  }
 0x6c1   :  { %5622 = vmatprep.subr.bf16.mxu1 %v8103_v36  ;;  %v8266_v36 = vld [vmem:[%s9388_s13 + $0x58] sm:$0xff]  }
 0x6c3   :  { %5494 = vmatpush1.bf16.msra.mxu0 %v8098_v13  ;;  %v8170_v13 = vld [vmem:[#allocation19 + $0x370] ss:$24 sps:$4 sm:$0xff]  }
 0x6c4   :  { %5623 = vmatpush1.bf16.msra.mxu1 %v8101_v37  ;;  %5495 = vmatprep.subr.bf16.mxu0 %v8106_v38  ;;  %v8175_v37 = vld [vmem:[#allocation19 + $0x3a4] ss:$24 sps:$4 sm:$0xff]   ;;  %v8268_v38 = vld [vmem:[%s9388_s13 + $0x60] sm:$0xff]  }
 0x6c5   :  { %5624 = vmatprep.subr.bf16.mxu1 %v8109_v39  ;;  %v8173_v39 = vld [vmem:[#allocation19 + $0x3a0] ss:$24 sps:$4 sm:$0xff]  }
 0x6c7   :  { %5496 = vmatpush1.bf16.msra.mxu0 %v8104_v43  ;;  %v8178_v43 = vld [vmem:[#allocation19 + $0x3d4] ss:$24 sps:$4 sm:$0xff]  }
 0x6c8   :  { %5625 = vmatpush1.bf16.msra.mxu1 %v8107_v44  ;;  %5497 = vmatprep.subr.bf16.mxu0 %v8112_v45  ;;  %v8269_v44 = vld [vmem:[%s9388_s13 + $0x20] sm:$0xff]   ;;  %v8270_v45 = vld [vmem:[%s9388_s13 + $0x68] sm:$0xff]  }
 0x6c9   :  { %5626 = vmatprep.subr.bf16.mxu1 %v8115_v46  ;;  %v8176_v46 = vld [vmem:[#allocation19 + $0x3d0] ss:$24 sps:$4 sm:$0xff]  }
 0x6cb   :  { %5498 = vmatpush1.bf16.msra.mxu0 %v8110_v47  ;;  %v8181_v47 = vld [vmem:[#allocation19 + $0x404] ss:$24 sps:$4 sm:$0xff]  }
 0x6cc   :  { %5627 = vmatpush1.bf16.msra.mxu1 %v8113_v48  ;;  %5639 = vmatprep.subr.bf16.mxu0 %v8118_v49  ;;  %v8271_v48 = vld [vmem:[%s9388_s13 + $0x28] sm:$0xff]  }
 0x6cd   :  { %7135 = vmatprep.subr.bf16.mxu1 %v8260_v23  ;;  %v8179_v49 = vld [vmem:[#allocation19 + $0x400] ss:$24 sps:$4 sm:$0xff]  }
 0x6ce   :  { %5500 = vmatmul.mubr.bf16.vlgmr.msra.gmra.mrb[32].mxu0 %v9184_v41  ;;  %v8221_v23 = vld [vmem:[#allocation19 + $0x6a0] ss:$24 sps:$4 sm:$0xff]  }
 0x6cf   :  { %5629 = vmatmul.mubr.bf16.vlgmr.msra.gmra.mrb[16].mxu1 %v9184_v41  ;;  %5640 = vmatpush1.bf16.msra.mxu0 %v8116_v50  ;;  %v8184_v50 = vld [vmem:[#allocation19 + $0x434] ss:$24 sps:$4 sm:$0xff]  }
 0x6d0   :  { %5671 = vmatprep.mubr.bf16.mxu0 %v9170_v54  ;;  %5641 = vmatprep.subr.bf16.mxu0 %v8121_v51  ;;  %v8134_v54 = vld [vmem:[#allocation19 + $0x130] ss:$24 sps:$4 sm:$0xff]  }
 0x6d1   :  { %7136 = vmatpush3.bf16.msra.mxu1 %v8261_v10  ;;  %v8272_v51 = vld [vmem:[%s9388_s13 + $0x70] sm:$0xff]  }
 0x6d2   :  { %7137 = vmatprep.subr.bf16.mxu1 %v8262_v32  ;;  %v8224_v10 = vld [vmem:[#allocation19 + $0x6d0] ss:$24 sps:$4 sm:$0xff]   ;;  %v8232_v32 = vld [vmem:[#allocation19 + $0x734] ss:$24 sps:$4 sm:$0xff]  }
 0x6d3   :  { %5642 = vmatpush1.bf16.msra.mxu0 %v8119_v52  ;;  %v8182_v52 = vld [vmem:[#allocation19 + $0x430] ss:$24 sps:$4 sm:$0xff]  }
 0x6d4   :  { %5643 = vmatprep.subr.bf16.mxu0 %v8124_v55  ;;  %v8273_v55 = vld [vmem:[%s9388_s13 + $0x30] sm:$0xff]  }
 0x6d5   :  { %7138 = vmatpush3.bf16.msra.mxu1 %v8263_v31  ;;  %v8235_v31 = vld [vmem:[#allocation19 + $0x764] ss:$24 sps:$4 sm:$0xff]  }
 0x6d6   :  { %7139 = vmatprep.subr.bf16.mxu1 %v8264_v33  ;;  %v8233_v33 = vld [vmem:[#allocation19 + $0x760] ss:$24 sps:$4 sm:$0xff]  }
 0x6d7   :  { %5644 = vmatpush1.bf16.msra.mxu0 %v8122_v25  ;;  %v8187_v25 = vld [vmem:[#allocation19 + $0x464] ss:$24 sps:$4 sm:$0xff]  }
 0x6d8   :  { %5645 = vmatprep.subr.bf16.mxu0 %v8127_v56  ;;  %v8274_v56 = vld [vmem:[%s9388_s13 + $0x78] sm:$0xff]  }
 0x6db   :  { %5646 = vmatpush1.bf16.msra.mxu0 %v8125_v57  ;;  %v8185_v57 = vld [vmem:[#allocation19 + $0x460] ss:$24 sps:$4 sm:$0xff]  }
 0x6dc   :  { %5647 = vmatprep.subr.bf16.mxu0 %v8130_v58  ;;  %v8275_v58 = vld [vmem:[%s9388_s13 + $0x38] sm:$0xff]  }
 0x6df   :  { %5648 = vmatpush1.bf16.msra.mxu0 %v8128_v1  ;;  %v8190_v1 = vld [vmem:[#allocation19 + $0x494] ss:$24 sps:$4 sm:$0xff]  }
 0x6e0   :  { %5649 = vmatprep.subr.bf16.mxu0 %v8133_v61  ;;  %v8276_v61 = vld [vmem:[%s9388_s13 + $0xc0] sm:$0xff]  }
 0x6e3   :  { %5650 = vmatpush1.bf16.msra.mxu0 %v8131_v62  ;;  %v8188_v62 = vld [vmem:[#allocation19 + $0x490] ss:$24 sps:$4 sm:$0xff]  }
 0x6e4   :  { %5651 = vmatprep.subr.bf16.mxu0 %v8136_v0  ;;  %v8193_v0 = vld [vmem:[#allocation19 + $0x4c4] ss:$24 sps:$4 sm:$0xff]  }
 0x6e7   :  { %5652 = vmatpush1.bf16.msra.mxu0 %v8134_v54  ;;  %v8191_v54 = vld [vmem:[#allocation19 + $0x4c0] ss:$24 sps:$4 sm:$0xff]  }
 0x6e8   :  { %5653 = vmatprep.subr.bf16.mxu0 %v8139_v63  ;;  %v8196_v63 = vld [vmem:[#allocation19 + $0x4f4] ss:$24 sps:$4 sm:$0xff]  }
 0x6eb   :  { %5654 = vmatpush1.bf16.msra.mxu0 %v8137_v2  ;;  %v8194_v2 = vld [vmem:[#allocation19 + $0x4f0] ss:$24 sps:$4 sm:$0xff]  }
 0x6ec   :  { %5655 = vmatprep.subr.bf16.mxu0 %v8142_v3  ;;  %v8199_v3 = vld [vmem:[#allocation19 + $0x524] ss:$24 sps:$4 sm:$0xff]  }
 0x6ef   :  { %5656 = vmatpush1.bf16.msra.mxu0 %v8140_v4  ;;  %v8197_v4 = vld [vmem:[#allocation19 + $0x520] ss:$24 sps:$4 sm:$0xff]  }
 0x6f0   :  { %5657 = vmatprep.subr.bf16.mxu0 %v8145_v5  ;;  %v8202_v5 = vld [vmem:[#allocation19 + $0x554] ss:$24 sps:$4 sm:$0xff]  }
 0x6f3   :  { %5658 = vmatpush1.bf16.msra.mxu0 %v8143_v6  ;;  %v8200_v6 = vld [vmem:[#allocation19 + $0x550] ss:$24 sps:$4 sm:$0xff]  }
 0x6f4   :  { %5659 = vmatprep.subr.bf16.mxu0 %v8148_v7  ;;  %v8205_v7 = vld [vmem:[#allocation19 + $0x584] ss:$24 sps:$4 sm:$0xff]  }
 0x6f7   :  { %5660 = vmatpush1.bf16.msra.mxu0 %v8146_v8  ;;  %v8203_v8 = vld [vmem:[#allocation19 + $0x580] ss:$24 sps:$4 sm:$0xff]  }
 0x6f8   :  { %5661 = vmatprep.subr.bf16.mxu0 %v8151_v9  ;;  %v8208_v9 = vld [vmem:[#allocation19 + $0x5b4] ss:$24 sps:$4 sm:$0xff]  }
 0x6fb   :  { %5662 = vmatpush1.bf16.msra.mxu0 %v8149_v11  ;;  %v8206_v11 = vld [vmem:[#allocation19 + $0x5b0] ss:$24 sps:$4 sm:$0xff]  }
 0x6fc   :  { %5663 = vmatprep.subr.bf16.mxu0 %v8154_v12  ;;  %v8211_v12 = vld [vmem:[#allocation19 + $0x5e4] ss:$24 sps:$4 sm:$0xff]  }
 0x6ff   :  { %5664 = vmatpush1.bf16.msra.mxu0 %v8152_v14  ;;  %v8209_v14 = vld [vmem:[#allocation19 + $0x5e0] ss:$24 sps:$4 sm:$0xff]  }
 0x700   :  { %5665 = vmatprep.subr.bf16.mxu0 %v8157_v15  ;;  %v8214_v15 = vld [vmem:[#allocation19 + $0x614] ss:$24 sps:$4 sm:$0xff]  }
 0x703   :  { %5666 = vmatpush1.bf16.msra.mxu0 %v8155_v17  ;;  %v8212_v17 = vld [vmem:[#allocation19 + $0x610] ss:$24 sps:$4 sm:$0xff]  }
 0x704   :  { %5667 = vmatprep.subr.bf16.mxu0 %v8160_v18  ;;  %v8217_v18 = vld [vmem:[#allocation19 + $0x644] ss:$24 sps:$4 sm:$0xff]  }
 0x707   :  { %5668 = vmatpush1.bf16.msra.mxu0 %v8158_v19  ;;  %v8215_v19 = vld [vmem:[#allocation19 + $0x640] ss:$24 sps:$4 sm:$0xff]  }
 0x708   :  { %5669 = vmatprep.subr.bf16.mxu0 %v8163_v20  ;;  %v8220_v20 = vld [vmem:[#allocation19 + $0x674] ss:$24 sps:$4 sm:$0xff]  }
 0x70b   :  { %5670 = vmatpush1.bf16.msra.mxu0 %v8161_v21  ;;  %v8218_v21 = vld [vmem:[#allocation19 + $0x670] ss:$24 sps:$4 sm:$0xff]  }
 0x70c   :  { %5682 = vmatprep.subr.bf16.mxu0 %v8166_v22  ;;  %v8223_v22 = vld [vmem:[#allocation19 + $0x6a4] ss:$24 sps:$4 sm:$0xff]  }
 0x70e   :  { %5672 = vmatmul.mubr.bf16.vlgmr.msra.gmra.mrb[36].mxu0 %v9168_v53  ;;  %v8265_v53 = vld [vmem:[%s9388_s13 + $0x10] sm:$0xff]  }
 0x70f   :  { %5683 = vmatpush1.bf16.msra.mxu0 %v8164_v24  ;;  %5714 = vmatprep.mubr.bf16.mxu0 %v9180_v16  ;;  %v8267_v16 = vld [vmem:[%s9388_s13 + $0x18] sm:$0xff]  }
 0x710   :  { %5684 = vmatprep.subr.bf16.mxu0 %v8169_v29  ;;  %7140 = vmatpush3.bf16.msra.mxu1 %v8265_v53  ;;  %v8226_v24 = vld [vmem:[#allocation19 + $0x6d4] ss:$24 sps:$4 sm:$0xff]   ;;  %v8229_v29 = vld [vmem:[#allocation19 + $0x704] ss:$24 sps:$4 sm:$0xff]  }
 0x711   :  { %7141 = vmatprep.subr.bf16.mxu1 %v8266_v36  ;;  %v8241_v53 = vld [vmem:[#allocation19 + $0x7c4] ss:$24 sps:$4 sm:$0xff]   ;;  %v8239_v36 = vld [vmem:[#allocation19 + $0x7c0] ss:$24 sps:$4 sm:$0xff]  }
 0x713   :  { %5685 = vmatpush1.bf16.msra.mxu0 %v8167_v60  ;;  %v8238_v60 = vld [vmem:[#allocation19 + $0x794] ss:$24 sps:$4 sm:$0xff]  }
 0x714   :  { %5686 = vmatprep.subr.bf16.mxu0 %v8172_v35  ;;  %7142 = vmatpush3.bf16.msra.mxu1 %v8267_v16  ;;  %v8236_v35 = vld [vmem:[#allocation19 + $0x790] ss:$24 sps:$4 sm:$0xff]   ;;  %v8247_v16 = vld [vmem:[#allocation19 + $0x824] ss:$24 sps:$4 sm:$0xff]  }
 0x715   :  { %7143 = vmatprep.subr.bf16.mxu1 %v8268_v38  ;;  %v8245_v38 = vld [vmem:[#allocation19 + $0x820] ss:$24 sps:$4 sm:$0xff]  }
 0x717   :  { %5687 = vmatpush1.bf16.msra.mxu0 %v8170_v13  ;;  %v8244_v13 = vld [vmem:[#allocation19 + $0x7f4] ss:$24 sps:$4 sm:$0xff]  }
 0x718   :  { %5688 = vmatprep.subr.bf16.mxu0 %v8175_v37  ;;  %7144 = vmatpush3.bf16.msra.mxu1 %v8269_v44  ;;  %v8242_v37 = vld [vmem:[#allocation19 + $0x7f0] ss:$24 sps:$4 sm:$0xff]   ;;  %v8253_v44 = vld [vmem:[#allocation19 + $0x884] ss:$24 sps:$4 sm:$0xff]  }
 0x719   :  { %7145 = vmatprep.subr.bf16.mxu1 %v8270_v45  ;;  %v8251_v45 = vld [vmem:[#allocation19 + $0x880] ss:$24 sps:$4 sm:$0xff]  }
 0x71b   :  { %5689 = vmatpush1.bf16.msra.mxu0 %v8173_v39  ;;  %v8250_v39 = vld [vmem:[#allocation19 + $0x854] ss:$24 sps:$4 sm:$0xff]  }
 0x71c   :  { %5690 = vmatprep.subr.bf16.mxu0 %v8178_v43  ;;  %7146 = vmatpush3.bf16.msra.mxu1 %v8271_v48  ;;  %v8248_v43 = vld [vmem:[#allocation19 + $0x850] ss:$24 sps:$4 sm:$0xff]   ;;  %v8259_v48 = vld [vmem:[#allocation19 + $0x8e4] ss:$24 sps:$4 sm:$0xff]  }
 0x71d   :  { %7147 = vmatprep.subr.bf16.mxu1 %v8272_v51 }
 0x71f   :  { %5691 = vmatpush1.bf16.msra.mxu0 %v8176_v46  ;;  %v8256_v46 = vld [vmem:[#allocation19 + $0x8b4] ss:$24 sps:$4 sm:$0xff]  }
 0x720   :  { %5692 = vmatprep.subr.bf16.mxu0 %v8181_v47  ;;  %7148 = vmatpush3.bf16.msra.mxu1 %v8273_v55  ;;  %v8254_v47 = vld [vmem:[#allocation19 + $0x8b0] ss:$24 sps:$4 sm:$0xff]  }
 0x721   :  { %7149 = vmatprep.subr.bf16.mxu1 %v8274_v56 }
 0x723   :  { %5693 = vmatpush1.bf16.msra.mxu0 %v8179_v49  ;;  %v8257_v49 = vld [vmem:[#allocation19 + $0x8e0] ss:$24 sps:$4 sm:$0xff]  }
 0x724   :  { %5694 = vmatprep.subr.bf16.mxu0 %v8184_v50  ;;  %7150 = vmatpush3.bf16.msra.mxu1 %v8275_v58  ;;  %v9251_v50 = vld [vmem:[#allocation20] sm:$0x3f] }
 0x725   :  { %7157 = vmatprep.subr.bf16.mxu1 %v8276_v61  ;;  %v3914_v51 = vrot.slane %v9251_v50, %v8926_v26  ;;  %v3918_v55 = vrot.slane %v9251_v50, %v8928_v27 }
 0x727   :  { %5695 = vmatpush1.bf16.msra.mxu0 %v8182_v52  ;;  %v3922_v52 = vrot.slane %v9251_v50, %v8930_v28 }
 0x728   :  { %5696 = vmatprep.subr.bf16.mxu0 %v8187_v25  ;;  %v3926_v25 = vrot.slane %v9251_v50, %v8933_v30 }
 0x72b   :  { %5697 = vmatpush1.bf16.msra.mxu0 %v8185_v57 }
 0x72c   :  { %5698 = vmatprep.subr.bf16.mxu0 %v8190_v1 }
 0x72f   :  { %5699 = vmatpush1.bf16.msra.mxu0 %v8188_v62 }
 0x730   :  { %5700 = vmatprep.subr.bf16.mxu0 %v8193_v0 }
 0x733   :  { %5701 = vmatpush1.bf16.msra.mxu0 %v8191_v54 }
 0x734   :  { %5702 = vmatprep.subr.bf16.mxu0 %v8196_v63 }
 0x737   :  { %5703 = vmatpush1.bf16.msra.mxu0 %v8194_v2 }
 0x738   :  { %5704 = vmatprep.subr.bf16.mxu0 %v8199_v3 }
 0x73b   :  { %5705 = vmatpush1.bf16.msra.mxu0 %v8197_v4 }
 0x73c   :  { %5706 = vmatprep.subr.bf16.mxu0 %v8202_v5 }
 0x73f   :  { %5707 = vmatpush1.bf16.msra.mxu0 %v8200_v6 }
 0x740   :  { %5708 = vmatprep.subr.bf16.mxu0 %v8205_v7 }
 0x743   :  { %5709 = vmatpush1.bf16.msra.mxu0 %v8203_v8 }
 0x744   :  { %5710 = vmatprep.subr.bf16.mxu0 %v8208_v9 }
 0x747   :  { %5711 = vmatpush1.bf16.msra.mxu0 %v8206_v11 }
 0x748   :  { %5712 = vmatprep.subr.bf16.mxu0 %v8211_v12 }
 0x74b   :  { %5713 = vmatpush1.bf16.msra.mxu0 %v8209_v14 }
 0x74c   :  { %5725 = vmatprep.subr.bf16.mxu0 %v8214_v15 }
 0x74e   :  { %5715 = vmatmul.mubr.bf16.vlgmr.msra.gmra.mrb[36].mxu0 %v9178_v59  ;;  %v8227_v59 = vld [vmem:[#allocation19 + $0x700] ss:$24 sps:$4 sm:$0xff]  }
 0x74f   :  { %5726 = vmatpush1.bf16.msra.mxu0 %v8212_v17  ;;  %5757 = vmatprep.mubr.bf16.mxu0 %v9186_v42  ;;  %v8230_v42 = vld [vmem:[#allocation19 + $0x730] ss:$24 sps:$4 sm:$0xff]  }
 0x750   :  { %5727 = vmatprep.subr.bf16.mxu0 %v8217_v18  ;;  %v8277_v18 = vld [vmem:[%s9388_s13 + $0x80] sm:$0xff]  }
 0x753   :  { %5728 = vmatpush1.bf16.msra.mxu0 %v8215_v19 }
 0x754   :  { %5729 = vmatprep.subr.bf16.mxu0 %v8220_v20  ;;  %v8278_v20 = vld [vmem:[%s9388_s13 + $0xc8] sm:$0xff]  }
 0x757   :  { %5730 = vmatpush1.bf16.msra.mxu0 %v8218_v21  ;;  %v8279_v21 = vld [vmem:[%s9388_s13 + $0x88] sm:$0xff]  }
 0x758   :  { %5731 = vmatprep.subr.bf16.mxu0 %v8223_v22  ;;  %v8280_v22 = vld [vmem:[%s9388_s13 + $0xd0] sm:$0xff]  }
 0x75b   :  { %5732 = vmatpush1.bf16.msra.mxu0 %v8221_v23  ;;  %v8281_v23 = vld [vmem:[%s9388_s13 + $0x90] sm:$0xff]  }
 0x75c   :  { %5733 = vmatprep.subr.bf16.mxu0 %v8226_v24  ;;  %v8282_v24 = vld [vmem:[%s9388_s13 + $0xd8] sm:$0xff]  }
 0x75f   :  { %5734 = vmatpush1.bf16.msra.mxu0 %v8224_v10  ;;  %v8283_v10 = vld [vmem:[%s9388_s13 + $0x98] sm:$0xff]  }
 0x760   :  { %5735 = vmatprep.subr.bf16.mxu0 %v8229_v29  ;;  %v8284_v29 = vld [vmem:[%s9388_s13 + $0xe0] sm:$0xff]  }
 0x763   :  { %5736 = vmatpush1.bf16.msra.mxu0 %v8227_v59  ;;  %v8285_v59 = vld [vmem:[%s9388_s13 + $0xa0] sm:$0xff]  }
 0x764   :  { %5737 = vmatprep.subr.bf16.mxu0 %v8232_v32  ;;  %v8286_v32 = vld [vmem:[%s9388_s13 + $0xe8] sm:$0xff]  }
 0x767   :  { %5738 = vmatpush1.bf16.msra.mxu0 %v8230_v42  ;;  %v8287_v42 = vld [vmem:[%s9388_s13 + $0xa8] sm:$0xff]  }
 0x768   :  { %5739 = vmatprep.subr.bf16.mxu0 %v8235_v31  ;;  %v8288_v31 = vld [vmem:[%s9388_s13 + $0xf0] sm:$0xff]  }
 0x76b   :  { %5740 = vmatpush1.bf16.msra.mxu0 %v8233_v33  ;;  %v8289_v33 = vld [vmem:[%s9388_s13 + $0xb0] sm:$0xff]  }
 0x76c   :  { %5741 = vmatprep.subr.bf16.mxu0 %v8238_v60  ;;  %v8290_v60 = vld [vmem:[%s9388_s13 + $0xf8] sm:$0xff]  }
 0x76f   :  { %5742 = vmatpush1.bf16.msra.mxu0 %v8236_v35  ;;  %v8291_v35 = vld [vmem:[%s9388_s13 + $0xb8] sm:$0xff]  }
 0x770   :  { %5743 = vmatprep.subr.bf16.mxu0 %v8241_v53  ;;  %v8292_v53 = vld [vmem:[%s9388_s13 + $0x140] sm:$0xff]  }
 0x773   :  { %5744 = vmatpush1.bf16.msra.mxu0 %v8239_v36  ;;  %v8293_v36 = vld [vmem:[%s9388_s13 + $0x100] sm:$0xff]  }
 0x774   :  { %5745 = vmatprep.subr.bf16.mxu0 %v8244_v13  ;;  %v8294_v13 = vld [vmem:[%s9388_s13 + $0x148] sm:$0xff]  }
 0x777   :  { %5746 = vmatpush1.bf16.msra.mxu0 %v8242_v37  ;;  %v8295_v37 = vld [vmem:[%s9388_s13 + $0x108] sm:$0xff]  }
 0x778   :  { %5747 = vmatprep.subr.bf16.mxu0 %v8247_v16  ;;  %v8296_v16 = vld [vmem:[%s9388_s13 + $0x150] sm:$0xff]  }
 0x77b   :  { %5748 = vmatpush1.bf16.msra.mxu0 %v8245_v38  ;;  %v8297_v38 = vld [vmem:[%s9388_s13 + $0x110] sm:$0xff]  }
 0x77c   :  { %5749 = vmatprep.subr.bf16.mxu0 %v8250_v39  ;;  %v8298_v39 = vld [vmem:[%s9388_s13 + $0x158] sm:$0xff]  }
 0x77f   :  { %5750 = vmatpush1.bf16.msra.mxu0 %v8248_v43  ;;  %v8299_v43 = vld [vmem:[%s9388_s13 + $0x118] sm:$0xff]  }
 0x780   :  { %5751 = vmatprep.subr.bf16.mxu0 %v8253_v44  ;;  %v8300_v44 = vld [vmem:[%s9388_s13 + $0x160] sm:$0xff]  }
 0x783   :  { %5752 = vmatpush1.bf16.msra.mxu0 %v8251_v45  ;;  %v8301_v45 = vld [vmem:[%s9388_s13 + $0x120] sm:$0xff]  }
 0x784   :  { %5753 = vmatprep.subr.bf16.mxu0 %v8256_v46  ;;  %v8302_v46 = vld [vmem:[%s9388_s13 + $0x168] sm:$0xff]  }
 0x787   :  { %5754 = vmatpush1.bf16.msra.mxu0 %v8254_v47  ;;  %v8303_v47 = vld [vmem:[%s9388_s13 + $0x128] sm:$0xff]  }
 0x788   :  { %5755 = vmatprep.subr.bf16.mxu0 %v8259_v48  ;;  %v8304_v48 = vld [vmem:[%s9388_s13 + $0x170] sm:$0xff]  }
 0x78b   :  { %5756 = vmatpush1.bf16.msra.mxu0 %v8257_v49  ;;  %v8305_v49 = vld [vmem:[%s9388_s13 + $0x130] sm:$0xff]  }
 0x78e   :  { %5758 = vmatmul.mubr.bf16.vlgmr.msra.gmra.mrb[36].mxu0 %v9184_v41 }
 0x7a1   :  { %v5501_v56 = vpop.f32.mrb[32].mxu0 }
 0x7a2   :  { %v7213_v57 = vadd.f32 %v5501_v56, %v3914_v51  ;;  %v5630_v58 = vpop.f32.mrb[16].mxu1  ;;  %v5503_v1 = vpop.f32.mrb[33].mxu0 }
 0x7a3   :  { %v7217_v61 = vadd.f32 %v5630_v58, %v3922_v52  ;;  %v7214_v41 = vadd.f32 %v5503_v1, %v3918_v55  ;;  %v5632_v62 = vpop.f32.mrb[17].mxu1  ;;  %v5505_v0 = vpop.f32.mrb[34].mxu0 }
 0x7a4   :  { %v7218_v54 = vadd.f32 %v5632_v62, %v3926_v25  ;;  %v7215_v63 = vadd.f32 %v5505_v0, %v3914_v51  ;;  %v5634_v26 = vpop.f32.mrb[18].mxu1  ;;  %v5507_v2 = vpop.f32.mrb[35].mxu0  ;;  %v5768_v5 = vmax.f32 %v7213_v57, 0.0  ;;  %v8306_v51 = vld [vmem:[%s9388_s13 + $0x178] sm:$0xff]  }
 0x7a5   :  { %v7219_v3 = vadd.f32 %v5634_v26, %v3922_v52  ;;  %v7216_v28 = vadd.f32 %v5507_v2, %v3918_v55  ;;  %v5636_v4 = vpop.f32.mrb[19].mxu1  ;;  %v5770_v7 = vmax.f32 %v7217_v61, 0.0  ;;  %v5769_v30 = vmax.f32 %v7214_v41, 0.0  ;;  %v8307_v52 = vld [vmem:[%s9388_s13 + $0x138] sm:$0xff]   ;;  %s8659_s13 = smov [#allocation23]  }
 0x7a6   :  { %v5774_v27 = vmax.f32 %v7215_v63, 0.0  ;;  %v7220_v6 = vadd.f32 %v5636_v4, %v3926_v25  ;;  %v5771_v11 = vmax.f32 %v7218_v54, 0.0  ;;  %v3930_v55 = vrot.slane %v9251_v50, %v8937_v34  ;;  %s6331_s24 = sshll.u32 %s8659_s13, 4  ;;  %s6332_s24 = int_to_ptr.vmem [resolvable:$true] %s6331_s24 }
 0x7a7   :  { %v5776_v8 = vmax.f32 %v7219_v3, 0.0  ;;  %v5775_v9 = vmax.f32 %v7216_v28, 0.0  ;;  %v3934_v25 = vrot.slane %v9251_v50, %v8940_v40  ;;  %s8599_s5 = scalar_lea.vmem %s6332_s24, 256  ;;  %p8604_p7 = scmp.lt.s32.totalorder %s6332_s24, %s6332_s24 }
 0x7a8   :  { %v5780_v12 = vpack.c.bf16 %v5774_v27, %v5768_v5  ;;  %v5777_v14 = vmax.f32 %v7220_v6, 0.0  ;;  %v7020_v6 = vld [vmem:[#allocation22] ss:$0 sm:$0xff]  ;;  %p8600_p6 = scmp.ne.s32.totalorder %s6332_s24, %s8599_s5  ;;  %p8605_p8 = scmp.lt.s32.totalorder %s8599_s5, %s8599_s5 }
 0x7a9   :  { %v5782_v15 = vpack.c.bf16 %v5776_v8, %v5770_v7  ;;  %v5781_v17 = vpack.c.bf16 %v5775_v9, %v5769_v30 }
 0x7aa   :  { %v5783_v19 = vpack.c.bf16 %v5777_v14, %v5771_v11  ;;  %p8606_p9 = por %p8605_p8, %p8604_p7 }
 0x7ab   :  { %6209 = vmatprep.mubr.bf16.mxu1 %v5781_v17 }
 0x7ac   :  { %6210 = vmatmul.mubr.bf16.vlgmr.msra.gmra.mrb[20].mxu1 %v5780_v12  ;;  %p8607_p10 = pnand %p8606_p9, %p8600_p6 }
 0x7ad   :  { %7158 = vmatpush3.bf16.msra.mxu1 %v8277_v18  ;;  %6250 = vmatprep.mubr.bf16.mxu1 %v5783_v19 }
 0x7ae   :  { %7159 = vmatprep.subr.bf16.mxu1 %v8278_v20  ;;  %v6303_v20 = vpop.permute.xlu0 %6302 }
 0x7b1   :  { %7160 = vmatpush3.bf16.msra.mxu1 %v8279_v21 }
 0x7b2   :  { %7161 = vmatprep.subr.bf16.mxu1 %v8280_v22  ;;  %v6305_v22 = vpop.permute.xlu1 %6304 }
 0x7b5   :  { %7162 = vmatpush3.bf16.msra.mxu1 %v8281_v23 }
 0x7b6   :  { %7163 = vmatprep.subr.bf16.mxu1 %v8282_v24 }
 0x7b9   :  { %7164 = vmatpush3.bf16.msra.mxu1 %v8283_v10 }
 0x7ba   :  { %7165 = vmatprep.subr.bf16.mxu1 %v8284_v29 }
 0x7bd   :  { %7166 = vmatpush3.bf16.msra.mxu1 %v8285_v59 }
 0x7be   :  { %7167 = vmatprep.subr.bf16.mxu1 %v8286_v32  ;;  %v6311_v32 = vpop.permute.xlu0 %6310 }
 0x7c1   :  { %7168 = vmatpush3.bf16.msra.mxu1 %v8287_v42 }
 0x7c2   :  { %7169 = vmatprep.subr.bf16.mxu1 %v8288_v31 }
 0x7c5   :  { %7170 = vmatpush3.bf16.msra.mxu1 %v8289_v33 }
 0x7c6   :  { %7171 = vmatprep.subr.bf16.mxu1 %v8290_v60  ;;  %v6313_v60 = vpop.permute.xlu1 %6312 }
 0x7c9   :  { %7172 = vmatpush3.bf16.msra.mxu1 %v8291_v35 }
 0x7ca   :  { %7179 = vmatprep.subr.bf16.mxu1 %v8292_v53 }
 0x7cc   :  { %6251 = vmatmul.mubr.bf16.vlgmr.msra.gmra.mrb[24].mxu1 %v5782_v15 }
 0x7cd   :  { %7180 = vmatpush3.bf16.msra.mxu1 %v8293_v36 }
 0x7ce   :  { %7181 = vmatprep.subr.bf16.mxu1 %v8294_v13 }
 0x7d1   :  { %7182 = vmatpush3.bf16.msra.mxu1 %v8295_v37 }
 0x7d2   :  { %7183 = vmatprep.subr.bf16.mxu1 %v8296_v16 }
 0x7d5   :  { %7184 = vmatpush3.bf16.msra.mxu1 %v8297_v38 }
 0x7d6   :  { %7185 = vmatprep.subr.bf16.mxu1 %v8298_v39 }
 0x7d9   :  { %7186 = vmatpush3.bf16.msra.mxu1 %v8299_v43 }
 0x7da   :  { %7187 = vmatprep.subr.bf16.mxu1 %v8300_v44 }
 0x7dd   :  { %7188 = vmatpush3.bf16.msra.mxu1 %v8301_v45 }
 0x7de   :  { %7189 = vmatprep.subr.bf16.mxu1 %v8302_v46 }
 0x7e1   :  { %7190 = vmatpush3.bf16.msra.mxu1 %v8303_v47 }
 0x7e2   :  { %7191 = vmatprep.subr.bf16.mxu1 %v8304_v48 }
 0x7e5   :  { %7192 = vmatpush3.bf16.msra.mxu1 %v8305_v49 }
 0x7e6   :  { %7193 = vmatprep.subr.bf16.mxu1 %v8306_v51 }
 0x7e9   :  { %7194 = vmatpush3.bf16.msra.mxu1 %v8307_v52 }
 0x861   :  { %v5759_v56 = vpop.f32.mrb[36].mxu0 }
 0x862   :  { %v7221_v57 = vadd.f32 %v5759_v56, %v3930_v55  ;;  %v5761_v58 = vpop.f32.mrb[37].mxu0 }
 0x863   :  { %v7222_v1 = vadd.f32 %v5761_v58, %v3934_v25  ;;  %v5763_v61 = vpop.f32.mrb[38].mxu0 }
 0x864   :  { %v7223_v41 = vadd.f32 %v5763_v61, %v3930_v55  ;;  %v5765_v62 = vpop.f32.mrb[39].mxu0  ;;  %v5772_v54 = vmax.f32 %v7221_v57, 0.0 }
 0x865   :  { %v7224_v0 = vadd.f32 %v5765_v62, %v3934_v25  ;;  %v5773_v26 = vmax.f32 %v7222_v1, 0.0 }
 0x866   :  { %v5778_v63 = vmax.f32 %v7223_v41, 0.0 }
 0x867   :  { %v5779_v2 = vmax.f32 %v7224_v0, 0.0 }
 0x868   :  { %v5784_v3 = vpack.c.bf16 %v5778_v63, %v5772_v54 }
 0x869   :  { %v5785_v28 = vpack.c.bf16 %v5779_v2, %v5773_v26 }
 0x86b   :  { %6291 = vmatprep.mubr.bf16.mxu1 %v5785_v28 }
 0x86c   :  { %6292 = vmatmul.mubr.bf16.vlgmr.msra.gmra.mrb[28].mxu1 %v5784_v3 }
 0x87f   :  { %v7151_v34 = vpop.f32.mrb[20].mxu1 }
 0x880   :  { %v7152_v4 = vpop.f32.mrb[21].mxu1 }
 0x881   :  { %v7153_v5 = vadd.f32 %v7152_v4, %v7151_v34  ;;  %v7154_v40 = vpop.f32.mrb[22].mxu1 }
 0x882   :  { %v7155_v50 = vpop.f32.mrb[23].mxu1 }
 0x883   :  { %v7156_v27 = vadd.f32 %v7155_v50, %v7154_v40  ;;  %v6212_v8 = vadd.f32 %v7153_v5, %v7020_v6 }
 0x885   :  { %v6215_v14 = vadd.f32 %v7156_v27, %v7020_v6 }
 0x89f   :  { %v7173_v7 = vpop.f32.mrb[24].mxu1 }
 0x8a0   :  { %v7174_v30 = vpop.f32.mrb[25].mxu1 }
 0x8a1   :  { %v7175_v9 = vadd.f32 %v7174_v30, %v7173_v7  ;;  %v7176_v11 = vpop.f32.mrb[26].mxu1 }
 0x8a2   :  { %v7177_v12 = vpop.f32.mrb[27].mxu1 }
 0x8a3   :  { %v6253_v15 = vadd.f32 %v7175_v9, %v6212_v8  ;;  %v7178_v17 = vadd.f32 %v7177_v12, %v7176_v11 }
 0x8a5   :  { %v6256_v18 = vadd.f32 %v7178_v17, %v6215_v14 }
 0x93f   :  { %v7195_v19 = vpop.f32.mrb[28].mxu1 }
 0x940   :  { %v7196_v21 = vpop.f32.mrb[29].mxu1 }
 0x941   :  { %v7197_v23 = vadd.f32 %v7196_v21, %v7195_v19  ;;  %v7198_v24 = vpop.f32.mrb[30].mxu1 }
 0x942   :  { %v7199_v10 = vpop.f32.mrb[31].mxu1 }
 0x943   :  { %v6294_v29 = vadd.f32 %v7197_v23, %v6253_v15  ;;  %v7200_v59 = vadd.f32 %v7199_v10, %v7198_v24 }
 0x945   :  { %v6317_v42 = vsel %vm6316_vm3, %v6294_v29, %v6303_v20  ;;  %v6297_v31 = vadd.f32 %v7200_v59, %v6256_v18 }
 0x946   :  { %v6319_v33 = vsel %vm309_vm1, %v6317_v42, %v6311_v32 }
 0x947   :  { %v6318_v35 = vsel %vm6316_vm3, %v6297_v31, %v6305_v22  ;;  %v6322_v53 = vsel %vm6321_vm4, %v6319_v33, 0.0 }
 0x948   :  { %v6320_v36 = vsel %vm309_vm1, %v6318_v35, %v6313_v60  ;;  %6324 = vst [vmem:[#allocation23] sm:$0xff] %v6322_v53 }
 0x949   :  { %v6323_v13 = vsel %vm6321_vm4, %v6320_v36, 0.0 }
 0x94a   :  { %6325 = vst [vmem:[#allocation23 + $0x8] sm:$0xff] %v6323_v13 }
 0x94b   :  { %8610 = shalt.err (!%p8607_p10)
}
 0x94c   :  { %s9393_s25 = sld [smem:[#allocation32_spill]] }
 0x952   :  { %s8611_s18 = scalar_lea.hbm %s9393_s25, 256 }
 0x953   :  { %p8612_p11 = scmp.ne.s32.totalorder %s9393_s25, %s8611_s18  ;;  %p8615_p12 = scmp.lt.u32.totalorder %s8611_s18, %s9393_s25 }
 0x955   :  { %p8617_p13 = pnand %p8615_p12, %p8612_p11 }
 0x957   :  { %8620 = shalt.err (!%p8617_p13)
}
 0x958   :  { %6337 = dma.vmem_to_hbm [thread:$0]  %s6332_s24, 256, %s9393_s25, [#allocation4], %s8638_s28, %s8638_s28, %s8639_s29  }
 0x959   :  { %8635 = dma.done.wait [#allocation4], 256  }
 0x95a   :  { %8636 = vsyncadd [#allocation4], 4294967040 }
 0x95b   :  { %6341 = vsyncpa [#allocation3], 1 }
 0x95c   :  { %6342 = vsyncpa [#allocation6], 1 }
 0x95d   :  { %6343 = vsyncpa [#allocation9], 1 }
 0x95e   :  { %6344 = vsyncpa [#allocation12], 1 }
 0x95f   :  { %6345 = vsyncpa [#allocation15], 1 }
 0x960   :  { %6346 = vsyncpa [#allocation18], 1 }
 0x961   :  { %6347 = vsyncpa [#allocation21], 1 }
 0x962   :  { %6348 = vsyncpa [#allocation4], 1 }

</bundles_post_ra>
